<compile_context>
chip_gen: v6e
topology: v6e:2x2x1
jax: 0.10.0
libtpu: 0.0.40
codegen_flags: <defaults>
</compile_context>

<pallas_src>
import functools

import numpy as np

import jax
import jax.numpy as jnp
from jax.experimental import pallas as pl
from jax.experimental.pallas import tpu as pltpu


# ---------------------------------------------------------------------------
# Fixed architecture of the chosen config
# ---------------------------------------------------------------------------
C_IN = 4                # tensor_shape[0]  (also the final output channel count)
F_ENC = 8               # encoder CONV_3x3 filters
C_MID = 2 * F_ENC       # channels after the 1x1 expansion / entering the pool
F_DEC = 8               # decoder CONV_3x3 filters == ConvTranspose channels

_TAPS3 = tuple((dy, dx) for dy in (-1, 0, 1) for dx in (-1, 0, 1))
_PHASES = ((0, 0), (0, 1), (1, 0), (1, 1))
# (kernel tap ky/kx, phase-grid shift du/dv) pairs for each output parity of the
# ConvTranspose2d(k=4, stride=2, padding=1) polyphase decomposition.
_PHASE_TAPS = {0: ((1, 0), (3, -1)), 1: ((0, 1), (2, 0))}


def _wb_layout():
    """Static (row0,row1,col0,col1) slices of the packed weight/bias buffer."""
    cpad_e = -(-C_IN // 8) * 8                      # encoder Cin padded to 8
    lay, r = {}, 0
    lay["we3"] = (r, r + F_ENC, 0, 9 * cpad_e)
    lay["be3"] = (r, r + F_ENC, 9 * cpad_e, 9 * cpad_e + 1); r += F_ENC
    lay["we1"] = (r, r + C_MID, 0, F_ENC)
    lay["be1"] = (r, r + C_MID, F_ENC, F_ENC + 1);           r += C_MID
    lay["wd3"] = (r, r + F_DEC, 0, 9 * C_MID)
    lay["bd3"] = (r, r + F_DEC, 9 * C_MID, 9 * C_MID + 1);   r += F_DEC
    lay["wt"]  = (r, r + 4 * F_DEC, 0, 4 * F_DEC)
    lay["bt"]  = (r, r + F_DEC, 4 * F_DEC, 4 * F_DEC + 1);   r += 4 * F_DEC
    lay["wd1"] = (r, r + C_IN, 0, F_DEC)
    lay["bd1"] = (r, r + C_IN, F_DEC, F_DEC + 1);            r += C_IN
    return lay, r, 9 * C_MID + 1                    # rows=68, cols=145


_LAYOUT, _WB_ROWS, _WB_COLS = _wb_layout()


# ---------------------------------------------------------------------------
# The fused Pallas kernel (whole autoencoder forward)
# ---------------------------------------------------------------------------
def _fused_ae_kernel(x_ref, wb_ref, cL_ref, cLh_ref, o_ref,
                     enc_line, enc_patch, pool_line, dec_line,
                     *, N, H, W, lay):
    f32 = jnp.float32
    Hh, Wh = H // 2, W // 2
    HW, HhWh = H * W, Hh * Wh
    L, Lh = N * HW, N * HhWh
    pad_e, pad_d = W + 1, Wh + 1
    C = x_ref.shape[1]
    cb_e = enc_line.shape[0]

    def wslc(name):                                  # static slice of packed weights
        r0, r1, c0, c1 = lay[name]
        return wb_ref[r0:r1, c0:c1]

    def emask(t):                                    # (1, L) boundary mask, tap t
        return cL_ref[4 * Lh + t: 4 * Lh + t + 1, :]

    def dmask(t):                                    # (1, Lh) boundary mask, tap t
        return cLh_ref[L + t: L + t + 1, :]

    relu = lambda v: jnp.maximum(v, 0.0)
    dot = lambda a, b: jnp.dot(a, b, preferred_element_type=f32)

    # ---------------- encoder: Conv3x3(p=1)+ReLU -> Conv1x1+ReLU ----------------
    # Padded line buffer: zero ONLY the pad columns + channel-pad rows, then data.
    enc_line[:, 0:pad_e] = jnp.zeros((cb_e, pad_e), f32)
    enc_line[:, pad_e + L: pad_e + L + pad_e] = jnp.zeros((cb_e, pad_e), f32)
    if C < cb_e:
        enc_line[C:cb_e, pad_e:pad_e + L] = jnp.zeros((cb_e - C, L), f32)
    for n in range(N):            # in-kernel NCHW -> lane-dense (C, N*H*W) layout
        enc_line[0:C, pad_e + n * HW: pad_e + (n + 1) * HW] = x_ref[n]

    # im2col via statically shifted lane-window loads * precomputed boundary masks.
    for t, (dy, dx) in enumerate(_TAPS3):
        d = dy * W + dx
        enc_patch[t * cb_e:(t + 1) * cb_e, :] = (
            emask(t) * enc_line[:, pad_e + d: pad_e + d + L])
    h1 = relu(dot(wslc("we3"), enc_patch[...]) + wslc("be3"))      # (8, L)
    h2 = relu(dot(wslc("we1"), h1) + wslc("be1"))                  # (16, L)

    # ---------------- MaxPool2d(2,2) + Tanh ----------------
    c_mid = pool_line.shape[0]
    pool_line[:, L:L + pad_e] = jnp.zeros((c_mid, pad_e), f32)     # pad cols only
    pool_line[:, 0:L] = h2
    m = jnp.maximum(jnp.maximum(h2, pool_line[:, 1:1 + L]),
                    jnp.maximum(pool_line[:, W:W + L],
                                pool_line[:, W + 1:W + 1 + L]))
    # stride-2 decimation = precomputed one-hot gather matmul (lanes stay dense)
    code = jnp.tanh(dot(m, cLh_ref[0:L, :]))                       # (16, Lh)
    # binarize=False -> no rounding of the code

    # ---------------- decoder: Conv3x3(p=1)+ReLU ----------------
    c_dec = dec_line.shape[0]
    dec_line[:, 0:pad_d] = jnp.zeros((c_dec, pad_d), f32)
    dec_line[:, pad_d + Lh: pad_d + Lh + pad_d] = jnp.zeros((c_dec, pad_d), f32)
    dec_line[:, pad_d:pad_d + Lh] = code
    p3 = jnp.concatenate(                                          # (144, Lh) in regs
        [dmask(t) * dec_line[:, pad_d + dy * Wh + dx: pad_d + dy * Wh + dx + Lh]
         for t, (dy, dx) in enumerate(_TAPS3)], axis=0)
    h3 = relu(dot(wslc("wd3"), p3) + wslc("bd3"))                  # (8, Lh)

    # ---------------- ConvTranspose2d(4,s=2,p=1)+ReLU, polyphase, fused with the
    # ---------------- final Conv1x1 + Tanh via the precomputed stacked scatter ----
    F = h3.shape[0]
    dec_line[0:F, pad_d:pad_d + Lh] = h3      # reuse line buffer (pads already 0)
    wt_r0 = lay["wt"][0]
    phase_cols = []
    for ph, (py, px) in enumerate(_PHASES):
        blocks = []
        for _, du in _PHASE_TAPS[py]:
            for _, dv in _PHASE_TAPS[px]:
                t = (du + 1) * 3 + (dv + 1)
                d = du * Wh + dv
                blocks.append(dmask(t) * dec_line[0:F, pad_d + d: pad_d + d + Lh])
        pp = jnp.concatenate(blocks, axis=0)                        # (4F, Lh) in regs
        w_ph = wb_ref[wt_r0 + ph * F: wt_r0 + (ph + 1) * F, 0:4 * F]
        phase_cols.append(relu(dot(w_ph, pp) + wslc("bt")))         # (F, Lh)
    P = jnp.concatenate(phase_cols, axis=1)                         # (F, 4*Lh)
    # Fold the final 1x1 conv in front of the scatter (exact: scatter is one-hot).
    Q = dot(wslc("wd1"), P)                                         # (C, 4*Lh)
    out = jnp.tanh(dot(Q, cL_ref[0:4 * Lh, :]) + wslc("bd1"))       # (C, L)

    for n in range(N):            # lane-dense (C, N*H*W) -> (N, C, H*W) layout
        o_ref[n] = out[:, n * HW:(n + 1) * HW]


# ---------------------------------------------------------------------------
# One-time parameter re-layout + static constant precomputation (off hot path)
# ---------------------------------------------------------------------------
def prepare_params(params, input_shape):
    N, C, H, W = input_shape
    assert C == C_IN and H % 2 == 0 and W % 2 == 0
    Hh, Wh = H // 2, W // 2
    HW, HhWh = H * W, Hh * Wh
    L, Lh = N * HW, N * HhWh

    lay = _LAYOUT
    wb = np.zeros((_WB_ROWS, _WB_COLS), np.float32)

    def put(name, arr):
        r0, r1, c0, c1 = lay[name]
        wb[r0:r1, c0:c1] = np.asarray(arr, np.float32).reshape(r1 - r0, c1 - c0)

    def conv3x3_rows(w):           # (Cout,Cin,3,3) -> (Cout, 9*Cpad), tap-major
        w = np.asarray(w, np.float32)
        co, ci = w.shape[0], w.shape[1]
        cpad = -(-ci // 8) * 8
        wt = np.transpose(w, (0, 2, 3, 1))
        wt = np.pad(wt, ((0, 0), (0, 0), (0, 0), (0, cpad - ci)))
        return wt.reshape(co, -1)

    put("we3", conv3x3_rows(params["enc_w3"]))
    put("be3", np.asarray(params["enc_b3"]).reshape(-1, 1))
    put("we1", np.asarray(params["enc_w1"]).reshape(C_MID, F_ENC))
    put("be1", np.asarray(params["enc_b1"]).reshape(-1, 1))
    put("wd3", conv3x3_rows(params["dec_w3"]))
    put("bd3", np.asarray(params["dec_b3"]).reshape(-1, 1))
    # ConvTranspose2d weight (Cin, Cout, 4, 4) -> polyphase packed (4*Cout, 4*Cin);
    # tap order must match the kernel's (du, dv) window order.
    wt = np.asarray(params["dec_wt"], np.float32)
    ph_blocks = []
    for py, px in _PHASES:
        blocks = [wt[:, :, ky, kx].T
                  for ky, _ in _PHASE_TAPS[py] for kx, _ in _PHASE_TAPS[px]]
        ph_blocks.append(np.concatenate(blocks, axis=1))            # (Cout, 4*Cin)
    put("wt", np.concatenate(ph_blocks, axis=0))
    put("bt", np.asarray(params["dec_bt"]).reshape(-1, 1))
    put("wd1", np.asarray(params["dec_w1"]).reshape(C_IN, F_DEC))
    put("bd1", np.asarray(params["dec_b1"]).reshape(-1, 1))

    # --- static one-hot scatter / gather + boundary masks (exact 0/1 in f32) ---
    r = np.arange(Lh); b = r // HhWh; u = (r % HhWh) // Wh; v = r % Wh
    scatter = np.zeros((4 * Lh, L), np.float32)       # phase-major stacked scatter
    for ph, (py, px) in enumerate(_PHASES):
        scatter[ph * Lh + r, b * HW + (2 * u + py) * W + (2 * v + px)] = 1.0
    i = np.arange(L); y = (i % HW) // W; x = i % W
    masks_e = np.stack([((y + dy >= 0) & (y + dy < H) &
                         (x + dx >= 0) & (x + dx < W)).astype(np.float32)
                        for dy, dx in _TAPS3])                       # (9, L)
    cL = np.concatenate([scatter, masks_e], axis=0)                  # (4*Lh+9, L)

    j = np.arange(Lh); bj = j // HhWh; uj = (j % HhWh) // Wh; vj = j % Wh
    gather = np.zeros((L, Lh), np.float32)            # maxpool stride-2 decimation
    gather[bj * HW + 2 * uj * W + 2 * vj, j] = 1.0
    i2 = np.arange(Lh); y2 = (i2 % HhWh) // Wh; x2 = i2 % Wh
    masks_d = np.stack([((y2 + dy >= 0) & (y2 + dy < Hh) &
                         (x2 + dx >= 0) & (x2 + dx < Wh)).astype(np.float32)
                        for dy, dx in _TAPS3])                       # (9, Lh)
    cLh = np.concatenate([gather, masks_d], axis=0)                  # (L+9, Lh)

    return {"wb": jnp.asarray(wb), "cL": jnp.asarray(cL), "cLh": jnp.asarray(cLh)}


# ---------------------------------------------------------------------------
# Wrapper: one fused pallas_call, 4 input DMAs, free reshapes only
# ---------------------------------------------------------------------------
_VMEM = pl.BlockSpec(memory_space=pltpu.MemorySpace.VMEM)


def _fused_forward(x_flat, wb, cL, cLh, *, N, C, H, W):
    Hh, Wh = H // 2, W // 2
    HW = H * W
    L, Lh = N * HW, N * Hh * Wh
    pad_e, pad_d = W + 1, Wh + 1
    cb_e = -(-C // 8) * 8
    assert cL.shape == (4 * Lh + 9, L) and cLh.shape == (L + 9, Lh)
    assert wb.shape == (_WB_ROWS, _WB_COLS)

    kernel = functools.partial(_fused_ae_kernel, N=N, H=H, W=W, lay=_LAYOUT)
    # Gridless single invocation: at N=2 the problem is launch-bound; working set
    # (~1.6 MB) is far below any generation's VMEM (v7x: 64 MiB), no grid needed.
    return pl.pallas_call(
        kernel,
        out_shape=jax.ShapeDtypeStruct((N, C, HW), jnp.float32),
        in_specs=[_VMEM] * 4,
        out_specs=_VMEM,
        scratch_shapes=[
            pltpu.VMEM((cb_e, L + 2 * pad_e), jnp.float32),    # encoder line buffer
            pltpu.VMEM((9 * cb_e, L), jnp.float32),            # encoder im2col patch
            pltpu.VMEM((C_MID, L + pad_e), jnp.float32),       # maxpool line buffer
            pltpu.VMEM((C_MID, Lh + 2 * pad_d), jnp.float32),  # decoder/convT line buf
        ],
    )(x_flat, wb, cL, cLh)


@jax.jit
def sequential_ae_forward(x_nchw, prepped):
    """SequentialAE.forward.  Public API is NCHW (PyTorch convention)."""
    N, C, H, W = x_nchw.shape
    # Free reshapes only; the NCHW <-> lane-dense layout change happens in-kernel.
    x_flat = x_nchw.reshape(N, C, H * W)
    y = _fused_forward(x_flat, prepped["wb"], prepped["cL"], prepped["cLh"],
                       N=N, C=C, H=H, W=W)
    return y.reshape(N, C, H, W)


# ---------------------------------------------------------------------------
# Pure-JAX (XLA) reference, NCHW like PyTorch, for correctness checking
# ---------------------------------------------------------------------------
def reference_forward(x, p):
    def conv(x, w, b, pad):
        y = jax.lax.conv_general_dilated(
            x, w, (1, 1), ((pad, pad), (pad, pad)),
            dimension_numbers=("NCHW", "OIHW", "NCHW"))
        return y + b[None, :, None, None]

    def convT(x, w, b):  # ConvTranspose2d(k=4, s=2, p=1)
        w_eq = jnp.transpose(w[:, :, ::-1, ::-1], (1, 0, 2, 3))
        y = jax.lax.conv_general_dilated(
            x, w_eq, (1, 1), ((2, 2), (2, 2)), lhs_dilation=(2, 2),
            dimension_numbers=("NCHW", "OIHW", "NCHW"))
        return y + b[None, :, None, None]

    x = jax.nn.relu(conv(x, p["enc_w3"], p["enc_b3"], 1))
    x = jax.nn.relu(conv(x, p["enc_w1"], p["enc_b1"], 0))
    x = jax.lax.reduce_window(x, -jnp.inf, jax.lax.max,
                              (1, 1, 2, 2), (1, 1, 2, 2), "VALID")
    x = jnp.tanh(x)
    x = jax.nn.relu(conv(x, p["dec_w3"], p["dec_b3"], 1))
    x = jax.nn.relu(convT(x, p["dec_wt"], p["dec_bt"]))
    x = jnp.tanh(conv(x, p["dec_w1"], p["dec_b1"], 0))
    return x


# ---------------------------------------------------------------------------
if __name__ == "__main__":
    key = jax.random.PRNGKey(0)
    ks = jax.random.split(key, 11)

    def w(k, shape, scale=0.1):
        return scale * jax.random.normal(k, shape, jnp.float32)

    # Parameter shapes exactly as the PyTorch module constructs them
    # (Conv2d: OIHW, ConvTranspose2d: (Cin, Cout, K, K)).
    params = {
        "enc_w3": w(ks[0], (8, 4, 3, 3)),   "enc_b3": w(ks[1], (8,)),
        "enc_w1": w(ks[2], (16, 8, 1, 1)),  "enc_b1": w(ks[3], (16,)),
        "dec_w3": w(ks[4], (8, 16, 3, 3)),  "dec_b3": w(ks[5], (8,)),
        "dec_wt": w(ks[6], (8, 8, 4, 4)),   "dec_bt": w(ks[7], (8,)),
        "dec_w1": w(ks[8], (4, 8, 1, 1)),   "dec_b1": w(ks[9], (4,)),
    }

    x = jax.random.normal(ks[10], (2, 4, 16, 16), jnp.float32)   # NCHW

    prepped = prepare_params(params, x.shape)   # one-time re-layout + constants
    out = jax.block_until_ready(sequential_ae_forward(x, prepped))
    ref = reference_forward(x, params)

    assert out.shape == (2, 4, 16, 16), out.shape
    assert out.dtype == jnp.float32
    assert jnp.allclose(out, ref, atol=1e-4, rtol=1e-4), float(
        jnp.max(jnp.abs(out - ref)))
    print("KERNEL_OK")
</pallas_src>

<mosaic_0001>
module attributes {stable_mosaic.version = 11 : i64} {
  func.func @_fused_ae_kernel(%arg0: memref<2x4x256xf32, #tpu.memory_space<vmem>>, %arg1: memref<68x145xf32, #tpu.memory_space<vmem>>, %arg2: memref<521x512xf32, #tpu.memory_space<vmem>>, %arg3: memref<521x128xf32, #tpu.memory_space<vmem>>, %arg4: memref<2x4x256xf32, #tpu.memory_space<vmem>>, %arg5: memref<8x546xf32, #tpu.memory_space<vmem>>, %arg6: memref<72x512xf32, #tpu.memory_space<vmem>>, %arg7: memref<16x529xf32, #tpu.memory_space<vmem>>, %arg8: memref<16x146xf32, #tpu.memory_space<vmem>>) attributes {dimension_semantics = [], scalar_prefetch = 0 : i64, scratch_operands = 4 : i64, tpu.core_type = #tpu.core_type<tc>} {
    %cst = arith.constant 0.000000e+00 : f32
    %0 = vector.broadcast %cst : f32 to vector<8x17xf32>
    %c0 = arith.constant 0 : index
    %c0_0 = arith.constant 0 : index
    %1 = vector.load %arg5[%c0, %c0_0] : memref<8x546xf32, #tpu.memory_space<vmem>>, vector<8x17xf32>
    tpu.vector_store %arg5[%c0, %c0_0], %0 {strides = array<i32>} : memref<8x546xf32, #tpu.memory_space<vmem>>, vector<8x17xf32>,
    %cst_1 = arith.constant 0.000000e+00 : f32
    %2 = vector.broadcast %cst_1 : f32 to vector<8x17xf32>
    %c0_2 = arith.constant 0 : index
    %c529 = arith.constant 529 : index
    %3 = vector.load %arg5[%c0_2, %c529] : memref<8x546xf32, #tpu.memory_space<vmem>>, vector<8x17xf32>
    tpu.vector_store %arg5[%c0_2, %c529], %2 {strides = array<i32>} : memref<8x546xf32, #tpu.memory_space<vmem>>, vector<8x17xf32>,
    %cst_3 = arith.constant 0.000000e+00 : f32
    %4 = vector.broadcast %cst_3 : f32 to vector<4x512xf32>
    %c4 = arith.constant 4 : index
    %c17 = arith.constant 17 : index
    %5 = vector.load %arg5[%c4, %c17] : memref<8x546xf32, #tpu.memory_space<vmem>>, vector<4x512xf32>
    tpu.vector_store %arg5[%c4, %c17], %4 {strides = array<i32>} : memref<8x546xf32, #tpu.memory_space<vmem>>, vector<4x512xf32>,
    %c0_4 = arith.constant 0 : index
    %c0_5 = arith.constant 0 : index
    %c0_6 = arith.constant 0 : index
    %6 = vector.load %arg0[%c0_4, %c0_5, %c0_6] : memref<2x4x256xf32, #tpu.memory_space<vmem>>, vector<1x4x256xf32>
    %7 = vector.shape_cast %6 : vector<1x4x256xf32> to vector<4x256xf32>
    %c0_7 = arith.constant 0 : index
    %c17_8 = arith.constant 17 : index
    %8 = vector.load %arg5[%c0_7, %c17_8] : memref<8x546xf32, #tpu.memory_space<vmem>>, vector<4x256xf32>
    tpu.vector_store %arg5[%c0_7, %c17_8], %7 {strides = array<i32>} : memref<8x546xf32, #tpu.memory_space<vmem>>, vector<4x256xf32>,
    %c1 = arith.constant 1 : index
    %c0_9 = arith.constant 0 : index
    %c0_10 = arith.constant 0 : index
    %9 = vector.load %arg0[%c1, %c0_9, %c0_10] : memref<2x4x256xf32, #tpu.memory_space<vmem>>, vector<1x4x256xf32>
    %10 = vector.shape_cast %9 : vector<1x4x256xf32> to vector<4x256xf32>
    %c0_11 = arith.constant 0 : index
    %c273 = arith.constant 273 : index
    %11 = vector.load %arg5[%c0_11, %c273] : memref<8x546xf32, #tpu.memory_space<vmem>>, vector<4x256xf32>
    tpu.vector_store %arg5[%c0_11, %c273], %10 {strides = array<i32>} : memref<8x546xf32, #tpu.memory_space<vmem>>, vector<4x256xf32>,
    %c512 = arith.constant 512 : index
    %c0_12 = arith.constant 0 : index
    %12 = vector.load %arg2[%c512, %c0_12] : memref<521x512xf32, #tpu.memory_space<vmem>>, vector<1x512xf32>
    %c0_13 = arith.constant 0 : index
    %c0_14 = arith.constant 0 : index
    %13 = vector.load %arg5[%c0_13, %c0_14] : memref<8x546xf32, #tpu.memory_space<vmem>>, vector<8x512xf32>
    %14 = vector.broadcast %12 : vector<1x512xf32> to vector<8x512xf32>
    %15 = arith.mulf %14, %13 : vector<8x512xf32>
    %c0_15 = arith.constant 0 : index
    %c0_16 = arith.constant 0 : index
    %16 = vector.load %arg6[%c0_15, %c0_16] : memref<72x512xf32, #tpu.memory_space<vmem>>, vector<8x512xf32>
    tpu.vector_store %arg6[%c0_15, %c0_16], %15 {strides = array<i32>} : memref<72x512xf32, #tpu.memory_space<vmem>>, vector<8x512xf32>,
    %c513 = arith.constant 513 : index
    %c0_17 = arith.constant 0 : index
    %17 = vector.load %arg2[%c513, %c0_17] : memref<521x512xf32, #tpu.memory_space<vmem>>, vector<1x512xf32>
    %c0_18 = arith.constant 0 : index
    %c1_19 = arith.constant 1 : index
    %18 = vector.load %arg5[%c0_18, %c1_19] : memref<8x546xf32, #tpu.memory_space<vmem>>, vector<8x512xf32>
    %19 = vector.broadcast %17 : vector<1x512xf32> to vector<8x512xf32>
    %20 = arith.mulf %19, %18 : vector<8x512xf32>
    %c8 = arith.constant 8 : index
    %c0_20 = arith.constant 0 : index
    %21 = vector.load %arg6[%c8, %c0_20] : memref<72x512xf32, #tpu.memory_space<vmem>>, vector<8x512xf32>
    tpu.vector_store %arg6[%c8, %c0_20], %20 {strides = array<i32>} : memref<72x512xf32, #tpu.memory_space<vmem>>, vector<8x512xf32>,
    %c514 = arith.constant 514 : index
    %c0_21 = arith.constant 0 : index
    %22 = vector.load %arg2[%c514, %c0_21] : memref<521x512xf32, #tpu.memory_space<vmem>>, vector<1x512xf32>
    %c0_22 = arith.constant 0 : index
    %c2 = arith.constant 2 : index
    %23 = vector.load %arg5[%c0_22, %c2] : memref<8x546xf32, #tpu.memory_space<vmem>>, vector<8x512xf32>
    %24 = vector.broadcast %22 : vector<1x512xf32> to vector<8x512xf32>
    %25 = arith.mulf %24, %23 : vector<8x512xf32>
    %c16 = arith.constant 16 : index
    %c0_23 = arith.constant 0 : index
    %26 = vector.load %arg6[%c16, %c0_23] : memref<72x512xf32, #tpu.memory_space<vmem>>, vector<8x512xf32>
    tpu.vector_store %arg6[%c16, %c0_23], %25 {strides = array<i32>} : memref<72x512xf32, #tpu.memory_space<vmem>>, vector<8x512xf32>,
    %c515 = arith.constant 515 : index
    %c0_24 = arith.constant 0 : index
    %27 = vector.load %arg2[%c515, %c0_24] : memref<521x512xf32, #tpu.memory_space<vmem>>, vector<1x512xf32>
    %c0_25 = arith.constant 0 : index
    %c16_26 = arith.constant 16 : index
    %28 = vector.load %arg5[%c0_25, %c16_26] : memref<8x546xf32, #tpu.memory_space<vmem>>, vector<8x512xf32>
    %29 = vector.broadcast %27 : vector<1x512xf32> to vector<8x512xf32>
    %30 = arith.mulf %29, %28 : vector<8x512xf32>
    %c24 = arith.constant 24 : index
    %c0_27 = arith.constant 0 : index
    %31 = vector.load %arg6[%c24, %c0_27] : memref<72x512xf32, #tpu.memory_space<vmem>>, vector<8x512xf32>
    tpu.vector_store %arg6[%c24, %c0_27], %30 {strides = array<i32>} : memref<72x512xf32, #tpu.memory_space<vmem>>, vector<8x512xf32>,
    %c516 = arith.constant 516 : index
    %c0_28 = arith.constant 0 : index
    %32 = vector.load %arg2[%c516, %c0_28] : memref<521x512xf32, #tpu.memory_space<vmem>>, vector<1x512xf32>
    %c0_29 = arith.constant 0 : index
    %c17_30 = arith.constant 17 : index
    %33 = vector.load %arg5[%c0_29, %c17_30] : memref<8x546xf32, #tpu.memory_space<vmem>>, vector<8x512xf32>
    %34 = vector.broadcast %32 : vector<1x512xf32> to vector<8x512xf32>
    %35 = arith.mulf %34, %33 : vector<8x512xf32>
    %c32 = arith.constant 32 : index
    %c0_31 = arith.constant 0 : index
    %36 = vector.load %arg6[%c32, %c0_31] : memref<72x512xf32, #tpu.memory_space<vmem>>, vector<8x512xf32>
    tpu.vector_store %arg6[%c32, %c0_31], %35 {strides = array<i32>} : memref<72x512xf32, #tpu.memory_space<vmem>>, vector<8x512xf32>,
    %c517 = arith.constant 517 : index
    %c0_32 = arith.constant 0 : index
    %37 = vector.load %arg2[%c517, %c0_32] : memref<521x512xf32, #tpu.memory_space<vmem>>, vector<1x512xf32>
    %c0_33 = arith.constant 0 : index
    %c18 = arith.constant 18 : index
    %38 = vector.load %arg5[%c0_33, %c18] : memref<8x546xf32, #tpu.memory_space<vmem>>, vector<8x512xf32>
    %39 = vector.broadcast %37 : vector<1x512xf32> to vector<8x512xf32>
    %40 = arith.mulf %39, %38 : vector<8x512xf32>
    %c40 = arith.constant 40 : index
    %c0_34 = arith.constant 0 : index
    %41 = vector.load %arg6[%c40, %c0_34] : memref<72x512xf32, #tpu.memory_space<vmem>>, vector<8x512xf32>
    tpu.vector_store %arg6[%c40, %c0_34], %40 {strides = array<i32>} : memref<72x512xf32, #tpu.memory_space<vmem>>, vector<8x512xf32>,
    %c518 = arith.constant 518 : index
    %c0_35 = arith.constant 0 : index
    %42 = vector.load %arg2[%c518, %c0_35] : memref<521x512xf32, #tpu.memory_space<vmem>>, vector<1x512xf32>
    %c0_36 = arith.constant 0 : index
    %c32_37 = arith.constant 32 : index
    %43 = vector.load %arg5[%c0_36, %c32_37] : memref<8x546xf32, #tpu.memory_space<vmem>>, vector<8x512xf32>
    %44 = vector.broadcast %42 : vector<1x512xf32> to vector<8x512xf32>
    %45 = arith.mulf %44, %43 : vector<8x512xf32>
    %c48 = arith.constant 48 : index
    %c0_38 = arith.constant 0 : index
    %46 = vector.load %arg6[%c48, %c0_38] : memref<72x512xf32, #tpu.memory_space<vmem>>, vector<8x512xf32>
    tpu.vector_store %arg6[%c48, %c0_38], %45 {strides = array<i32>} : memref<72x512xf32, #tpu.memory_space<vmem>>, vector<8x512xf32>,
    %c519 = arith.constant 519 : index
    %c0_39 = arith.constant 0 : index
    %47 = vector.load %arg2[%c519, %c0_39] : memref<521x512xf32, #tpu.memory_space<vmem>>, vector<1x512xf32>
    %c0_40 = arith.constant 0 : index
    %c33 = arith.constant 33 : index
    %48 = vector.load %arg5[%c0_40, %c33] : memref<8x546xf32, #tpu.memory_space<vmem>>, vector<8x512xf32>
    %49 = vector.broadcast %47 : vector<1x512xf32> to vector<8x512xf32>
    %50 = arith.mulf %49, %48 : vector<8x512xf32>
    %c56 = arith.constant 56 : index
    %c0_41 = arith.constant 0 : index
    %51 = vector.load %arg6[%c56, %c0_41] : memref<72x512xf32, #tpu.memory_space<vmem>>, vector<8x512xf32>
    tpu.vector_store %arg6[%c56, %c0_41], %50 {strides = array<i32>} : memref<72x512xf32, #tpu.memory_space<vmem>>, vector<8x512xf32>,
    %c520 = arith.constant 520 : index
    %c0_42 = arith.constant 0 : index
    %52 = vector.load %arg2[%c520, %c0_42] : memref<521x512xf32, #tpu.memory_space<vmem>>, vector<1x512xf32>
    %c0_43 = arith.constant 0 : index
    %c34 = arith.constant 34 : index
    %53 = vector.load %arg5[%c0_43, %c34] : memref<8x546xf32, #tpu.memory_space<vmem>>, vector<8x512xf32>
    %54 = vector.broadcast %52 : vector<1x512xf32> to vector<8x512xf32>
    %55 = arith.mulf %54, %53 : vector<8x512xf32>
    %c64 = arith.constant 64 : index
    %c0_44 = arith.constant 0 : index
    %56 = vector.load %arg6[%c64, %c0_44] : memref<72x512xf32, #tpu.memory_space<vmem>>, vector<8x512xf32>
    tpu.vector_store %arg6[%c64, %c0_44], %55 {strides = array<i32>} : memref<72x512xf32, #tpu.memory_space<vmem>>, vector<8x512xf32>,
    %c0_45 = arith.constant 0 : index
    %c0_46 = arith.constant 0 : index
    %57 = vector.load %arg1[%c0_45, %c0_46] : memref<68x145xf32, #tpu.memory_space<vmem>>, vector<8x72xf32>
    %c0_47 = arith.constant 0 : index
    %c0_48 = arith.constant 0 : index
    %58 = vector.load %arg6[%c0_47, %c0_48] : memref<72x512xf32, #tpu.memory_space<vmem>>, vector<72x512xf32>
    %cst_49 = arith.constant dense<0.000000e+00> : vector<8x512xf32>
    %59 = tpu.matmul %57, %58, %cst_49 {dimension_numbers = #tpu.dot_dimension_numbers<[1], [0], [0], [1], [0, 0, 1, 1], [], []>} : vector<8x72xf32>, vector<72x512xf32>, vector<8x512xf32> -> vector<8x512xf32>
    %c0_50 = arith.constant 0 : index
    %c72 = arith.constant 72 : index
    %60 = vector.load %arg1[%c0_50, %c72] : memref<68x145xf32, #tpu.memory_space<vmem>>, vector<8x1xf32>
    %61 = vector.broadcast %60 : vector<8x1xf32> to vector<8x512xf32>
    %62 = arith.addf %59, %61 : vector<8x512xf32>
    %cst_51 = arith.constant 0.000000e+00 : f32
    %63 = vector.broadcast %cst_51 : f32 to vector<8x512xf32>
    %64 = arith.maximumf %62, %63 : vector<8x512xf32>
    %c8_52 = arith.constant 8 : index
    %c0_53 = arith.constant 0 : index
    %65 = vector.load %arg1[%c8_52, %c0_53] : memref<68x145xf32, #tpu.memory_space<vmem>>, vector<16x8xf32>
    %cst_54 = arith.constant dense<0.000000e+00> : vector<16x512xf32>
    %66 = tpu.matmul %65, %64, %cst_54 {dimension_numbers = #tpu.dot_dimension_numbers<[1], [0], [0], [1], [0, 0, 1, 1], [], []>} : vector<16x8xf32>, vector<8x512xf32>, vector<16x512xf32> -> vector<16x512xf32>
    %c8_55 = arith.constant 8 : index
    %c8_56 = arith.constant 8 : index
    %67 = vector.load %arg1[%c8_55, %c8_56] : memref<68x145xf32, #tpu.memory_space<vmem>>, vector<16x1xf32>
    %68 = vector.broadcast %67 : vector<16x1xf32> to vector<16x512xf32>
    %69 = arith.addf %66, %68 : vector<16x512xf32>
    %cst_57 = arith.constant 0.000000e+00 : f32
    %70 = vector.broadcast %cst_57 : f32 to vector<16x512xf32>
    %71 = arith.maximumf %69, %70 : vector<16x512xf32>
    %cst_58 = arith.constant 0.000000e+00 : f32
    %72 = vector.broadcast %cst_58 : f32 to vector<16x17xf32>
    %c0_59 = arith.constant 0 : index
    %c512_60 = arith.constant 512 : index
    %73 = vector.load %arg7[%c0_59, %c512_60] : memref<16x529xf32, #tpu.memory_space<vmem>>, vector<16x17xf32>
    tpu.vector_store %arg7[%c0_59, %c512_60], %72 {strides = array<i32>} : memref<16x529xf32, #tpu.memory_space<vmem>>, vector<16x17xf32>,
    %c0_61 = arith.constant 0 : index
    %c0_62 = arith.constant 0 : index
    %74 = vector.load %arg7[%c0_61, %c0_62] : memref<16x529xf32, #tpu.memory_space<vmem>>, vector<16x512xf32>
    tpu.vector_store %arg7[%c0_61, %c0_62], %71 {strides = array<i32>} : memref<16x529xf32, #tpu.memory_space<vmem>>, vector<16x512xf32>,
    %c0_63 = arith.constant 0 : index
    %c1_64 = arith.constant 1 : index
    %75 = vector.load %arg7[%c0_63, %c1_64] : memref<16x529xf32, #tpu.memory_space<vmem>>, vector<16x512xf32>
    %76 = arith.maximumf %71, %75 : vector<16x512xf32>
    %c0_65 = arith.constant 0 : index
    %c16_66 = arith.constant 16 : index
    %77 = vector.load %arg7[%c0_65, %c16_66] : memref<16x529xf32, #tpu.memory_space<vmem>>, vector<16x512xf32>
    %c0_67 = arith.constant 0 : index
    %c17_68 = arith.constant 17 : index
    %78 = vector.load %arg7[%c0_67, %c17_68] : memref<16x529xf32, #tpu.memory_space<vmem>>, vector<16x512xf32>
    %79 = arith.maximumf %77, %78 : vector<16x512xf32>
    %80 = arith.maximumf %76, %79 : vector<16x512xf32>
    %c0_69 = arith.constant 0 : index
    %c0_70 = arith.constant 0 : index
    %81 = vector.load %arg3[%c0_69, %c0_70] : memref<521x128xf32, #tpu.memory_space<vmem>>, vector<512x128xf32>
    %cst_71 = arith.constant dense<0.000000e+00> : vector<16x128xf32>
    %82 = tpu.matmul %80, %81, %cst_71 {dimension_numbers = #tpu.dot_dimension_numbers<[1], [0], [0], [1], [0, 0, 1, 1], [], []>} : vector<16x512xf32>, vector<512x128xf32>, vector<16x128xf32> -> vector<16x128xf32>
    %83 = math.tanh %82 : vector<16x128xf32>
    %cst_72 = arith.constant 0.000000e+00 : f32
    %84 = vector.broadcast %cst_72 : f32 to vector<16x9xf32>
    %c0_73 = arith.constant 0 : index
    %c0_74 = arith.constant 0 : index
    %85 = vector.load %arg8[%c0_73, %c0_74] : memref<16x146xf32, #tpu.memory_space<vmem>>, vector<16x9xf32>
    tpu.vector_store %arg8[%c0_73, %c0_74], %84 {strides = array<i32>} : memref<16x146xf32, #tpu.memory_space<vmem>>, vector<16x9xf32>,
    %cst_75 = arith.constant 0.000000e+00 : f32
    %86 = vector.broadcast %cst_75 : f32 to vector<16x9xf32>
    %c0_76 = arith.constant 0 : index
    %c137 = arith.constant 137 : index
    %87 = vector.load %arg8[%c0_76, %c137] : memref<16x146xf32, #tpu.memory_space<vmem>>, vector<16x9xf32>
    tpu.vector_store %arg8[%c0_76, %c137], %86 {strides = array<i32>} : memref<16x146xf32, #tpu.memory_space<vmem>>, vector<16x9xf32>,
    %c0_77 = arith.constant 0 : index
    %c9 = arith.constant 9 : index
    %88 = vector.load %arg8[%c0_77, %c9] : memref<16x146xf32, #tpu.memory_space<vmem>>, vector<16x128xf32>
    tpu.vector_store %arg8[%c0_77, %c9], %83 {strides = array<i32>} : memref<16x146xf32, #tpu.memory_space<vmem>>, vector<16x128xf32>,
    %c512_78 = arith.constant 512 : index
    %c0_79 = arith.constant 0 : index
    %89 = vector.load %arg3[%c512_78, %c0_79] : memref<521x128xf32, #tpu.memory_space<vmem>>, vector<1x128xf32>
    %c0_80 = arith.constant 0 : index
    %c0_81 = arith.constant 0 : index
    %90 = vector.load %arg8[%c0_80, %c0_81] : memref<16x146xf32, #tpu.memory_space<vmem>>, vector<16x128xf32>
    %91 = vector.broadcast %89 : vector<1x128xf32> to vector<16x128xf32>
    %92 = arith.mulf %91, %90 : vector<16x128xf32>
    %c513_82 = arith.constant 513 : index
    %c0_83 = arith.constant 0 : index
    %93 = vector.load %arg3[%c513_82, %c0_83] : memref<521x128xf32, #tpu.memory_space<vmem>>, vector<1x128xf32>
    %c0_84 = arith.constant 0 : index
    %c1_85 = arith.constant 1 : index
    %94 = vector.load %arg8[%c0_84, %c1_85] : memref<16x146xf32, #tpu.memory_space<vmem>>, vector<16x128xf32>
    %95 = vector.broadcast %93 : vector<1x128xf32> to vector<16x128xf32>
    %96 = arith.mulf %95, %94 : vector<16x128xf32>
    %c514_86 = arith.constant 514 : index
    %c0_87 = arith.constant 0 : index
    %97 = vector.load %arg3[%c514_86, %c0_87] : memref<521x128xf32, #tpu.memory_space<vmem>>, vector<1x128xf32>
    %c0_88 = arith.constant 0 : index
    %c2_89 = arith.constant 2 : index
    %98 = vector.load %arg8[%c0_88, %c2_89] : memref<16x146xf32, #tpu.memory_space<vmem>>, vector<16x128xf32>
    %99 = vector.broadcast %97 : vector<1x128xf32> to vector<16x128xf32>
    %100 = arith.mulf %99, %98 : vector<16x128xf32>
    %c515_90 = arith.constant 515 : index
    %c0_91 = arith.constant 0 : index
    %101 = vector.load %arg3[%c515_90, %c0_91] : memref<521x128xf32, #tpu.memory_space<vmem>>, vector<1x128xf32>
    %c0_92 = arith.constant 0 : index
    %c8_93 = arith.constant 8 : index
    %102 = vector.load %arg8[%c0_92, %c8_93] : memref<16x146xf32, #tpu.memory_space<vmem>>, vector<16x128xf32>
    %103 = vector.broadcast %101 : vector<1x128xf32> to vector<16x128xf32>
    %104 = arith.mulf %103, %102 : vector<16x128xf32>
    %c516_94 = arith.constant 516 : index
    %c0_95 = arith.constant 0 : index
    %105 = vector.load %arg3[%c516_94, %c0_95] : memref<521x128xf32, #tpu.memory_space<vmem>>, vector<1x128xf32>
    %c0_96 = arith.constant 0 : index
    %c9_97 = arith.constant 9 : index
    %106 = vector.load %arg8[%c0_96, %c9_97] : memref<16x146xf32, #tpu.memory_space<vmem>>, vector<16x128xf32>
    %107 = vector.broadcast %105 : vector<1x128xf32> to vector<16x128xf32>
    %108 = arith.mulf %107, %106 : vector<16x128xf32>
    %c517_98 = arith.constant 517 : index
    %c0_99 = arith.constant 0 : index
    %109 = vector.load %arg3[%c517_98, %c0_99] : memref<521x128xf32, #tpu.memory_space<vmem>>, vector<1x128xf32>
    %c0_100 = arith.constant 0 : index
    %c10 = arith.constant 10 : index
    %110 = vector.load %arg8[%c0_100, %c10] : memref<16x146xf32, #tpu.memory_space<vmem>>, vector<16x128xf32>
    %111 = vector.broadcast %109 : vector<1x128xf32> to vector<16x128xf32>
    %112 = arith.mulf %111, %110 : vector<16x128xf32>
    %c518_101 = arith.constant 518 : index
    %c0_102 = arith.constant 0 : index
    %113 = vector.load %arg3[%c518_101, %c0_102] : memref<521x128xf32, #tpu.memory_space<vmem>>, vector<1x128xf32>
    %c0_103 = arith.constant 0 : index
    %c16_104 = arith.constant 16 : index
    %114 = vector.load %arg8[%c0_103, %c16_104] : memref<16x146xf32, #tpu.memory_space<vmem>>, vector<16x128xf32>
    %115 = vector.broadcast %113 : vector<1x128xf32> to vector<16x128xf32>
    %116 = arith.mulf %115, %114 : vector<16x128xf32>
    %c519_105 = arith.constant 519 : index
    %c0_106 = arith.constant 0 : index
    %117 = vector.load %arg3[%c519_105, %c0_106] : memref<521x128xf32, #tpu.memory_space<vmem>>, vector<1x128xf32>
    %c0_107 = arith.constant 0 : index
    %c17_108 = arith.constant 17 : index
    %118 = vector.load %arg8[%c0_107, %c17_108] : memref<16x146xf32, #tpu.memory_space<vmem>>, vector<16x128xf32>
    %119 = vector.broadcast %117 : vector<1x128xf32> to vector<16x128xf32>
    %120 = arith.mulf %119, %118 : vector<16x128xf32>
    %c520_109 = arith.constant 520 : index
    %c0_110 = arith.constant 0 : index
    %121 = vector.load %arg3[%c520_109, %c0_110] : memref<521x128xf32, #tpu.memory_space<vmem>>, vector<1x128xf32>
    %c0_111 = arith.constant 0 : index
    %c18_112 = arith.constant 18 : index
    %122 = vector.load %arg8[%c0_111, %c18_112] : memref<16x146xf32, #tpu.memory_space<vmem>>, vector<16x128xf32>
    %123 = vector.broadcast %121 : vector<1x128xf32> to vector<16x128xf32>
    %124 = arith.mulf %123, %122 : vector<16x128xf32>
    %125 = tpu.concatenate %92, %96, %100, %104, %108, %112, %116, %120, %124 in 0 : vector<16x128xf32>, vector<16x128xf32>, vector<16x128xf32>, vector<16x128xf32>, vector<16x128xf32>, vector<16x128xf32>, vector<16x128xf32>, vector<16x128xf32>, vector<16x128xf32> -> vector<144x128xf32>
    %c24_113 = arith.constant 24 : index
    %c0_114 = arith.constant 0 : index
    %126 = vector.load %arg1[%c24_113, %c0_114] : memref<68x145xf32, #tpu.memory_space<vmem>>, vector<8x144xf32>
    %cst_115 = arith.constant dense<0.000000e+00> : vector<8x128xf32>
    %127 = tpu.matmul %126, %125, %cst_115 {dimension_numbers = #tpu.dot_dimension_numbers<[1], [0], [0], [1], [0, 0, 1, 1], [], []>} : vector<8x144xf32>, vector<144x128xf32>, vector<8x128xf32> -> vector<8x128xf32>
    %c24_116 = arith.constant 24 : index
    %c144 = arith.constant 144 : index
    %128 = vector.load %arg1[%c24_116, %c144] : memref<68x145xf32, #tpu.memory_space<vmem>>, vector<8x1xf32>
    %129 = vector.broadcast %128 : vector<8x1xf32> to vector<8x128xf32>
    %130 = arith.addf %127, %129 : vector<8x128xf32>
    %cst_117 = arith.constant 0.000000e+00 : f32
    %131 = vector.broadcast %cst_117 : f32 to vector<8x128xf32>
    %132 = arith.maximumf %130, %131 : vector<8x128xf32>
    %c0_118 = arith.constant 0 : index
    %c9_119 = arith.constant 9 : index
    %133 = vector.load %arg8[%c0_118, %c9_119] : memref<16x146xf32, #tpu.memory_space<vmem>>, vector<8x128xf32>
    tpu.vector_store %arg8[%c0_118, %c9_119], %132 {strides = array<i32>} : memref<16x146xf32, #tpu.memory_space<vmem>>, vector<8x128xf32>,
    %c516_120 = arith.constant 516 : index
    %c0_121 = arith.constant 0 : index
    %134 = vector.load %arg3[%c516_120, %c0_121] : memref<521x128xf32, #tpu.memory_space<vmem>>, vector<1x128xf32>
    %c0_122 = arith.constant 0 : index
    %c9_123 = arith.constant 9 : index
    %135 = vector.load %arg8[%c0_122, %c9_123] : memref<16x146xf32, #tpu.memory_space<vmem>>, vector<8x128xf32>
    %136 = vector.broadcast %134 : vector<1x128xf32> to vector<8x128xf32>
    %137 = arith.mulf %136, %135 : vector<8x128xf32>
    %c515_124 = arith.constant 515 : index
    %c0_125 = arith.constant 0 : index
    %138 = vector.load %arg3[%c515_124, %c0_125] : memref<521x128xf32, #tpu.memory_space<vmem>>, vector<1x128xf32>
    %c0_126 = arith.constant 0 : index
    %c8_127 = arith.constant 8 : index
    %139 = vector.load %arg8[%c0_126, %c8_127] : memref<16x146xf32, #tpu.memory_space<vmem>>, vector<8x128xf32>
    %140 = vector.broadcast %138 : vector<1x128xf32> to vector<8x128xf32>
    %141 = arith.mulf %140, %139 : vector<8x128xf32>
    %c513_128 = arith.constant 513 : index
    %c0_129 = arith.constant 0 : index
    %142 = vector.load %arg3[%c513_128, %c0_129] : memref<521x128xf32, #tpu.memory_space<vmem>>, vector<1x128xf32>
    %c0_130 = arith.constant 0 : index
    %c1_131 = arith.constant 1 : index
    %143 = vector.load %arg8[%c0_130, %c1_131] : memref<16x146xf32, #tpu.memory_space<vmem>>, vector<8x128xf32>
    %144 = vector.broadcast %142 : vector<1x128xf32> to vector<8x128xf32>
    %145 = arith.mulf %144, %143 : vector<8x128xf32>
    %c512_132 = arith.constant 512 : index
    %c0_133 = arith.constant 0 : index
    %146 = vector.load %arg3[%c512_132, %c0_133] : memref<521x128xf32, #tpu.memory_space<vmem>>, vector<1x128xf32>
    %c0_134 = arith.constant 0 : index
    %c0_135 = arith.constant 0 : index
    %147 = vector.load %arg8[%c0_134, %c0_135] : memref<16x146xf32, #tpu.memory_space<vmem>>, vector<8x128xf32>
    %148 = vector.broadcast %146 : vector<1x128xf32> to vector<8x128xf32>
    %149 = arith.mulf %148, %147 : vector<8x128xf32>
    %150 = tpu.concatenate %137, %141, %145, %149 in 0 : vector<8x128xf32>, vector<8x128xf32>, vector<8x128xf32>, vector<8x128xf32> -> vector<32x128xf32>
    %c32_136 = arith.constant 32 : index
    %c0_137 = arith.constant 0 : index
    %151 = vector.load %arg1[%c32_136, %c0_137] : memref<68x145xf32, #tpu.memory_space<vmem>>, vector<8x32xf32>
    %cst_138 = arith.constant dense<0.000000e+00> : vector<8x128xf32>
    %152 = tpu.matmul %151, %150, %cst_138 {dimension_numbers = #tpu.dot_dimension_numbers<[1], [0], [0], [1], [0, 0, 1, 1], [], []>} : vector<8x32xf32>, vector<32x128xf32>, vector<8x128xf32> -> vector<8x128xf32>
    %c32_139 = arith.constant 32 : index
    %c32_140 = arith.constant 32 : index
    %153 = vector.load %arg1[%c32_139, %c32_140] : memref<68x145xf32, #tpu.memory_space<vmem>>, vector<8x1xf32>
    %154 = vector.broadcast %153 : vector<8x1xf32> to vector<8x128xf32>
    %155 = arith.addf %152, %154 : vector<8x128xf32>
    %cst_141 = arith.constant 0.000000e+00 : f32
    %156 = vector.broadcast %cst_141 : f32 to vector<8x128xf32>
    %157 = arith.maximumf %155, %156 : vector<8x128xf32>
    %c517_142 = arith.constant 517 : index
    %c0_143 = arith.constant 0 : index
    %158 = vector.load %arg3[%c517_142, %c0_143] : memref<521x128xf32, #tpu.memory_space<vmem>>, vector<1x128xf32>
    %c0_144 = arith.constant 0 : index
    %c10_145 = arith.constant 10 : index
    %159 = vector.load %arg8[%c0_144, %c10_145] : memref<16x146xf32, #tpu.memory_space<vmem>>, vector<8x128xf32>
    %160 = vector.broadcast %158 : vector<1x128xf32> to vector<8x128xf32>
    %161 = arith.mulf %160, %159 : vector<8x128xf32>
    %c516_146 = arith.constant 516 : index
    %c0_147 = arith.constant 0 : index
    %162 = vector.load %arg3[%c516_146, %c0_147] : memref<521x128xf32, #tpu.memory_space<vmem>>, vector<1x128xf32>
    %c0_148 = arith.constant 0 : index
    %c9_149 = arith.constant 9 : index
    %163 = vector.load %arg8[%c0_148, %c9_149] : memref<16x146xf32, #tpu.memory_space<vmem>>, vector<8x128xf32>
    %164 = vector.broadcast %162 : vector<1x128xf32> to vector<8x128xf32>
    %165 = arith.mulf %164, %163 : vector<8x128xf32>
    %c514_150 = arith.constant 514 : index
    %c0_151 = arith.constant 0 : index
    %166 = vector.load %arg3[%c514_150, %c0_151] : memref<521x128xf32, #tpu.memory_space<vmem>>, vector<1x128xf32>
    %c0_152 = arith.constant 0 : index
    %c2_153 = arith.constant 2 : index
    %167 = vector.load %arg8[%c0_152, %c2_153] : memref<16x146xf32, #tpu.memory_space<vmem>>, vector<8x128xf32>
    %168 = vector.broadcast %166 : vector<1x128xf32> to vector<8x128xf32>
    %169 = arith.mulf %168, %167 : vector<8x128xf32>
    %c513_154 = arith.constant 513 : index
    %c0_155 = arith.constant 0 : index
    %170 = vector.load %arg3[%c513_154, %c0_155] : memref<521x128xf32, #tpu.memory_space<vmem>>, vector<1x128xf32>
    %c0_156 = arith.constant 0 : index
    %c1_157 = arith.constant 1 : index
    %171 = vector.load %arg8[%c0_156, %c1_157] : memref<16x146xf32, #tpu.memory_space<vmem>>, vector<8x128xf32>
    %172 = vector.broadcast %170 : vector<1x128xf32> to vector<8x128xf32>
    %173 = arith.mulf %172, %171 : vector<8x128xf32>
    %174 = tpu.concatenate %161, %165, %169, %173 in 0 : vector<8x128xf32>, vector<8x128xf32>, vector<8x128xf32>, vector<8x128xf32> -> vector<32x128xf32>
    %c40_158 = arith.constant 40 : index
    %c0_159 = arith.constant 0 : index
    %175 = vector.load %arg1[%c40_158, %c0_159] : memref<68x145xf32, #tpu.memory_space<vmem>>, vector<8x32xf32>
    %cst_160 = arith.constant dense<0.000000e+00> : vector<8x128xf32>
    %176 = tpu.matmul %175, %174, %cst_160 {dimension_numbers = #tpu.dot_dimension_numbers<[1], [0], [0], [1], [0, 0, 1, 1], [], []>} : vector<8x32xf32>, vector<32x128xf32>, vector<8x128xf32> -> vector<8x128xf32>
    %c32_161 = arith.constant 32 : index
    %c32_162 = arith.constant 32 : index
    %177 = vector.load %arg1[%c32_161, %c32_162] : memref<68x145xf32, #tpu.memory_space<vmem>>, vector<8x1xf32>
    %178 = vector.broadcast %177 : vector<8x1xf32> to vector<8x128xf32>
    %179 = arith.addf %176, %178 : vector<8x128xf32>
    %cst_163 = arith.constant 0.000000e+00 : f32
    %180 = vector.broadcast %cst_163 : f32 to vector<8x128xf32>
    %181 = arith.maximumf %179, %180 : vector<8x128xf32>
    %c519_164 = arith.constant 519 : index
    %c0_165 = arith.constant 0 : index
    %182 = vector.load %arg3[%c519_164, %c0_165] : memref<521x128xf32, #tpu.memory_space<vmem>>, vector<1x128xf32>
    %c0_166 = arith.constant 0 : index
    %c17_167 = arith.constant 17 : index
    %183 = vector.load %arg8[%c0_166, %c17_167] : memref<16x146xf32, #tpu.memory_space<vmem>>, vector<8x128xf32>
    %184 = vector.broadcast %182 : vector<1x128xf32> to vector<8x128xf32>
    %185 = arith.mulf %184, %183 : vector<8x128xf32>
    %c518_168 = arith.constant 518 : index
    %c0_169 = arith.constant 0 : index
    %186 = vector.load %arg3[%c518_168, %c0_169] : memref<521x128xf32, #tpu.memory_space<vmem>>, vector<1x128xf32>
    %c0_170 = arith.constant 0 : index
    %c16_171 = arith.constant 16 : index
    %187 = vector.load %arg8[%c0_170, %c16_171] : memref<16x146xf32, #tpu.memory_space<vmem>>, vector<8x128xf32>
    %188 = vector.broadcast %186 : vector<1x128xf32> to vector<8x128xf32>
    %189 = arith.mulf %188, %187 : vector<8x128xf32>
    %c516_172 = arith.constant 516 : index
    %c0_173 = arith.constant 0 : index
    %190 = vector.load %arg3[%c516_172, %c0_173] : memref<521x128xf32, #tpu.memory_space<vmem>>, vector<1x128xf32>
    %c0_174 = arith.constant 0 : index
    %c9_175 = arith.constant 9 : index
    %191 = vector.load %arg8[%c0_174, %c9_175] : memref<16x146xf32, #tpu.memory_space<vmem>>, vector<8x128xf32>
    %192 = vector.broadcast %190 : vector<1x128xf32> to vector<8x128xf32>
    %193 = arith.mulf %192, %191 : vector<8x128xf32>
    %c515_176 = arith.constant 515 : index
    %c0_177 = arith.constant 0 : index
    %194 = vector.load %arg3[%c515_176, %c0_177] : memref<521x128xf32, #tpu.memory_space<vmem>>, vector<1x128xf32>
    %c0_178 = arith.constant 0 : index
    %c8_179 = arith.constant 8 : index
    %195 = vector.load %arg8[%c0_178, %c8_179] : memref<16x146xf32, #tpu.memory_space<vmem>>, vector<8x128xf32>
    %196 = vector.broadcast %194 : vector<1x128xf32> to vector<8x128xf32>
    %197 = arith.mulf %196, %195 : vector<8x128xf32>
    %198 = tpu.concatenate %185, %189, %193, %197 in 0 : vector<8x128xf32>, vector<8x128xf32>, vector<8x128xf32>, vector<8x128xf32> -> vector<32x128xf32>
    %c48_180 = arith.constant 48 : index
    %c0_181 = arith.constant 0 : index
    %199 = vector.load %arg1[%c48_180, %c0_181] : memref<68x145xf32, #tpu.memory_space<vmem>>, vector<8x32xf32>
    %cst_182 = arith.constant dense<0.000000e+00> : vector<8x128xf32>
    %200 = tpu.matmul %199, %198, %cst_182 {dimension_numbers = #tpu.dot_dimension_numbers<[1], [0], [0], [1], [0, 0, 1, 1], [], []>} : vector<8x32xf32>, vector<32x128xf32>, vector<8x128xf32> -> vector<8x128xf32>
    %c32_183 = arith.constant 32 : index
    %c32_184 = arith.constant 32 : index
    %201 = vector.load %arg1[%c32_183, %c32_184] : memref<68x145xf32, #tpu.memory_space<vmem>>, vector<8x1xf32>
    %202 = vector.broadcast %201 : vector<8x1xf32> to vector<8x128xf32>
    %203 = arith.addf %200, %202 : vector<8x128xf32>
    %cst_185 = arith.constant 0.000000e+00 : f32
    %204 = vector.broadcast %cst_185 : f32 to vector<8x128xf32>
    %205 = arith.maximumf %203, %204 : vector<8x128xf32>
    %c520_186 = arith.constant 520 : index
    %c0_187 = arith.constant 0 : index
    %206 = vector.load %arg3[%c520_186, %c0_187] : memref<521x128xf32, #tpu.memory_space<vmem>>, vector<1x128xf32>
    %c0_188 = arith.constant 0 : index
    %c18_189 = arith.constant 18 : index
    %207 = vector.load %arg8[%c0_188, %c18_189] : memref<16x146xf32, #tpu.memory_space<vmem>>, vector<8x128xf32>
    %208 = vector.broadcast %206 : vector<1x128xf32> to vector<8x128xf32>
    %209 = arith.mulf %208, %207 : vector<8x128xf32>
    %c519_190 = arith.constant 519 : index
    %c0_191 = arith.constant 0 : index
    %210 = vector.load %arg3[%c519_190, %c0_191] : memref<521x128xf32, #tpu.memory_space<vmem>>, vector<1x128xf32>
    %c0_192 = arith.constant 0 : index
    %c17_193 = arith.constant 17 : index
    %211 = vector.load %arg8[%c0_192, %c17_193] : memref<16x146xf32, #tpu.memory_space<vmem>>, vector<8x128xf32>
    %212 = vector.broadcast %210 : vector<1x128xf32> to vector<8x128xf32>
    %213 = arith.mulf %212, %211 : vector<8x128xf32>
    %c517_194 = arith.constant 517 : index
    %c0_195 = arith.constant 0 : index
    %214 = vector.load %arg3[%c517_194, %c0_195] : memref<521x128xf32, #tpu.memory_space<vmem>>, vector<1x128xf32>
    %c0_196 = arith.constant 0 : index
    %c10_197 = arith.constant 10 : index
    %215 = vector.load %arg8[%c0_196, %c10_197] : memref<16x146xf32, #tpu.memory_space<vmem>>, vector<8x128xf32>
    %216 = vector.broadcast %214 : vector<1x128xf32> to vector<8x128xf32>
    %217 = arith.mulf %216, %215 : vector<8x128xf32>
    %c516_198 = arith.constant 516 : index
    %c0_199 = arith.constant 0 : index
    %218 = vector.load %arg3[%c516_198, %c0_199] : memref<521x128xf32, #tpu.memory_space<vmem>>, vector<1x128xf32>
    %c0_200 = arith.constant 0 : index
    %c9_201 = arith.constant 9 : index
    %219 = vector.load %arg8[%c0_200, %c9_201] : memref<16x146xf32, #tpu.memory_space<vmem>>, vector<8x128xf32>
    %220 = vector.broadcast %218 : vector<1x128xf32> to vector<8x128xf32>
    %221 = arith.mulf %220, %219 : vector<8x128xf32>
    %222 = tpu.concatenate %209, %213, %217, %221 in 0 : vector<8x128xf32>, vector<8x128xf32>, vector<8x128xf32>, vector<8x128xf32> -> vector<32x128xf32>
    %c56_202 = arith.constant 56 : index
    %c0_203 = arith.constant 0 : index
    %223 = vector.load %arg1[%c56_202, %c0_203] : memref<68x145xf32, #tpu.memory_space<vmem>>, vector<8x32xf32>
    %cst_204 = arith.constant dense<0.000000e+00> : vector<8x128xf32>
    %224 = tpu.matmul %223, %222, %cst_204 {dimension_numbers = #tpu.dot_dimension_numbers<[1], [0], [0], [1], [0, 0, 1, 1], [], []>} : vector<8x32xf32>, vector<32x128xf32>, vector<8x128xf32> -> vector<8x128xf32>
    %c32_205 = arith.constant 32 : index
    %c32_206 = arith.constant 32 : index
    %225 = vector.load %arg1[%c32_205, %c32_206] : memref<68x145xf32, #tpu.memory_space<vmem>>, vector<8x1xf32>
    %226 = vector.broadcast %225 : vector<8x1xf32> to vector<8x128xf32>
    %227 = arith.addf %224, %226 : vector<8x128xf32>
    %cst_207 = arith.constant 0.000000e+00 : f32
    %228 = vector.broadcast %cst_207 : f32 to vector<8x128xf32>
    %229 = arith.maximumf %227, %228 : vector<8x128xf32>
    %230 = tpu.concatenate %157, %181, %205, %229 in 1 : vector<8x128xf32>, vector<8x128xf32>, vector<8x128xf32>, vector<8x128xf32> -> vector<8x512xf32>
    %c64_208 = arith.constant 64 : index
    %c0_209 = arith.constant 0 : index
    %231 = vector.load %arg1[%c64_208, %c0_209] : memref<68x145xf32, #tpu.memory_space<vmem>>, vector<4x8xf32>
    %cst_210 = arith.constant dense<0.000000e+00> : vector<4x512xf32>
    %232 = tpu.matmul %231, %230, %cst_210 {dimension_numbers = #tpu.dot_dimension_numbers<[1], [0], [0], [1], [0, 0, 1, 1], [], []>} : vector<4x8xf32>, vector<8x512xf32>, vector<4x512xf32> -> vector<4x512xf32>
    %c0_211 = arith.constant 0 : index
    %c0_212 = arith.constant 0 : index
    %233 = vector.load %arg2[%c0_211, %c0_212] : memref<521x512xf32, #tpu.memory_space<vmem>>, vector<512x512xf32>
    %cst_213 = arith.constant dense<0.000000e+00> : vector<4x512xf32>
    %234 = tpu.matmul %232, %233, %cst_213 {dimension_numbers = #tpu.dot_dimension_numbers<[1], [0], [0], [1], [0, 0, 1, 1], [], []>} : vector<4x512xf32>, vector<512x512xf32>, vector<4x512xf32> -> vector<4x512xf32>
    %c64_214 = arith.constant 64 : index
    %c8_215 = arith.constant 8 : index
    %235 = vector.load %arg1[%c64_214, %c8_215] : memref<68x145xf32, #tpu.memory_space<vmem>>, vector<4x1xf32>
    %236 = vector.broadcast %235 : vector<4x1xf32> to vector<4x512xf32>
    %237 = arith.addf %234, %236 : vector<4x512xf32>
    %238 = math.tanh %237 : vector<4x512xf32>
    %239 = vector.extract_strided_slice %238 {offsets = [0, 0], sizes = [4, 256], strides = [1, 1]} : vector<4x512xf32> to vector<4x256xf32>
    %c0_216 = arith.constant 0 : index
    %c0_217 = arith.constant 0 : index
    %c0_218 = arith.constant 0 : index
    %240 = vector.load %arg4[%c0_216, %c0_217, %c0_218] : memref<2x4x256xf32, #tpu.memory_space<vmem>>, vector<1x4x256xf32>
    %241 = vector.shape_cast %240 : vector<1x4x256xf32> to vector<4x256xf32>
    %242 = vector.shape_cast %239 : vector<4x256xf32> to vector<1x4x256xf32>
    tpu.vector_store %arg4[%c0_216, %c0_217, %c0_218], %242 {strides = array<i32>} : memref<2x4x256xf32, #tpu.memory_space<vmem>>, vector<1x4x256xf32>,
    %243 = vector.extract_strided_slice %238 {offsets = [0, 256], sizes = [4, 256], strides = [1, 1]} : vector<4x512xf32> to vector<4x256xf32>
    %c1_219 = arith.constant 1 : index
    %c0_220 = arith.constant 0 : index
    %c0_221 = arith.constant 0 : index
    %244 = vector.load %arg4[%c1_219, %c0_220, %c0_221] : memref<2x4x256xf32, #tpu.memory_space<vmem>>, vector<1x4x256xf32>
    %245 = vector.shape_cast %244 : vector<1x4x256xf32> to vector<4x256xf32>
    %246 = vector.shape_cast %243 : vector<4x256xf32> to vector<1x4x256xf32>
    tpu.vector_store %arg4[%c1_219, %c0_220, %c0_221], %246 {strides = array<i32>} : memref<2x4x256xf32, #tpu.memory_space<vmem>>, vector<1x4x256xf32>,
    return
  }
}

</mosaic_0001>

<bundles_post_ra>
// kernel: sequential_ae_forward.1
= control target key start
LH: loop header
LB: loop body
LE: loop exit
PB: predicated region body
PF: predicated region fallthrough
CT: control target
= control target key end

     0   :  { %9 = vsyncpa [#allocation7], 0  ;;  %s3655_s0 = inlined_call_operand.vmem [shape: f32[2,4,256], index: 0, kind: input, shape index: {}]   ;;  %s3656_s1 = inlined_call_operand.hbm [shape: f32[68,145], index: 1, kind: input, shape index: {}]   ;;  %s3657_s2 = inlined_call_operand.hbm [shape: f32[521,512], index: 2, kind: input, shape index: {}]   ;;  %s3658_s3 = inlined_call_operand.hbm [shape: f32[521,128], index: 3, kind: input, shape index: {}]   ;;  %s3659_s4 = inlined_call_operand.vmem [shape: f32[2,4,256], index: 4, kind: output, shape index: {}]  }
   0x1   :  { %10 = vsyncpa [#allocation9], 0  ;;  %s3073_s15 = smov [#allocation8]  }
   0x2   :  { %s30_s16 = sshll.u32 %s3073_s15, 4  ;;  %s31_s16 = int_to_ptr.vmem [resolvable:$true] %s30_s16 }
   0x3   :  { %s3017_s17 = scalar_lea.vmem %s31_s16, 33792  ;;  %p3022_p1 = scmp.lt.s32.totalorder %s31_s16, %s31_s16 }
   0x4   :  { %p3018_p0 = scmp.ne.s32.totalorder %s31_s16, %s3017_s17  ;;  %p3023_p2 = scmp.lt.s32.totalorder %s3017_s17, %s3017_s17 }
   0x6   :  { %p3024_p3 = por %p3023_p2, %p3022_p1 }
   0x8   :  { %p3025_p4 = pnand %p3024_p3, %p3018_p0 }
   0xa   :  { %3028 = shalt.err (!%p3025_p4)
}
   0xb   :  { %s3074_s18 = smov 512   ;;  %s3075_s19 = smov 32  }
   0xc   :  { %36 = dma.hbm_to_vmem [thread:$0]  %s3657_s2, 33792, %s31_s16, [#allocation9], %s3074_s18, %s3074_s18, %s3075_s19  }
   0xd   :  { %s3076_s22 = smov [#allocation6]  }
   0xe   :  { %s18_s23 = sshll.u32 %s3076_s22, 4  ;;  %s19_s23 = int_to_ptr.vmem [resolvable:$true] %s18_s23 }
   0xf   :  { %s3037_s24 = scalar_lea.vmem %s19_s23, 2304  ;;  %p3042_p6 = scmp.lt.s32.totalorder %s19_s23, %s19_s23 }
  0x10   :  { %p3038_p5 = scmp.ne.s32.totalorder %s19_s23, %s3037_s24  ;;  %p3043_p7 = scmp.lt.s32.totalorder %s3037_s24, %s3037_s24 }
  0x12   :  { %p3044_p8 = por %p3043_p7, %p3042_p6 }
  0x14   :  { %p3045_p9 = pnand %p3044_p8, %p3038_p5 }
  0x16   :  { %3048 = shalt.err (!%p3045_p9)
}
  0x17   :  { %s3077_s25 = smov 256   ;;  %s3078_s26 = smov 16  }
  0x18   :  { %24 = dma.hbm_to_vmem [thread:$0]  %s3656_s1, 2304, %s19_s23, [#allocation7], %s3077_s25, %s3077_s25, %s3078_s26  }
  0x19   :  { %s3079_s29 = smov [#allocation10]  }
  0x1a   :  { %s42_s30 = sshll.u32 %s3079_s29, 4  ;;  %s43_s30 = int_to_ptr.vmem [resolvable:$true] %s42_s30 }
  0x1b   :  { %s3057_s2 = scalar_lea.vmem %s43_s30, 8448  ;;  %p3062_p11 = scmp.lt.s32.totalorder %s43_s30, %s43_s30 }
  0x1c   :  { %p3058_p10 = scmp.ne.s32.totalorder %s43_s30, %s3057_s2  ;;  %p3063_p12 = scmp.lt.s32.totalorder %s3057_s2, %s3057_s2 }
  0x1e   :  { %p3064_p13 = por %p3063_p12, %p3062_p11 }
  0x20   :  { %p3065_p0 = pnand %p3064_p13, %p3058_p10 }
  0x22   :  { %3068 = shalt.err (!%p3065_p0)
}
  0x23   :  { %s3080_s5 = smov 128   ;;  %s3081_s6 = smov 8  }
  0x24   :  { %48 = dma.hbm_to_vmem [thread:$0]  %s3658_s3, 8448, %s43_s30, [#allocation9], %s3080_s5, %s3080_s5, %s3081_s6  }
  0x25   :  { %3069 = dma.done.wait [#allocation7], 2304  }
  0x26   :  { %3070 = vsyncadd [#allocation7], 4294964992 }
  0x27   :  { %3071 = dma.done.wait [#allocation9], 42240  }
  0x28   :  { %3072 = vsyncadd [#allocation9], 4294925056  ;;  %vm58_vm0 = vcmask 138240   ;;  %vm62_vm1 = vcmask 1047692   ;;  %v3082_v0 = vmov 0.0   ;;  %vm60_vm2 = vcmask 277640  }
  0x29   :  { %985 = vst.msk [vmem:[#allocation4 + $0x20] sm:$0xff] %vm58_vm0, %v3082_v0  ;;  %986 = vst.msk [vmem:[#allocation4 + $0x48] sm:$0xff] %vm58_vm0, %v3082_v0  ;;  %vm67_vm3 = vcmask 138244   ;;  %724 = vmatprep.mubr.f32.mxu0 %v3082_v0  ;;  %795 = vmatprep.mubr.f32.mxu1 %v3082_v0  ;;  %v69_v1 = vld [vmem:[%s3655_s0] sm:$0xff]  ;;  %v2739_v2 = vld [vmem:[%s3655_s0 + $0x8] sm:$0xff]  ;;  %s3083_s11 = smov 17   ;;  %v107_v28 = vlaneseq }
  0x2a   :  { %59 = vst.msk [vmem:[#allocation2] sm:$0xff] %vm58_vm0, %v3082_v0  ;;  %64 = vst [vmem:[#allocation2 + $0x8] sm:$0xf0] %v3082_v0  ;;  %72 = vrot.lane.b32.xlu0 %v69_v1, %s3083_s11  ;;  %v71_v3 = vcombine.high %v69_v1, %v69_v1  ;;  %89 = vrot.lane.b32.xlu1 %v2739_v2, %s3083_s11  ;;  %v88_v4 = vcombine.high %v2739_v2, %v2739_v2  ;;  %vm80_vm4 = vcmask 1043592   ;;  %vm83_vm5 = vcmask 134144   ;;  %s3084_s0 = smov 94  }
  0x2b   :  { %65 = vst [vmem:[#allocation2 + $0x10] sm:$0xf0] %v3082_v0  ;;  %66 = vst [vmem:[#allocation2 + $0x18] sm:$0xf0] %v3082_v0  ;;  %s3085_s12 = smov 95   ;;  %s3086_s13 = smov 96  }
  0x2c   :  { %63 = vst.msk [vmem:[#allocation2] sm:$0xf0] %vm62_vm1, %v3082_v0  ;;  %s3087_s14 = smov 110   ;;  %s3088_s15 = smov 111   ;;  %v3092_v16 = vmov 72   ;;  %v3227_v17 = vld [vmem:[#allocation6] sm:$0xff] }
  0x2d   :  { %61 = vst.msk [vmem:[#allocation2 + $0x20] sm:$0xff] %vm60_vm2, %v3082_v0  ;;  %s3089_s16 = smov 112   ;;  %s3090_s17 = smov 126   ;;  %2940 = vset.pattern.permute.xlu0 %v3092_v16  ;;  %v108_v31 = vshrl.u32 %v107_v28, 7  ;;  %vm598_vm6 = vcmask 769024   ;;  %vm538_vm7 = vcmask 777216  }
  0x2e   :  { %68 = vst.msk [vmem:[#allocation2 + $0x20] sm:$0xf0] %vm67_vm3, %v3082_v0  ;;  %74 = vrot.lane.b32.xlu0 %v71_v3, %s3083_s11  ;;  %91 = vrot.lane.b32.xlu1 %v88_v4, %s3083_s11  ;;  %s3091_s18 = smov 127   ;;  %v556_v32 = vld [vmem:[#allocation8 + $0x820] ss:$8 sm:$0xf] }
  0x2f   :  { %v3250_v35 = vsub.s32 0, %v108_v31  ;;  %v3252_v36 = vsub.s32 1, %v108_v31  ;;  %v3256_v41 = vsub.s32 3, %v108_v31  ;;  %v3258_v42 = vsub.s32 2, %v108_v31  ;;  %s3094_s19 = smov 9   ;;  %s3095_s20 = smov 118  }
  0x30   :  { %v496_v49 = vld [vmem:[#allocation8 + $0x807] ss:$8 sm:$0xf]  ;;  %v436_v55 = vld [vmem:[#allocation8 + $0x806] ss:$8 sm:$0xf] }
  0x31   :  { %v570_v37 = vrot.slane %v556_v32, %v3252_v36  ;;  %v566_v38 = vrot.slane %v556_v32, %v3250_v35  ;;  %v578_v47 = vrot.slane %v556_v32, %v3256_v41  ;;  %v574_v48 = vrot.slane %v556_v32, %v3258_v42  ;;  %v376_v31 = vld [vmem:[#allocation8 + $0x805] ss:$8 sm:$0xf]  ;;  %s3096_s21 = smov 119   ;;  %s3097_s22 = smov 120  }
  0x32   :  { %v518_v53 = vrot.slane %v496_v49, %v3256_v41  ;;  %v510_v57 = vrot.slane %v496_v49, %v3252_v36  ;;  %v514_v58 = vrot.slane %v496_v49, %v3258_v42  ;;  %v506_v60 = vrot.slane %v496_v49, %v3250_v35 }
  0x33   :  { %v446_v1 = vrot.slane %v436_v55, %v3250_v35  ;;  %vm478_vm8 = vcmask 785408   ;;  %v458_v28 = vrot.slane %v436_v55, %v3256_v41  ;;  %vm418_vm9 = vcmask 900096  }
  0x34   :  { %vm358_vm10 = vcmask 908288   ;;  %vm298_vm11 = vcmask 916480   ;;  %vm238_vm12 = vcmask 1031168   ;;  %vm178_vm13 = vcmask 1039360  }
  0x35   :  { %vm657_vm14 = vcmask 588800   ;;  %vm818_vm15 = vcmask 64512   ;;  %vm1344_vm1 = vcmask 146504   ;;  %vm1355_vm2 = vcmask 1047624  }
  0x36   :  { %1345 = vst.msk [vmem:[#allocation5 + $0x8] sm:$0xff] %vm1344_vm1, %v3082_v0  ;;  %1346 = vst.msk [vmem:[#allocation5 + $0x18] sm:$0xff] %vm1344_vm1, %v3082_v0  ;;  %vm1537_vm3 = vcmask 130048  }
  0x9c   :  { %v73_v5 = vpop.permute.xlu0 %72  ;;  %v90_v6 = vpop.permute.xlu1 %89 }
  0x9d   :  { %81 = vst.msk [vmem:[#allocation2] sm:$0xf] %vm80_vm4, %v73_v5 }
  0xa0   :  { %v75_v7 = vpop.permute.xlu0 %74  ;;  %v92_v8 = vpop.permute.xlu1 %91 }
  0xa1   :  { %v76_v9 = vsel %vm58_vm0, %v73_v5, %v75_v7  ;;  %84 = vst.msk [vmem:[#allocation2 + $0x10] sm:$0xf] %vm83_vm5, %v75_v7  ;;  %v93_v10 = vsel %vm58_vm0, %v90_v6, %v92_v8  ;;  %99 = vst.msk [vmem:[#allocation2 + $0x20] sm:$0xf] %vm83_vm5, %v92_v8  ;;  %v450_v5 = vrot.slane %v436_v55, %v3252_v36  ;;  %vm1341_vm0 = vcmask 72704  }
  0xa2   :  { %82 = vst [vmem:[#allocation2 + $0x8] sm:$0xf] %v76_v9  ;;  %97 = vst.msk [vmem:[#allocation2 + $0x10] sm:$0xf] %vm80_vm4, %v90_v6  ;;  %vm1466_vm4 = vcmask 965632   ;;  %vm1446_vm5 = vcmask 973824  }
  0xa3   :  { %98 = vst [vmem:[#allocation2 + $0x18] sm:$0xf] %v93_v10  ;;  %1342 = vst.msk [vmem:[#allocation5] sm:$0xff] %vm1341_vm0, %v3082_v0 }
  0xa4   :  { %v3157_v11 = vld [vmem:[#allocation2] sm:$0xff]  ;;  %1343 = vst.msk [vmem:[#allocation5 + $0x10] sm:$0xff] %vm1341_vm0, %v3082_v0 }
  0xa5   :  { %588 = vrot.lane.b32.xlu0 %v3157_v11, %s3084_s0  ;;  %528 = vrot.lane.b32.xlu1 %v3157_v11, %s3085_s12 }
  0xa8   :  { %v561_v12 = vld [vmem:[#allocation2 + $0x20] sm:$0xff] }
  0xa9   :  { %468 = vrot.lane.b32.xlu0 %v3157_v11, %s3086_s13  ;;  %408 = vrot.lane.b32.xlu1 %v3157_v11, %s3087_s14  ;;  %v3176_v13 = vld [vmem:[#allocation2 + $0x10] sm:$0xff]  ;;  %v3178_v14 = vld [vmem:[#allocation2 + $0x8] sm:$0xff] }
  0xaa   :  { %v3182_v15 = vld [vmem:[#allocation2 + $0x18] sm:$0xff] }
  0xad   :  { %348 = vrot.lane.b32.xlu0 %v3157_v11, %s3088_s15  ;;  %288 = vrot.lane.b32.xlu1 %v3157_v11, %s3089_s16 }
  0xb1   :  { %596 = vrot.lane.b32.xlu1 %v561_v12, %s3084_s0  ;;  %228 = vrot.lane.b32.xlu0 %v3157_v11, %s3090_s17 }
  0xb5   :  { %476 = vrot.lane.b32.xlu1 %v561_v12, %s3086_s13  ;;  %536 = vrot.lane.b32.xlu0 %v561_v12, %s3085_s12 }
  0xb9   :  { %356 = vrot.lane.b32.xlu1 %v561_v12, %s3088_s15  ;;  %416 = vrot.lane.b32.xlu0 %v561_v12, %s3087_s14 }
  0xbd   :  { %236 = vrot.lane.b32.xlu1 %v561_v12, %s3090_s17  ;;  %296 = vrot.lane.b32.xlu0 %v561_v12, %s3089_s16 }
  0xc1   :  { %592 = vrot.lane.b32.xlu1 %v3176_v13, %s3084_s0  ;;  %590 = vrot.lane.b32.xlu0 %v3178_v14, %s3084_s0 }
  0xc5   :  { %530 = vrot.lane.b32.xlu1 %v3178_v14, %s3085_s12  ;;  %594 = vrot.lane.b32.xlu0 %v3182_v15, %s3084_s0 }
  0xc9   :  { %534 = vrot.lane.b32.xlu1 %v3182_v15, %s3085_s12  ;;  %532 = vrot.lane.b32.xlu0 %v3176_v13, %s3085_s12 }
  0xcd   :  { %472 = vrot.lane.b32.xlu1 %v3176_v13, %s3086_s13  ;;  %470 = vrot.lane.b32.xlu0 %v3178_v14, %s3086_s13 }
  0xd1   :  { %410 = vrot.lane.b32.xlu1 %v3178_v14, %s3087_s14  ;;  %474 = vrot.lane.b32.xlu0 %v3182_v15, %s3086_s13 }
  0xd5   :  { %414 = vrot.lane.b32.xlu1 %v3182_v15, %s3087_s14  ;;  %412 = vrot.lane.b32.xlu0 %v3176_v13, %s3087_s14 }
  0xd9   :  { %352 = vrot.lane.b32.xlu1 %v3176_v13, %s3088_s15  ;;  %350 = vrot.lane.b32.xlu0 %v3178_v14, %s3088_s15 }
  0xdd   :  { %290 = vrot.lane.b32.xlu1 %v3178_v14, %s3089_s16  ;;  %354 = vrot.lane.b32.xlu0 %v3182_v15, %s3088_s15 }
  0xe1   :  { %294 = vrot.lane.b32.xlu1 %v3182_v15, %s3089_s16  ;;  %292 = vrot.lane.b32.xlu0 %v3176_v13, %s3089_s16 }
  0xe5   :  { %232 = vrot.lane.b32.xlu1 %v3176_v13, %s3090_s17  ;;  %230 = vrot.lane.b32.xlu0 %v3178_v14, %s3090_s17 }
  0xe9   :  { %170 = vrot.lane.b32.xlu1 %v3178_v14, %s3091_s18  ;;  %234 = vrot.lane.b32.xlu0 %v3182_v15, %s3090_s17 }
  0xed   :  { %174 = vrot.lane.b32.xlu1 %v3182_v15, %s3091_s18  ;;  %172 = vrot.lane.b32.xlu0 %v3176_v13, %s3091_s18 }
  0xf1   :  { %176 = vrot.lane.b32.xlu0 %v561_v12, %s3091_s18  ;;  %168 = vrot.lane.b32.xlu1 %v3157_v11, %s3091_s18 }
  0xf5   :  { %654 = vperm.xlu0 %2940, %v3227_v17  }
 0x117   :  { %v589_v18 = vpop.permute.xlu0 %588  ;;  %v529_v19 = vpop.permute.xlu1 %528 }
 0x11b   :  { %v3230_v20 = vpop.permute.xlu0 %468  ;;  %v3232_v21 = vpop.permute.xlu1 %408 }
 0x11f   :  { %v3234_v22 = vpop.permute.xlu0 %348  ;;  %v3236_v23 = vpop.permute.xlu1 %288 }
 0x123   :  { %v597_v24 = vpop.permute.xlu1 %596  ;;  %v3238_v25 = vpop.permute.xlu0 %228 }
 0x127   :  { %v3240_v26 = vpop.permute.xlu1 %476  ;;  %v537_v27 = vpop.permute.xlu0 %536 }
 0x12b   :  { %v3242_v29 = vpop.permute.xlu1 %356  ;;  %v3244_v30 = vpop.permute.xlu0 %416 }
 0x12f   :  { %v3246_v33 = vpop.permute.xlu1 %236  ;;  %v3248_v34 = vpop.permute.xlu0 %296 }
 0x133   :  { %v593_v39 = vpop.permute.xlu1 %592  ;;  %v591_v40 = vpop.permute.xlu0 %590 }
 0x134   :  { %v599_v43 = vsel %vm598_vm6, %v589_v18, %v591_v40  ;;  %v600_v44 = vsel %vm598_vm6, %v591_v40, %v593_v39  ;;  %v316_v40 = vld [vmem:[#allocation8 + $0x804] ss:$8 sm:$0xf] }
 0x135   :  { %v608_v45 = vmul.f32 %v600_v44, %v570_v37  ;;  %v607_v46 = vmul.f32 %v599_v43, %v566_v38 }
 0x137   :  { %v531_v50 = vpop.permute.xlu1 %530  ;;  %674 = vmatprep.subr.mxu0 %v608_v45  ;;  %v595_v51 = vpop.permute.xlu0 %594  ;;  %v390_v45 = vrot.slane %v376_v31, %v3252_v36 }
 0x138   :  { %v601_v52 = vsel %vm598_vm6, %v593_v39, %v595_v51  ;;  %675 = vmatpush1.msra.mxu0 %v607_v46  ;;  %v602_v54 = vsel %vm598_vm6, %v595_v51, %v597_v24  ;;  %v539_v61 = vsel %vm538_vm7, %v529_v19, %v531_v50  ;;  %v398_v39 = vrot.slane %v376_v31, %v3256_v41 }
 0x139   :  { %v610_v56 = vmul.f32 %v602_v54, %v578_v47  ;;  %v609_v59 = vmul.f32 %v601_v52, %v574_v48  ;;  %v547_v9 = vmul.f32 %v539_v61, %v506_v60  ;;  %v394_v46 = vrot.slane %v376_v31, %v3258_v42 }
 0x13a   :  { %v386_v47 = vrot.slane %v376_v31, %v3250_v35  ;;  %v330_v54 = vrot.slane %v316_v40, %v3252_v36  ;;  %vm1426_vm6 = vcmask 982016  }
 0x13b   :  { %v535_v62 = vpop.permute.xlu1 %534  ;;  %745 = vmatprep.subr.mxu1 %v610_v56  ;;  %v533_v63 = vpop.permute.xlu0 %532 }
 0x13c   :  { %v542_v2 = vsel %vm538_vm7, %v535_v62, %v537_v27  ;;  %v540_v3 = vsel %vm538_vm7, %v531_v50, %v533_v63  ;;  %v541_v4 = vsel %vm538_vm7, %v533_v63, %v535_v62  ;;  %746 = vmatpush1.msra.mxu1 %v609_v59  ;;  %v454_v27 = vrot.slane %v436_v55, %v3258_v42 }
 0x13d   :  { %v550_v6 = vmul.f32 %v542_v2, %v518_v53  ;;  %v548_v7 = vmul.f32 %v540_v3, %v510_v57  ;;  %v549_v8 = vmul.f32 %v541_v4, %v514_v58  ;;  %v334_v63 = vrot.slane %v316_v40, %v3258_v42  ;;  %v256_v2 = vld [vmem:[#allocation8 + $0x803] ss:$8 sm:$0xf] }
 0x13e   :  { %vm3099_vm7 = vmmov 0  }
 0x13f   :  { %v473_v10 = vpop.permute.xlu1 %472  ;;  %676 = vmatprep.subr.mxu0 %v548_v7  ;;  %747 = vmatprep.subr.mxu1 %v550_v6  ;;  %v471_v12 = vpop.permute.xlu0 %470  ;;  %v278_v6 = vrot.slane %v256_v2, %v3256_v41  ;;  %v196_v7 = vld [vmem:[#allocation8 + $0x802] ss:$8 sm:$0xf] }
 0x140   :  { %v479_v16 = vsel %vm478_vm8, %v3230_v20, %v471_v12  ;;  %v480_v18 = vsel %vm478_vm8, %v471_v12, %v473_v10  ;;  %677 = vmatpush1.msra.mxu0 %v547_v9  ;;  %748 = vmatpush1.msra.mxu1 %v549_v8  ;;  %v274_v12 = vrot.slane %v256_v2, %v3258_v42 }
 0x141   :  { %v487_v19 = vmul.f32 %v479_v16, %v446_v1  ;;  %v488_v24 = vmul.f32 %v480_v18, %v450_v5  ;;  %v338_v1 = vrot.slane %v316_v40, %v3256_v41  ;;  %v266_v16 = vrot.slane %v256_v2, %v3250_v35 }
 0x143   :  { %v411_v32 = vpop.permute.xlu1 %410  ;;  %678 = vmatprep.subr.mxu0 %v488_v24  ;;  %v475_v37 = vpop.permute.xlu0 %474 }
 0x144   :  { %v481_v38 = vsel %vm478_vm8, %v473_v10, %v475_v37  ;;  %v482_v20 = vsel %vm478_vm8, %v475_v37, %v3240_v26  ;;  %679 = vmatpush1.msra.mxu0 %v487_v19  ;;  %v419_v48 = vsel %vm418_vm9, %v3232_v21, %v411_v32  ;;  %v326_v26 = vrot.slane %v316_v40, %v3250_v35 }
 0x145   :  { %v489_v43 = vmul.f32 %v481_v38, %v454_v27  ;;  %v490_v44 = vmul.f32 %v482_v20, %v458_v28  ;;  %v427_v21 = vmul.f32 %v419_v48, %v386_v47  ;;  %v270_v10 = vrot.slane %v256_v2, %v3252_v36  ;;  %v136_v48 = vld [vmem:[#allocation8 + $0x801] ss:$8 sm:$0xf] }
 0x146   :  { %v218_v47 = vrot.slane %v196_v7, %v3256_v41  ;;  %vm1669_vm8 = vcmask 261120  }
 0x147   :  { %v415_v49 = vpop.permute.xlu1 %414  ;;  %749 = vmatprep.subr.mxu1 %v490_v44  ;;  %v413_v50 = vpop.permute.xlu0 %412 }
 0x148   :  { %v422_v51 = vsel %vm418_vm9, %v415_v49, %v3244_v30  ;;  %v420_v52 = vsel %vm418_vm9, %v411_v32, %v413_v50  ;;  %v421_v53 = vsel %vm418_vm9, %v413_v50, %v415_v49  ;;  %750 = vmatpush1.msra.mxu1 %v489_v43  ;;  %v210_v32 = vrot.slane %v196_v7, %v3252_v36 }
 0x149   :  { %v430_v55 = vmul.f32 %v422_v51, %v398_v39  ;;  %v428_v56 = vmul.f32 %v420_v52, %v390_v45  ;;  %v429_v57 = vmul.f32 %v421_v53, %v394_v46  ;;  %v214_v46 = vrot.slane %v196_v7, %v3258_v42 }
 0x14a   :  { %v150_v53 = vrot.slane %v136_v48, %v3252_v36 }
 0x14b   :  { %v353_v58 = vpop.permute.xlu1 %352  ;;  %680 = vmatprep.subr.mxu0 %v428_v56  ;;  %751 = vmatprep.subr.mxu1 %v430_v55  ;;  %v351_v59 = vpop.permute.xlu0 %350 }
 0x14c   :  { %v359_v60 = vsel %vm358_vm10, %v3234_v22, %v351_v59  ;;  %v360_v30 = vsel %vm358_vm10, %v351_v59, %v353_v58  ;;  %681 = vmatpush1.msra.mxu0 %v427_v21  ;;  %752 = vmatpush1.msra.mxu1 %v429_v57  ;;  %v101_v57 = vld [vmem:[#allocation8 + $0x800] ss:$8 sm:$0xf]  ;;  %v146_v59 = vrot.slane %v136_v48, %v3250_v35 }
 0x14d   :  { %v367_v61 = vmul.f32 %v359_v60, %v326_v26  ;;  %v368_v62 = vmul.f32 %v360_v30, %v330_v54  ;;  %v114_v60 = vrot.slane %v101_v57, %v3252_v36 }
 0x14f   :  { %v291_v3 = vpop.permute.xlu1 %290  ;;  %682 = vmatprep.subr.mxu0 %v368_v62  ;;  %v355_v4 = vpop.permute.xlu0 %354  ;;  %v128_v36 = vmul.f32 %v3178_v14, %v114_v60  ;;  %v806_v14 = vld [vmem:[#allocation6 + $0x10] sm:$0xff] }
 0x150   :  { %v361_v5 = vsel %vm358_vm10, %v353_v58, %v355_v4  ;;  %v362_v22 = vsel %vm358_vm10, %v355_v4, %v3242_v29  ;;  %683 = vmatpush1.msra.mxu0 %v367_v61  ;;  %v299_v18 = vsel %vm298_vm11, %v3236_v23, %v291_v3  ;;  %v206_v29 = vrot.slane %v196_v7, %v3250_v35 }
 0x151   :  { %v369_v8 = vmul.f32 %v361_v5, %v334_v63  ;;  %v370_v9 = vmul.f32 %v362_v22, %v338_v1  ;;  %v307_v23 = vmul.f32 %v299_v18, %v266_v16  ;;  %v158_v58 = vrot.slane %v136_v48, %v3256_v41 }
 0x152   :  { %v110_v63 = vrot.slane %v101_v57, %v3250_v35  ;;  %v122_v1 = vrot.slane %v101_v57, %v3256_v41  ;;  %v118_v4 = vrot.slane %v101_v57, %v3258_v42 }
 0x153   :  { %v295_v19 = vpop.permute.xlu1 %294  ;;  %753 = vmatprep.subr.mxu1 %v370_v9  ;;  %v293_v24 = vpop.permute.xlu0 %292 }
 0x154   :  { %v302_v27 = vsel %vm298_vm11, %v295_v19, %v3248_v34  ;;  %v300_v28 = vsel %vm298_vm11, %v291_v3, %v293_v24  ;;  %v301_v31 = vsel %vm298_vm11, %v293_v24, %v295_v19  ;;  %754 = vmatpush1.msra.mxu1 %v369_v8  ;;  %v127_v7 = vmul.f32 %v3157_v11, %v110_v63  ;;  %v1156_v63 = vld [vmem:[#allocation10 + $0xf8] sm:$0xff] }
 0x155   :  { %v310_v37 = vmul.f32 %v302_v27, %v278_v6  ;;  %v308_v38 = vmul.f32 %v300_v28, %v270_v10  ;;  %v309_v20 = vmul.f32 %v301_v31, %v274_v12  ;;  %v130_v8 = vmul.f32 %v3182_v15, %v122_v1  ;;  %v807_v15 = vld [vmem:[#allocation6 + $0x20] sm:$0xff] }
 0x156   :  { %v129_v35 = vmul.f32 %v3176_v13, %v118_v4  ;;  %v3093_v11 = vmov 8   ;;  %v1171_v1 = vld [vmem:[#allocation10 + $0x170] sm:$0xff] }
 0x157   :  { %v233_v39 = vpop.permute.xlu1 %232  ;;  %684 = vmatprep.subr.mxu0 %v308_v38  ;;  %755 = vmatprep.subr.mxu1 %v310_v37  ;;  %v231_v40 = vpop.permute.xlu0 %230 }
 0x158   :  { %v239_v43 = vsel %vm238_vm12, %v3238_v25, %v231_v40  ;;  %v240_v34 = vsel %vm238_vm12, %v231_v40, %v233_v39  ;;  %685 = vmatpush1.msra.mxu0 %v307_v23  ;;  %756 = vmatpush1.msra.mxu1 %v309_v20 }
 0x159   :  { %v247_v44 = vmul.f32 %v239_v43, %v206_v29  ;;  %v248_v45 = vmul.f32 %v240_v34, %v210_v32  ;;  %2941 = vset.pattern.permute.xlu1 %v3093_v11 }
 0x15a   :  { %810 = vperm.xlu1 %2941, %v806_v14  }
 0x15b   :  { %v171_v49 = vpop.permute.xlu1 %170  ;;  %686 = vmatprep.subr.mxu0 %v248_v45  ;;  %v235_v50 = vpop.permute.xlu0 %234 }
 0x15c   :  { %v241_v26 = vsel %vm238_vm12, %v233_v39, %v235_v50  ;;  %v242_v51 = vsel %vm238_vm12, %v235_v50, %v3246_v33  ;;  %687 = vmatpush1.msra.mxu0 %v247_v44  ;;  %v154_v33 = vrot.slane %v136_v48, %v3258_v42 }
 0x15d   :  { %v249_v25 = vmul.f32 %v241_v26, %v214_v46  ;;  %v250_v52 = vmul.f32 %v242_v51, %v218_v47 }
 0x15e   :  { %815 = vperm.xlu1 %2941, %v807_v15  }
 0x15f   :  { %v175_v54 = vpop.permute.xlu1 %174  ;;  %757 = vmatprep.subr.mxu1 %v250_v52  ;;  %v173_v55 = vpop.permute.xlu0 %172 }
 0x160   :  { %v180_v56 = vsel %vm178_vm13, %v171_v49, %v173_v55  ;;  %758 = vmatpush1.msra.mxu1 %v249_v25  ;;  %v181_v30 = vsel %vm178_vm13, %v173_v55, %v175_v54 }
 0x161   :  { %v188_v21 = vmul.f32 %v180_v56, %v150_v53  ;;  %v189_v6 = vmul.f32 %v181_v30, %v154_v33  ;;  %v3390_v33 = vld [vmem:[#allocation4 + $0x48] sm:$0xff]  ;;  %v1188_v30 = vld [vmem:[#allocation10 + $0x1f8] sm:$0xff] }
 0x163   :  { %688 = vmatprep.subr.mxu0 %v188_v21  ;;  %v177_v61 = vpop.permute.xlu0 %176  ;;  %v169_v62 = vpop.permute.xlu1 %168 }
 0x164   :  { %v182_v2 = vsel %vm178_vm13, %v175_v54, %v177_v61  ;;  %v179_v3 = vsel %vm178_vm13, %v169_v62, %v171_v49  ;;  %v3364_v49 = vld [vmem:[#allocation4 + $0x20] sm:$0xff]  ;;  %v1172_v61 = vld [vmem:[#allocation10 + $0x178] sm:$0xff]  ;;  %v1187_v62 = vld [vmem:[#allocation10 + $0x1f0] sm:$0xff] }
 0x165   :  { %v190_v5 = vmul.f32 %v182_v2, %v158_v58  ;;  %v187_v22 = vmul.f32 %v179_v3, %v146_v59  ;;  %v1140_v2 = vld [vmem:[#allocation10 + $0x78] sm:$0xff]  ;;  %v1186_v3 = vld [vmem:[#allocation10 + $0x1e8] sm:$0xff] }
 0x167   :  { %689 = vmatpush1.msra.mxu0 %v187_v22  ;;  %759 = vmatprep.subr.mxu1 %v190_v5  ;;  %v1155_v5 = vld [vmem:[#allocation10 + $0xf0] sm:$0xff]  ;;  %v1170_v22 = vld [vmem:[#allocation10 + $0x168] sm:$0xff] }
 0x168   :  { %690 = vmatprep.subr.mxu0 %v128_v36  ;;  %760 = vmatpush1.msra.mxu1 %v189_v6  ;;  %v1139_v6 = vld [vmem:[#allocation10 + $0x70] sm:$0xff]  ;;  %v1185_v36 = vld [vmem:[#allocation10 + $0x1e0] sm:$0xff] }
 0x169   :  { %691 = vmatpush1.msra.mxu0 %v127_v7  ;;  %761 = vmatprep.subr.mxu1 %v130_v8  ;;  %v1154_v7 = vld [vmem:[#allocation10 + $0xe8] sm:$0xff]  ;;  %v1169_v8 = vld [vmem:[#allocation10 + $0x160] sm:$0xff] }
 0x16a   :  { %2740 = vmatmul.mubr.msk.f32.vlgmr.msra.gmra.mxu0 %vm657_vm14, %v3227_v17  ;;  %762 = vmatpush1.msra.mxu1 %v129_v35  ;;  %v1138_v35 = vld [vmem:[#allocation10 + $0x68] sm:$0xff] }
 0x16b   :  { %2741 = vmatmul.mubr.msk.f32.vlgmr.msra.gmra.mxu1 %vm657_vm14, %v3227_v17  ;;  %887 = vmatprep.mubr.f32.mxu0 %v3082_v0 }
 0x16c   :  { %964 = vmatprep.mubr.f32.mxu1 %v3082_v0 }
 0x170   :  { %v655_v41 = vpop.permute.xlu0 %654 }
 0x1d5   :  { %v811_v28 = vpop.permute.xlu1 %810 }
 0x1d9   :  { %v816_v23 = vpop.permute.xlu1 %815 }
 0x22a   :  { %v726_v13 = vpop.f32.mrf.mxu0 }
 0x22b   :  { %v797_v42 = vpop.f32.mrf.mxu1  ;;  %v727_v9 = vadd.f32 %v726_v13, %v655_v41  ;;  %v1137_v13 = vld [vmem:[#allocation10 + $0x60] sm:$0xff] }
 0x22c   :  { %v728_v10 = vpop.f32.mrf.mxu0  ;;  %v798_v12 = vadd.f32 %v797_v42, %v655_v41  ;;  %v1183_v42 = vld [vmem:[#allocation10 + $0x1d0] sm:$0xff] }
 0x22d   :  { %v729_v16 = vadd.f32 %v728_v10, %v655_v41  ;;  %v799_v18 = vpop.f32.mrf.mxu1  ;;  %v802_v24 = vmax.f32 %v727_v9, 0.0  ;;  %v1152_v9 = vld [vmem:[#allocation10 + $0xd8] sm:$0xff]  ;;  %v1167_v10 = vld [vmem:[#allocation10 + $0x150] sm:$0xff] }
 0x22e   :  { %v800_v17 = vadd.f32 %v799_v18, %v655_v41  ;;  %v804_v27 = vmax.f32 %v798_v12, 0.0  ;;  %v1168_v41 = vld [vmem:[#allocation10 + $0x158] sm:$0xff]  ;;  %v1151_v18 = vld [vmem:[#allocation10 + $0xd0] sm:$0xff] }
 0x22f   :  { %v803_v19 = vmax.f32 %v729_v16, 0.0  ;;  %v1136_v12 = vld [vmem:[#allocation10 + $0x58] sm:$0xff]  ;;  %v1182_v16 = vld [vmem:[#allocation10 + $0x1c8] sm:$0xff] }
 0x230   :  { %v805_v29 = vmax.f32 %v800_v17, 0.0  ;;  %v1166_v17 = vld [vmem:[#allocation10 + $0x148] sm:$0xff] }
 0x231   :  { %853 = vmatprep.subr.mxu0 %v803_v19  ;;  %v1135_v19 = vld [vmem:[#allocation10 + $0x50] sm:$0xff] }
 0x232   :  { %854 = vmatpush1.msra.mxu0 %v802_v24  ;;  %930 = vmatprep.subr.mxu1 %v805_v29  ;;  %v1181_v24 = vld [vmem:[#allocation10 + $0x1c0] sm:$0xff]  ;;  %v1150_v29 = vld [vmem:[#allocation10 + $0xc8] sm:$0xff] }
 0x233   :  { %2742 = vmatmul.mubr.msk.f32.vlgmr.msra.gmra.mxu0 %vm818_vm15, %v806_v14  ;;  %931 = vmatpush1.msra.mxu1 %v804_v27  ;;  %v1165_v27 = vld [vmem:[#allocation10 + $0x140] sm:$0xff] }
 0x234   :  { %2744 = vmatmul.mubr.msk.f32.vlgmr.msra.gmra.mxu1 %vm818_vm15, %v806_v14  ;;  %893 = vmatprep.mubr.f32.mxu0 %v3082_v0  ;;  %v1184_v14 = vld [vmem:[#allocation10 + $0x1d8] sm:$0xff] }
 0x235   :  { %970 = vmatprep.mubr.f32.mxu1 %v3082_v0  ;;  %2810 = vmatprep.subr.mxu1 %v1188_v30  ;;  %v1146_v30 = vld [vmem:[#allocation10 + $0xa8] sm:$0xff] }
 0x236   :  { %2811 = vmatpush3.msra.mxu1 %v1172_v61  ;;  %2772 = vmatprep.subr.mxu0 %v1156_v63  ;;  %v1161_v61 = vld [vmem:[#allocation10 + $0x120] sm:$0xff]  ;;  %v1176_v63 = vld [vmem:[#allocation10 + $0x198] sm:$0xff] }
 0x237   :  { %2743 = vmatmul.mubr.msk.f32.gmra.mxu0 %vm818_vm15, %v807_v15  ;;  %2812 = vmatprep.subr.mxu1 %v1187_v62  ;;  %v1130_v62 = vld [vmem:[#allocation10 + $0x28] sm:$0xff] }
 0x238   :  { %2745 = vmatmul.mubr.msk.f32.gmra.mxu1 %vm818_vm15, %v807_v15  ;;  %2773 = vmatpush3.msra.mxu0 %v1140_v2  ;;  %v1153_v15 = vld [vmem:[#allocation10 + $0xe0] sm:$0xff]  ;;  %v1160_v2 = vld [vmem:[#allocation10 + $0x118] sm:$0xff] }
 0x239   :  { %2813 = vmatpush3.msra.mxu1 %v1171_v1  ;;  %2774 = vmatprep.subr.mxu0 %v1155_v5  ;;  %v1145_v1 = vld [vmem:[#allocation10 + $0xa0] sm:$0xff]  ;;  %v1144_v5 = vld [vmem:[#allocation10 + $0x98] sm:$0xff] }
 0x23a   :  { %2814 = vmatprep.subr.mxu1 %v1186_v3  ;;  %2775 = vmatpush3.msra.mxu0 %v1139_v6  ;;  %v1129_v3 = vld [vmem:[#allocation10 + $0x20] sm:$0xff]  ;;  %v1128_v6 = vld [vmem:[#allocation10 + $0x18] sm:$0xff] }
 0x23b   :  { %2815 = vmatpush3.msra.mxu1 %v1170_v22  ;;  %2776 = vmatprep.subr.mxu0 %v1154_v7  ;;  %v1159_v22 = vld [vmem:[#allocation10 + $0x110] sm:$0xff] }
 0x23c   :  { %2816 = vmatprep.subr.mxu1 %v1185_v36  ;;  %2777 = vmatpush3.msra.mxu0 %v1138_v35  ;;  %v1174_v36 = vld [vmem:[#allocation10 + $0x188] sm:$0xff]  ;;  %v1143_v7 = vld [vmem:[#allocation10 + $0x90] sm:$0xff] }
 0x23d   :  { %2817 = vmatpush3.msra.mxu1 %v1169_v8  ;;  %2778 = vmatprep.subr.mxu0 %v1153_v15  ;;  %v1158_v8 = vld [vmem:[#allocation10 + $0x108] sm:$0xff]  ;;  %v1127_v35 = vld [vmem:[#allocation10 + $0x10] sm:$0xff] }
 0x23e   :  { %2818 = vmatprep.subr.mxu1 %v1184_v14  ;;  %2779 = vmatpush3.msra.mxu0 %v1137_v13  ;;  %v1173_v14 = vld [vmem:[#allocation10 + $0x180] sm:$0xff] }
 0x23f   :  { %2819 = vmatpush3.msra.mxu1 %v1168_v41  ;;  %2780 = vmatprep.subr.mxu0 %v1152_v9  ;;  %v1142_v41 = vld [vmem:[#allocation10 + $0x88] sm:$0xff]  ;;  %v1157_v13 = vld [vmem:[#allocation10 + $0x100] sm:$0xff] }
 0x240   :  { %2820 = vmatprep.subr.mxu1 %v1183_v42  ;;  %2781 = vmatpush3.msra.mxu0 %v1136_v12  ;;  %v1126_v12 = vld [vmem:[#allocation10 + $0x8] sm:$0xff] }
 0x241   :  { %2821 = vmatpush3.msra.mxu1 %v1167_v10  ;;  %2782 = vmatprep.subr.mxu0 %v1151_v18 }
 0x242   :  { %2822 = vmatprep.subr.mxu1 %v1182_v16  ;;  %2783 = vmatpush3.msra.mxu0 %v1135_v19 }
 0x243   :  { %2823 = vmatpush3.msra.mxu1 %v1166_v17  ;;  %2784 = vmatprep.subr.mxu0 %v1150_v29  ;;  %v1141_v17 = vld [vmem:[#allocation10 + $0x80] sm:$0xff] }
 0x244   :  { %2824 = vmatprep.subr.mxu1 %v1181_v24  ;;  %v1125_v24 = vld [vmem:[#allocation10] sm:$0xff] }
 0x245   :  { %2825 = vmatpush3.msra.mxu1 %v1165_v27 }
 0x2f3   :  { %v889_v31 = vpop.f32.mrf.mxu0 }
 0x2f4   :  { %v3351_v32 = vadd.f32 %v889_v31, %v811_v28  ;;  %v966_v37 = vpop.f32.mrf.mxu1  ;;  %v1180_v31 = vld [vmem:[#allocation10 + $0x1b8] sm:$0xff] }
 0x2f5   :  { %v3353_v38 = vadd.f32 %v966_v37, %v811_v28  ;;  %v891_v20 = vpop.f32.mrf.mxu0  ;;  %v1149_v37 = vld [vmem:[#allocation10 + $0xc0] sm:$0xff]  ;;  %2826 = vmatprep.subr.mxu1 %v1180_v31 }
 0x2f6   :  { %v977_v39 = vmax.f32 %v3351_v32, 0.0  ;;  %v3356_v40 = vadd.f32 %v891_v20, %v811_v28  ;;  %v968_v43 = vpop.f32.mrf.mxu1  ;;  %v1164_v20 = vld [vmem:[#allocation10 + $0x138] sm:$0xff] }
 0x2f7   :  { %v979_v34 = vmax.f32 %v3353_v38, 0.0  ;;  %v3359_v44 = vadd.f32 %v968_v43, %v811_v28  ;;  %v895_v45 = vpop.f32.mrf.mxu0  ;;  %v1134_v28 = vld [vmem:[#allocation10 + $0x48] sm:$0xff]  ;;  %v1179_v43 = vld [vmem:[#allocation10 + $0x1b0] sm:$0xff]  ;;  %2827 = vmatpush3.msra.mxu1 %v1164_v20 }
 0x2f8   :  { %v978_v46 = vmax.f32 %v3356_v40, 0.0  ;;  %v3362_v47 = vadd.f32 %v895_v45, %v816_v23  ;;  %v972_v48 = vpop.f32.mrf.mxu1  ;;  %2785 = vmatpush3.msra.mxu0 %v1134_v28  ;;  %v1148_v45 = vld [vmem:[#allocation10 + $0xb8] sm:$0xff]  ;;  %2828 = vmatprep.subr.mxu1 %v1179_v43 }
 0x2f9   :  { %v980_v50 = vmax.f32 %v3359_v44, 0.0  ;;  %v3367_v26 = vadd.f32 %v972_v48, %v816_v23  ;;  %v897_v51 = vpop.f32.mrf.mxu0  ;;  %v1163_v48 = vld [vmem:[#allocation10 + $0x130] sm:$0xff]  ;;  %2786 = vmatprep.subr.mxu0 %v1149_v37 }
 0x2fa   :  { %v981_v25 = vmax.f32 %v3362_v47, 0.0  ;;  %v3370_v52 = vadd.f32 %v897_v51, %v816_v23  ;;  %v974_v53 = vpop.f32.mrf.mxu1  ;;  %v2942_v54 = vpack.i.bf16 %v979_v34, %v978_v46  ;;  %v1132_v51 = vld [vmem:[#allocation10 + $0x38] sm:$0xff]  ;;  %2829 = vmatpush3.msra.mxu1 %v1163_v48 }
 0x2fb   :  { %v983_v55 = vmax.f32 %v3367_v26, 0.0  ;;  %v3377_v56 = vadd.f32 %v974_v53, %v816_v23  ;;  %v2947_v57 = vpack.i.bf16 %v3364_v49, %v980_v50  ;;  %v1133_v23 = vld [vmem:[#allocation10 + $0x40] sm:$0xff]  ;;  %v1178_v53 = vld [vmem:[#allocation10 + $0x1a8] sm:$0xff] }
 0x2fc   :  { %v982_v21 = vmax.f32 %v3370_v52, 0.0  ;;  %2943 = vrot.lane.b32.xlu0 %v2942_v54, %s3091_s18  ;;  %v2962_v4 = vpack.i.bf16 %v981_v25, %v3390_v33  ;;  %2787 = vmatpush3.msra.mxu0 %v1133_v23  ;;  %v1147_v54 = vld [vmem:[#allocation10 + $0xb0] sm:$0xff] }
 0x2fd   :  { %v984_v58 = vmax.f32 %v3377_v56, 0.0  ;;  %2948 = vrot.lane.b32.xlu1 %v2947_v57, %s3091_s18  ;;  %v1162_v57 = vld [vmem:[#allocation10 + $0x128] sm:$0xff]  ;;  %2788 = vmatprep.subr.mxu0 %v1148_v45 }
 0x2fe   :  { %v2952_v59 = vpack.i.bf16 %v982_v21, %v977_v39  ;;  %2789 = vmatpush3.msra.mxu0 %v1132_v51  ;;  %2830 = vmatprep.subr.mxu1 %v1178_v53 }
 0x2ff   :  { %v2957_v60 = vpack.i.bf16 %v984_v58, %v983_v55  ;;  %2790 = vmatprep.subr.mxu0 %v1147_v54  ;;  %2831 = vmatpush3.msra.mxu1 %v1162_v57 }
 0x300   :  { %2953 = vrot.lane.b32.xlu0 %v2952_v59, %s3091_s18  ;;  %v1131_v59 = vld [vmem:[#allocation10 + $0x30] sm:$0xff] }
 0x301   :  { %2958 = vrot.lane.b32.xlu1 %v2957_v60, %s3091_s18  ;;  %v1177_v60 = vld [vmem:[#allocation10 + $0x1a0] sm:$0xff]  ;;  %2791 = vmatpush3.msra.mxu0 %v1131_v59 }
 0x302   :  { %2832 = vmatprep.subr.mxu1 %v1177_v60  ;;  %2792 = vmatprep.subr.mxu0 %v1146_v30 }
 0x303   :  { %2833 = vmatpush3.msra.mxu1 %v1161_v61  ;;  %2793 = vmatpush3.msra.mxu0 %v1130_v62 }
 0x304   :  { %2963 = vrot.lane.b32.xlu0 %v2962_v4, %s3091_s18  ;;  %2834 = vmatprep.subr.mxu1 %v1176_v63  ;;  %v1175_v4 = vld [vmem:[#allocation10 + $0x190] sm:$0xff] }
 0x305   :  { %2794 = vmatprep.subr.mxu0 %v1145_v1  ;;  %2835 = vmatpush3.msra.mxu1 %v1160_v2 }
 0x306   :  { %2795 = vmatpush3.msra.mxu0 %v1129_v3  ;;  %2836 = vmatprep.subr.mxu1 %v1175_v4 }
 0x307   :  { %2796 = vmatprep.subr.mxu0 %v1144_v5  ;;  %2837 = vmatpush3.msra.mxu1 %v1159_v22 }
 0x308   :  { %2797 = vmatpush3.msra.mxu0 %v1128_v6  ;;  %2838 = vmatprep.subr.mxu1 %v1174_v36 }
 0x309   :  { %2798 = vmatprep.subr.mxu0 %v1143_v7  ;;  %2839 = vmatpush3.msra.mxu1 %v1158_v8 }
 0x30a   :  { %2799 = vmatpush3.msra.mxu0 %v1127_v35  ;;  %2840 = vmatprep.subr.mxu1 %v1173_v14 }
 0x30b   :  { %2800 = vmatprep.subr.mxu0 %v1142_v41  ;;  %2841 = vmatpush3.msra.mxu1 %v1157_v13 }
 0x30c   :  { %2801 = vmatpush3.msra.mxu0 %v1126_v12  ;;  %2868 = vmatprep.subr.mxu1 %v3082_v0 }
 0x30d   :  { %2802 = vmatprep.subr.mxu0 %v1141_v17 }
 0x30e   :  { %2803 = vmatpush3.msra.mxu0 %v1125_v24 }
 0x30f   :  { %1540 = vmatprep.subr.mxu0 %v3082_v0 }
 0x36e   :  { %v2944_v15 = vpop.permute.xlu0 %2943 }
 0x36f   :  { %v2946_v42 = vunpack.i.h.bf16 %v2944_v15  ;;  %v2945_v9 = vunpack.i.l.bf16 %v2944_v15  ;;  %v2949_v10 = vpop.permute.xlu1 %2948 }
 0x370   :  { %v2951_v16 = vunpack.i.h.bf16 %v2949_v10  ;;  %v2950_v18 = vunpack.i.l.bf16 %v2949_v10 }
 0x371   :  { %v1036_v19 = vsel %vm178_vm13, %v2945_v9, %v2946_v42 }
 0x372   :  { %v1065_v29 = vmax.f32 %v3364_v49, %v2951_v16  ;;  %v1037_v27 = vsel %vm178_vm13, %v2946_v42, %v2950_v18  ;;  %v1038_v28 = vsel %vm178_vm13, %v2950_v18, %v2951_v16  ;;  %v2954_v31 = vpop.permute.xlu0 %2953  ;;  %v1062_v37 = vmax.f32 %v978_v46, %v1036_v19 }
 0x373   :  { %v1053_v20 = vmax.f32 %v979_v34, %v1037_v27  ;;  %v2956_v23 = vunpack.i.h.bf16 %v2954_v31  ;;  %v2955_v43 = vunpack.i.l.bf16 %v2954_v31  ;;  %v2959_v45 = vpop.permute.xlu1 %2958  ;;  %v1064_v48 = vmax.f32 %v980_v50, %v1038_v28 }
 0x374   :  { %v2961_v49 = vunpack.i.h.bf16 %v2959_v45  ;;  %v2960_v51 = vunpack.i.l.bf16 %v2959_v45 }
 0x375   :  { %v1035_v53 = vsel %vm178_vm13, %v2955_v43, %v2945_v9  ;;  %v2967_v54 = vpack.i.bf16 %v1053_v20, %v1062_v37  ;;  %v2972_v57 = vpack.i.bf16 %v1065_v29, %v1064_v48 }
 0x376   :  { %v1051_v40 = vmax.f32 %v977_v39, %v1035_v53  ;;  %v1040_v38 = vsel %vm178_vm13, %v2956_v23, %v2960_v51  ;;  %v2964_v34 = vpop.permute.xlu0 %2963  ;;  %v1041_v46 = vsel %vm178_vm13, %v2960_v51, %v2961_v49 }
 0x377   :  { %v2966_v59 = vunpack.i.h.bf16 %v2964_v34  ;;  %v2965_v60 = vunpack.i.l.bf16 %v2964_v34  ;;  %2968 = vrot.lane.b32.xlu1 %v2967_v54, %s3089_s16  ;;  %2973 = vrot.lane.b32.xlu0 %v2972_v57, %s3089_s16  ;;  %v1067_v44 = vmax.f32 %v982_v21, %v1040_v38  ;;  %v1068_v61 = vmax.f32 %v983_v55, %v1041_v46 }
 0x379   :  { %v1039_v50 = vsel %vm178_vm13, %v2966_v59, %v2956_v23  ;;  %v1042_v30 = vsel %vm178_vm13, %v2961_v49, %v2965_v60  ;;  %v1070_v32 = vmax.f32 %v3390_v33, %v2965_v60  ;;  %v2977_v39 = vpack.i.bf16 %v1067_v44, %v1051_v40 }
 0x37a   :  { %v1069_v62 = vmax.f32 %v984_v58, %v1042_v30  ;;  %v1066_v63 = vmax.f32 %v981_v25, %v1039_v50  ;;  %v1531_v50 = vld [vmem:[#allocation6 + $0x38] sm:$0xff]  ;;  %v3098_v30 = vmov 16  }
 0x37b   :  { %2978 = vrot.lane.b32.xlu1 %v2977_v39, %s3089_s16  ;;  %2992 = vset.pattern.permute.xlu0 %v3098_v30 }
 0x37c   :  { %v2982_v52 = vpack.i.bf16 %v1069_v62, %v1068_v61  ;;  %v2987_v21 = vpack.i.bf16 %v1066_v63, %v1070_v32 }
 0x37e   :  { %2983 = vrot.lane.b32.xlu0 %v2982_v52, %s3089_s16 }
 0x37f   :  { %2988 = vrot.lane.b32.xlu1 %v2987_v21, %s3089_s16 }
 0x3e9   :  { %v2969_v1 = vpop.permute.xlu1 %2968  ;;  %v2974_v33 = vpop.permute.xlu0 %2973 }
 0x3ea   :  { %v2971_v2 = vunpack.i.h.bf16 %v2969_v1  ;;  %v2970_v3 = vunpack.i.l.bf16 %v2969_v1  ;;  %v2976_v26 = vunpack.i.h.bf16 %v2974_v33  ;;  %v2975_v55 = vunpack.i.l.bf16 %v2974_v33 }
 0x3ec   :  { %v1103_v56 = vsel %vm298_vm11, %v2971_v2, %v2975_v55  ;;  %v1102_v58 = vsel %vm298_vm11, %v2970_v3, %v2971_v2  ;;  %v1104_v47 = vsel %vm298_vm11, %v2975_v55, %v2976_v26 }
 0x3ed   :  { %v1119_v25 = vmax.f32 %v1053_v20, %v1103_v56  ;;  %v2979_v4 = vpop.permute.xlu1 %2978  ;;  %v1118_v5 = vmax.f32 %v1062_v37, %v1102_v58  ;;  %v1120_v22 = vmax.f32 %v1064_v48, %v1104_v47  ;;  %v3508_v58 = vld [vmem:[#allocation10 + $0x207] ss:$0 sm:$0xff] }
 0x3ee   :  { %v2980_v6 = vunpack.i.l.bf16 %v2979_v4  ;;  %v2981_v8 = vunpack.i.h.bf16 %v2979_v4 }
 0x3ef   :  { %1253 = vmatprep.mubr.f32.mxu0 %v1118_v5  ;;  %1328 = vmatprep.mubr.f32.mxu1 %v1120_v22 }
 0x3f0   :  { %v1101_v36 = vsel %vm298_vm11, %v2980_v6, %v2970_v3  ;;  %1329 = vmatmul.mubr.f32.vlgmr.msra.gmra.mxu1 %v1119_v25  ;;  %v2984_v7 = vpop.permute.xlu0 %2983  ;;  %v3514_v6 = vld [vmem:[#allocation10 + $0x206] ss:$0 sm:$0xff] }
 0x3f1   :  { %v1117_v35 = vmax.f32 %v1051_v40, %v1101_v36  ;;  %v2986_v14 = vunpack.i.h.bf16 %v2984_v7  ;;  %v2985_v15 = vunpack.i.l.bf16 %v2984_v7  ;;  %v2989_v41 = vpop.permute.xlu1 %2988 }
 0x3f2   :  { %v2991_v13 = vunpack.i.h.bf16 %v2989_v41  ;;  %v2990_v42 = vunpack.i.l.bf16 %v2989_v41  ;;  %v3522_v41 = vld [vmem:[#allocation10 + $0x205] ss:$0 sm:$0xff] }
 0x3f3   :  { %1254 = vmatmul.mubr.f32.vlgmr.msra.gmra.mxu0 %v1117_v35  ;;  %v1106_v9 = vsel %vm298_vm11, %v2981_v8, %v2985_v15  ;;  %v1107_v10 = vsel %vm298_vm11, %v2985_v15, %v2986_v14 }
 0x3f4   :  { %v1122_v12 = vmax.f32 %v1067_v44, %v1106_v9  ;;  %v1105_v16 = vsel %vm298_vm11, %v2991_v13, %v2981_v8  ;;  %v1108_v18 = vsel %vm298_vm11, %v2986_v14, %v2990_v42  ;;  %v1123_v24 = vmax.f32 %v1068_v61, %v1107_v10 }
 0x3f5   :  { %v1121_v17 = vmax.f32 %v1066_v63, %v1105_v16  ;;  %v1124_v19 = vmax.f32 %v1069_v62, %v1108_v18  ;;  %v3530_v18 = vld [vmem:[#allocation10 + $0x204] ss:$0 sm:$0xff] }
 0x3f6   :  { %1258 = vmatprep.mubr.f32.mxu0 %v1122_v12 }
 0x3f7   :  { %1259 = vmatmul.mubr.f32.gmra.mxu0 %v1121_v17  ;;  %1333 = vmatprep.mubr.f32.mxu1 %v1124_v19 }
 0x3f8   :  { %1334 = vmatmul.mubr.f32.gmra.mxu1 %v1123_v24  ;;  %2755 = vmatprep.mubr.msk.f32.mxu0 %vm1537_vm3, %v1531_v50 }
 0x3f9   :  { %2876 = vmatprep.mubr.msk.f32.mxu1 %vm3099_vm7, %v3082_v0 }
 0x4b0   :  { %v2842_v29 = vpop.f32.mrf.mxu1 }
 0x4b2   :  { %v2843_v27 = vpop.f32.mrf.mxu1 }
 0x4b3   :  { %v2804_v28 = vpop.f32.mrf.mxu0  ;;  %v2844_v37 = vadd.f32 %v2843_v27, %v2842_v29 }
 0x4b5   :  { %v2805_v31 = vpop.f32.mrf.mxu0 }
 0x4b6   :  { %v2806_v20 = vadd.f32 %v2805_v31, %v2804_v28  ;;  %v3538_v31 = vld [vmem:[#allocation10 + $0x203] ss:$0 sm:$0xff] }
 0x4b7   :  { %v2807_v23 = vpop.f32.mrf.mxu0 }
 0x4b8   :  { %v1331_v43 = vadd.f32 %v2844_v37, %v2806_v20  ;;  %v2845_v45 = vpop.f32.mrf.mxu1 }
 0x4b9   :  { %v2808_v48 = vpop.f32.mrf.mxu0 }
 0x4ba   :  { %2997 = vtanh.f32 %v1331_v43  ;;  %v2809_v49 = vadd.f32 %v2808_v48, %v2807_v23  ;;  %v2846_v51 = vpop.f32.mrf.mxu1 }
 0x4bb   :  { %v2847_v53 = vadd.f32 %v2846_v51, %v2845_v45 }
 0x4bd   :  { %v1336_v54 = vadd.f32 %v2847_v53, %v2809_v49  ;;  %v3546_v49 = vld [vmem:[#allocation10 + $0x202] ss:$0 sm:$0xff] }
 0x4bf   :  { %2999 = vtanh.f32 %v1336_v54 }
 0x4c7   :  { %v2998_v57 = vpop.eup %2997 }
 0x4c8   :  { %1349 = vrot.lane.b32.xlu1 %v2998_v57, %s3094_s19  ;;  %v3553_v57 = vld [vmem:[#allocation10 + $0x201] ss:$0 sm:$0xff] }
 0x4cc   :  { %v3000_v40 = vpop.eup %2999 }
 0x4cd   :  { %1351 = vrot.lane.b32.xlu0 %v3000_v40, %s3094_s19 }
 0x53a   :  { %v1350_v38 = vpop.permute.xlu1 %1349 }
 0x53b   :  { %1356 = vst.msk [vmem:[#allocation5] sm:$0xff] %vm1355_vm2, %v1350_v38 }
 0x53c   :  { %1357 = vst.msk [vmem:[#allocation5 + $0x8] sm:$0xff] %vm1341_vm0, %v1350_v38 }
 0x53f   :  { %v1352_v34 = vpop.permute.xlu0 %1351 }
 0x540   :  { %1358 = vst.msk [vmem:[#allocation5 + $0x10] sm:$0xff] %vm1355_vm2, %v1352_v34 }
 0x541   :  { %1359 = vst.msk [vmem:[#allocation5 + $0x18] sm:$0xff] %vm1341_vm0, %v1352_v34 }
 0x542   :  { %v3455_v59 = vld [vmem:[#allocation5] sm:$0xff] }
 0x543   :  { %v1370_v46 = vld [vmem:[#allocation5 + $0x8] sm:$0xff]  ;;  %1497 = vrot.lane.b32.xlu0 %v3455_v59, %s3088_s15 }
 0x544   :  { %1499 = vrot.lane.b32.xlu1 %v1370_v46, %s3088_s15 }
 0x547   :  { %1478 = vrot.lane.b32.xlu0 %v3455_v59, %s3089_s16  ;;  %v3475_v44 = vld [vmem:[#allocation5 + $0x10] sm:$0xff] }
 0x548   :  { %1480 = vrot.lane.b32.xlu1 %v1370_v46, %s3089_s16  ;;  %v1371_v60 = vld [vmem:[#allocation5 + $0x18] sm:$0xff] }
 0x54b   :  { %1458 = vrot.lane.b32.xlu0 %v3455_v59, %s3095_s20 }
 0x54c   :  { %1460 = vrot.lane.b32.xlu1 %v1370_v46, %s3095_s20 }
 0x54f   :  { %1438 = vrot.lane.b32.xlu0 %v3455_v59, %s3096_s21 }
 0x550   :  { %1440 = vrot.lane.b32.xlu1 %v1370_v46, %s3096_s21 }
 0x553   :  { %1418 = vrot.lane.b32.xlu0 %v3455_v59, %s3097_s22 }
 0x554   :  { %1420 = vrot.lane.b32.xlu1 %v1370_v46, %s3097_s22 }
 0x557   :  { %1399 = vrot.lane.b32.xlu0 %v3455_v59, %s3090_s17 }
 0x558   :  { %1401 = vrot.lane.b32.xlu1 %v1370_v46, %s3090_s17 }
 0x55b   :  { %1501 = vrot.lane.b32.xlu0 %v3475_v44, %s3088_s15 }
 0x55c   :  { %1503 = vrot.lane.b32.xlu1 %v1371_v60, %s3088_s15 }
 0x55f   :  { %1482 = vrot.lane.b32.xlu0 %v3475_v44, %s3089_s16 }
 0x560   :  { %1484 = vrot.lane.b32.xlu1 %v1371_v60, %s3089_s16 }
 0x563   :  { %1462 = vrot.lane.b32.xlu0 %v3475_v44, %s3095_s20 }
 0x564   :  { %1464 = vrot.lane.b32.xlu1 %v1371_v60, %s3095_s20 }
 0x567   :  { %1442 = vrot.lane.b32.xlu0 %v3475_v44, %s3096_s21 }
 0x568   :  { %1444 = vrot.lane.b32.xlu1 %v1371_v60, %s3096_s21 }
 0x56b   :  { %1422 = vrot.lane.b32.xlu0 %v3475_v44, %s3097_s22 }
 0x56c   :  { %1424 = vrot.lane.b32.xlu1 %v1371_v60, %s3097_s22 }
 0x56f   :  { %1403 = vrot.lane.b32.xlu0 %v3475_v44, %s3090_s17 }
 0x570   :  { %1405 = vrot.lane.b32.xlu1 %v1371_v60, %s3090_s17 }
 0x573   :  { %1384 = vrot.lane.b32.xlu0 %v3475_v44, %s3091_s18 }
 0x574   :  { %1386 = vrot.lane.b32.xlu1 %v1371_v60, %s3091_s18 }
 0x577   :  { %1380 = vrot.lane.b32.xlu0 %v3455_v59, %s3091_s18 }
 0x578   :  { %1382 = vrot.lane.b32.xlu1 %v1370_v46, %s3091_s18 }
 0x57b   :  { %1520 = vrot.lane.b32.xlu0 %v3475_v44, %s3087_s14 }
 0x57c   :  { %1522 = vrot.lane.b32.xlu1 %v1371_v60, %s3087_s14 }
 0x57f   :  { %1516 = vrot.lane.b32.xlu0 %v3455_v59, %s3087_s14 }
 0x580   :  { %1518 = vrot.lane.b32.xlu1 %v1370_v46, %s3087_s14 }
 0x583   :  { %1534 = vperm.xlu0 %2992, %v1531_v50  }
 0x587   :  { %2994 = vset.pattern.permute.xlu0 %v3093_v11 }
 0x5b5   :  { %v1498_v39 = vpop.permute.xlu0 %1497 }
 0x5b6   :  { %v1500_v32 = vpop.permute.xlu1 %1499 }
 0x5b7   :  { %v1505_v47 = vsel %vm358_vm10, %v1498_v39, %v1500_v32 }
 0x5b8   :  { %v1509_v4 = vmul.f32 %v3508_v58, %v1505_v47 }
 0x5b9   :  { %v1479_v62 = vpop.permute.xlu0 %1478 }
 0x5ba   :  { %v1481_v61 = vpop.permute.xlu1 %1480 }
 0x5bb   :  { %v1486_v36 = vsel %vm298_vm11, %v1479_v62, %v1481_v61  ;;  %v2746_v61 = vld [vmem:[#allocation10 + $0x200] ss:$0 sm:$0xff] }
 0x5bc   :  { %v1490_v35 = vmul.f32 %v3514_v6, %v1486_v36 }
 0x5bd   :  { %v1459_v52 = vpop.permute.xlu0 %1458 }
 0x5be   :  { %v1461_v63 = vpop.permute.xlu1 %1460 }
 0x5bf   :  { %v1467_v13 = vsel %vm1466_vm4, %v1459_v52, %v1461_v63  ;;  %v1368_v52 = vmul.f32 %v2746_v61, %v3475_v44 }
 0x5c0   :  { %v1471_v10 = vmul.f32 %v3522_v41, %v1467_v13 }
 0x5c1   :  { %v1439_v1 = vpop.permute.xlu0 %1438 }
 0x5c2   :  { %v1441_v21 = vpop.permute.xlu1 %1440 }
 0x5c3   :  { %v1447_v17 = vsel %vm1446_vm5, %v1439_v1, %v1441_v21  ;;  %v3564_v21 = vld [vmem:[#allocation10 + $0x208] ss:$0 sm:$0xff] }
 0x5c4   :  { %v1451_v29 = vmul.f32 %v3530_v18, %v1447_v17 }
 0x5c5   :  { %v1419_v2 = vpop.permute.xlu0 %1418 }
 0x5c6   :  { %v1421_v33 = vpop.permute.xlu1 %1420 }
 0x5c7   :  { %v1427_v37 = vsel %vm1426_vm6, %v1419_v2, %v1421_v33  ;;  %v1367_v33 = vmul.f32 %v2746_v61, %v3455_v59 }
 0x5c8   :  { %v1431_v43 = vmul.f32 %v3538_v31, %v1427_v37 }
 0x5c9   :  { %v1400_v26 = vpop.permute.xlu0 %1399 }
 0x5ca   :  { %v1402_v3 = vpop.permute.xlu1 %1401 }
 0x5cb   :  { %v1407_v51 = vsel %vm238_vm12, %v1400_v26, %v1402_v3 }
 0x5cc   :  { %v1411_v40 = vmul.f32 %v3546_v49, %v1407_v51 }
 0x5cd   :  { %v1502_v56 = vpop.permute.xlu0 %1501 }
 0x5ce   :  { %v1504_v55 = vpop.permute.xlu1 %1503 }
 0x5cf   :  { %v1506_v11 = vsel %vm358_vm10, %v1502_v56, %v1504_v55  ;;  %v1530_v56 = vld [vmem:[#allocation6 + $0x30] sm:$0xff] }
 0x5d0   :  { %v1510_v25 = vmul.f32 %v3508_v58, %v1506_v11 }
 0x5d1   :  { %v1483_v22 = vpop.permute.xlu0 %1482 }
 0x5d2   :  { %v1485_v5 = vpop.permute.xlu1 %1484  ;;  %1541 = vmatpush1.msra.mxu0 %v1510_v25 }
 0x5d3   :  { %v1487_v7 = vsel %vm298_vm11, %v1483_v22, %v1485_v5  ;;  %1542 = vmatprep.subr.mxu0 %v3082_v0 }
 0x5d4   :  { %v1491_v8 = vmul.f32 %v3514_v6, %v1487_v7  ;;  %1543 = vmatpush1.msra.mxu0 %v1509_v4 }
 0x5d5   :  { %1544 = vmatprep.subr.mxu0 %v3082_v0  ;;  %v1463_v15 = vpop.permute.xlu0 %1462 }
 0x5d6   :  { %v1465_v14 = vpop.permute.xlu1 %1464  ;;  %1545 = vmatpush1.msra.mxu0 %v1491_v8  ;;  %v3100_v8 = vmov 32  }
 0x5d7   :  { %v1468_v42 = vsel %vm1466_vm4, %v1463_v15, %v1465_v14  ;;  %1546 = vmatprep.subr.mxu0 %v3082_v0  ;;  %2993 = vset.pattern.permute.xlu1 %v3100_v8 }
 0x5d8   :  { %v1472_v9 = vmul.f32 %v3522_v41, %v1468_v42  ;;  %1547 = vmatpush1.msra.mxu0 %v1490_v35  ;;  %v1663_v35 = vld [vmem:[#allocation6 + $0x40] sm:$0xff] }
 0x5d9   :  { %1548 = vmatprep.subr.mxu0 %v3082_v0  ;;  %v1443_v16 = vpop.permute.xlu0 %1442 }
 0x5da   :  { %v1445_v12 = vpop.permute.xlu1 %1444  ;;  %1549 = vmatpush1.msra.mxu0 %v1472_v9 }
 0x5db   :  { %v1448_v19 = vsel %vm1446_vm5, %v1443_v16, %v1445_v12  ;;  %1550 = vmatprep.subr.mxu0 %v3082_v0 }
 0x5dc   :  { %v1452_v24 = vmul.f32 %v3530_v18, %v1448_v19  ;;  %1551 = vmatpush1.msra.mxu0 %v1471_v10 }
 0x5dd   :  { %1552 = vmatprep.subr.mxu0 %v3082_v0  ;;  %v1423_v28 = vpop.permute.xlu0 %1422 }
 0x5de   :  { %v1425_v27 = vpop.permute.xlu1 %1424  ;;  %1553 = vmatpush1.msra.mxu0 %v1452_v24 }
 0x5df   :  { %v1428_v20 = vsel %vm1426_vm6, %v1423_v28, %v1425_v27  ;;  %1554 = vmatprep.subr.mxu0 %v3082_v0 }
 0x5e0   :  { %v1432_v23 = vmul.f32 %v3538_v31, %v1428_v20  ;;  %1555 = vmatpush1.msra.mxu0 %v1451_v29 }
 0x5e1   :  { %1556 = vmatprep.subr.mxu0 %v3082_v0  ;;  %v1404_v48 = vpop.permute.xlu0 %1403 }
 0x5e2   :  { %v1406_v45 = vpop.permute.xlu1 %1405  ;;  %1557 = vmatpush1.msra.mxu0 %v1432_v23 }
 0x5e3   :  { %v1408_v53 = vsel %vm238_vm12, %v1404_v48, %v1406_v45  ;;  %1558 = vmatprep.subr.mxu0 %v3082_v0  ;;  %v1767_v45 = vld [vmem:[#allocation6 + $0x50] sm:$0xff] }
 0x5e4   :  { %v1412_v54 = vmul.f32 %v3546_v49, %v1408_v53  ;;  %1559 = vmatpush1.msra.mxu0 %v1431_v43 }
 0x5e5   :  { %1560 = vmatprep.subr.mxu0 %v3082_v0  ;;  %v1385_v34 = vpop.permute.xlu0 %1384 }
 0x5e6   :  { %v1387_v38 = vpop.permute.xlu1 %1386  ;;  %1561 = vmatpush1.msra.mxu0 %v1412_v54 }
 0x5e7   :  { %v1389_v46 = vsel %vm178_vm13, %v1385_v34, %v1387_v38  ;;  %1562 = vmatprep.subr.mxu0 %v3082_v0  ;;  %v1866_v38 = vld [vmem:[#allocation6 + $0x60] sm:$0xff] }
 0x5e8   :  { %v1393_v60 = vmul.f32 %v3553_v57, %v1389_v46  ;;  %1563 = vmatpush1.msra.mxu0 %v1411_v40 }
 0x5e9   :  { %1564 = vmatprep.subr.mxu0 %v3082_v0  ;;  %v1381_v30 = vpop.permute.xlu0 %1380 }
 0x5ea   :  { %v1383_v50 = vpop.permute.xlu1 %1382  ;;  %1565 = vmatpush1.msra.mxu0 %v1393_v60  ;;  %v1953_v60 = vld [vmem:[#allocation6 + $0x70] sm:$0xff] }
 0x5eb   :  { %v1388_v32 = vsel %vm178_vm13, %v1381_v30, %v1383_v50  ;;  %1566 = vmatprep.subr.mxu0 %v3082_v0  ;;  %v2028_v50 = vld [vmem:[#allocation6 + $0x80] sm:$0xf] }
 0x5ec   :  { %v1392_v39 = vmul.f32 %v3553_v57, %v1388_v32 }
 0x5ed   :  { %v1521_v63 = vpop.permute.xlu0 %1520 }
 0x5ee   :  { %v1523_v62 = vpop.permute.xlu1 %1522  ;;  %1567 = vmatpush1.msra.mxu0 %v1392_v39 }
 0x5ef   :  { %v1525_v1 = vsel %vm418_vm9, %v1521_v63, %v1523_v62  ;;  %1568 = vmatprep.subr.mxu0 %v3082_v0 }
 0x5f0   :  { %1569 = vmatpush1.msra.mxu0 %v1368_v52  ;;  %v1529_v2 = vmul.f32 %v3564_v21, %v1525_v1 }
 0x5f1   :  { %1570 = vmatprep.subr.mxu0 %v3082_v0  ;;  %v1517_v26 = vpop.permute.xlu0 %1516 }
 0x5f2   :  { %v1519_v3 = vpop.permute.xlu1 %1518  ;;  %1571 = vmatpush1.msra.mxu0 %v1367_v33  ;;  %v2235_v33 = vld [vmem:[#allocation8 + $0x1e8] sm:$0xff] }
 0x5f3   :  { %v1524_v55 = vsel %vm418_vm9, %v1517_v26, %v1519_v3  ;;  %1600 = vmatprep.subr.mxu0 %v3082_v0  ;;  %v2231_v3 = vld [vmem:[#allocation8 + $0x1c8] sm:$0xff] }
 0x5f4   :  { %v1528_v44 = vmul.f32 %v3564_v21, %v1524_v55  ;;  %1601 = vmatpush2.msra.mxu0 %v1529_v2  ;;  %v2234_v2 = vld [vmem:[#allocation8 + $0x1e0] sm:$0xff]  ;;  %v2227_v55 = vld [vmem:[#allocation8 + $0x1a8] sm:$0xff] }
 0x5f5   :  { %1602 = vmatprep.subr.mxu0 %v3082_v0 }
 0x5f6   :  { %1603 = vmatpush2.msra.mxu0 %v1528_v44  ;;  %v2226_v44 = vld [vmem:[#allocation8 + $0x1a0] sm:$0xff] }
 0x5f7   :  { %1605 = vmatmul.mubr.f32.vlgmr.msra.gmra.mxu0 %v1530_v56 }
 0x5f8   :  { %2167 = vmatprep.mubr.f32.mxu0 %v3082_v0 }
 0x5fe   :  { %v1535_v59 = vpop.permute.xlu0 %1534 }
 0x6b7   :  { %v1606_v47 = vpop.f32.mrf.mxu0 }
 0x6b8   :  { %v1607_v11 = vadd.f32 %v1606_v47, %v1535_v59  ;;  %v2223_v59 = vld [vmem:[#allocation8 + $0x188] sm:$0xff]  ;;  %v2222_v47 = vld [vmem:[#allocation8 + $0x180] sm:$0xff] }
 0x6b9   :  { %v1608_v25 = vpop.f32.mrf.mxu0 }
 0x6ba   :  { %v1610_v4 = vmax.f32 %v1607_v11, 0.0  ;;  %v2219_v11 = vld [vmem:[#allocation8 + $0x168] sm:$0xff]  ;;  %v2218_v25 = vld [vmem:[#allocation8 + $0x160] sm:$0xff] }
 0x6bc   :  { %1612 = vrot.lane.b32.xlu1 %v1610_v4, %s3094_s19  ;;  %v2215_v4 = vld [vmem:[#allocation8 + $0x148] sm:$0xff] }
 0x72e   :  { %v1613_v5 = vpop.permute.xlu1 %1612 }
 0x72f   :  { %1615 = vst.msk [vmem:[#allocation5] sm:$0xff] %vm1355_vm2, %v1613_v5 }
 0x730   :  { %1616 = vst.msk [vmem:[#allocation5 + $0x8] sm:$0xff] %vm1341_vm0, %v1613_v5  ;;  %v2214_v5 = vld [vmem:[#allocation8 + $0x140] sm:$0xff] }
 0x736   :  { %v1618_v36 = vld [vmem:[#allocation5] sm:$0xff] }
 0x737   :  { %v1619_v22 = vld [vmem:[#allocation5 + $0x8] sm:$0xff]  ;;  %1650 = vrot.lane.b32.xlu1 %v1618_v36, %s3091_s18  ;;  %v1662_v7 = vmul.f32 %v2746_v61, %v1618_v36 }
 0x738   :  { %1652 = vrot.lane.b32.xlu0 %v1619_v22, %s3091_s18 }
 0x739   :  { %2869 = vmatpush3.msra.mxu1 %v1662_v7  ;;  %v2211_v7 = vld [vmem:[#allocation8 + $0x128] sm:$0xff] }
 0x73a   :  { %2870 = vmatprep.subr.mxu1 %v3082_v0 }
 0x73b   :  { %1638 = vrot.lane.b32.xlu1 %v1618_v36, %s3097_s22 }
 0x73c   :  { %1640 = vrot.lane.b32.xlu0 %v1619_v22, %s3097_s22 }
 0x73f   :  { %1626 = vrot.lane.b32.xlu1 %v1618_v36, %s3096_s21 }
 0x740   :  { %1628 = vrot.lane.b32.xlu0 %v1619_v22, %s3096_s21 }
 0x743   :  { %1760 = vrot.lane.b32.xlu1 %v1618_v36, %s3090_s17 }
 0x744   :  { %1762 = vrot.lane.b32.xlu0 %v1619_v22, %s3090_s17 }
 0x747   :  { %1748 = vrot.lane.b32.xlu1 %v1618_v36, %s3095_s20 }
 0x748   :  { %1750 = vrot.lane.b32.xlu0 %v1619_v22, %s3095_s20 }
 0x74b   :  { %1859 = vrot.lane.b32.xlu1 %v1618_v36, %s3089_s16 }
 0x74c   :  { %1861 = vrot.lane.b32.xlu0 %v1619_v22, %s3089_s16 }
 0x74f   :  { %1847 = vrot.lane.b32.xlu1 %v1618_v36, %s3088_s15 }
 0x750   :  { %1849 = vrot.lane.b32.xlu0 %v1619_v22, %s3088_s15 }
 0x753   :  { %1946 = vrot.lane.b32.xlu1 %v1618_v36, %s3087_s14 }
 0x754   :  { %1948 = vrot.lane.b32.xlu0 %v1619_v22, %s3087_s14 }
 0x757   :  { %1666 = vperm.xlu1 %2993, %v1663_v35  }
 0x758   :  { %2431 = vperm.xlu0 %2994, %v2028_v50  }
 0x7a9   :  { %v1651_v15 = vpop.permute.xlu1 %1650 }
 0x7aa   :  { %v1653_v14 = vpop.permute.xlu0 %1652 }
 0x7ab   :  { %v1654_v13 = vsel %vm178_vm13, %v1651_v15, %v1653_v14  ;;  %v2207_v15 = vld [vmem:[#allocation8 + $0x108] sm:$0xff] }
 0x7ac   :  { %v1656_v42 = vmul.f32 %v3553_v57, %v1654_v13 }
 0x7ad   :  { %v1639_v10 = vpop.permute.xlu1 %1638 }
 0x7ae   :  { %v1641_v9 = vpop.permute.xlu0 %1640  ;;  %2871 = vmatpush3.msra.mxu1 %v1656_v42 }
 0x7af   :  { %v1642_v12 = vsel %vm1426_vm6, %v1639_v10, %v1641_v9  ;;  %2872 = vmatprep.subr.mxu1 %v3082_v0  ;;  %v2203_v10 = vld [vmem:[#allocation8 + $0xe8] sm:$0xff] }
 0x7b0   :  { %v1644_v16 = vmul.f32 %v3538_v31, %v1642_v12  ;;  %v2363_v12 = vld [vmem:[#allocation8 + $0x5e8] sm:$0xff] }
 0x7b1   :  { %v1627_v19 = vpop.permute.xlu1 %1626 }
 0x7b2   :  { %v1629_v17 = vpop.permute.xlu0 %1628  ;;  %2873 = vmatpush3.msra.mxu1 %v1644_v16 }
 0x7b3   :  { %v1630_v24 = vsel %vm1446_vm5, %v1627_v19, %v1629_v17  ;;  %2874 = vmatprep.subr.mxu1 %v3082_v0  ;;  %v2362_v17 = vld [vmem:[#allocation8 + $0x5e0] sm:$0xff]  ;;  %v2199_v19 = vld [vmem:[#allocation8 + $0xc8] sm:$0xff] }
 0x7b4   :  { %v1632_v29 = vmul.f32 %v3530_v18, %v1630_v24  ;;  %v2359_v24 = vld [vmem:[#allocation8 + $0x5c8] sm:$0xff] }
 0x7b5   :  { %v1761_v28 = vpop.permute.xlu1 %1760 }
 0x7b6   :  { %v1763_v27 = vpop.permute.xlu0 %1762  ;;  %2875 = vmatpush3.msra.mxu1 %v1632_v29 }
 0x7b7   :  { %v1764_v37 = vsel %vm238_vm12, %v1761_v28, %v1763_v27  ;;  %2877 = vmatmul.mubr.msk.f32.vlgmr.msra.gmra.mxu1 %vm1669_vm8, %v1663_v35  ;;  %2879 = vmatprep.subr.mxu1 %v3082_v0  ;;  %v2210_v35 = vld [vmem:[#allocation8 + $0x120] sm:$0xff]  ;;  %v2195_v28 = vld [vmem:[#allocation8 + $0xa8] sm:$0xff] }
 0x7b8   :  { %v1766_v31 = vmul.f32 %v3546_v49, %v1764_v37  ;;  %2880 = vmatpush3.msra.mxu1 %v1656_v42  ;;  %2887 = vmatprep.mubr.msk.f32.mxu1 %vm3099_vm7, %v3082_v0  ;;  %v2206_v42 = vld [vmem:[#allocation8 + $0x100] sm:$0xff]  ;;  %v2355_v37 = vld [vmem:[#allocation8 + $0x5a8] sm:$0xff] }
 0x7b9   :  { %2881 = vmatprep.subr.mxu1 %v3082_v0  ;;  %v1749_v18 = vpop.permute.xlu1 %1748  ;;  %v2358_v27 = vld [vmem:[#allocation8 + $0x5c0] sm:$0xff] }
 0x7ba   :  { %v1751_v20 = vpop.permute.xlu0 %1750  ;;  %2882 = vmatpush3.msra.mxu1 %v1766_v31  ;;  %v2194_v31 = vld [vmem:[#allocation8 + $0xa0] sm:$0xff] }
 0x7bb   :  { %v1752_v23 = vsel %vm1466_vm4, %v1749_v18, %v1751_v20  ;;  %2883 = vmatprep.subr.mxu1 %v3082_v0  ;;  %v2354_v20 = vld [vmem:[#allocation8 + $0x5a0] sm:$0xff]  ;;  %v2191_v18 = vld [vmem:[#allocation8 + $0x88] sm:$0xff] }
 0x7bc   :  { %v1754_v43 = vmul.f32 %v3522_v41, %v1752_v23  ;;  %2884 = vmatpush3.msra.mxu1 %v1632_v29  ;;  %v2351_v23 = vld [vmem:[#allocation8 + $0x588] sm:$0xff] }
 0x7bd   :  { %2885 = vmatprep.subr.mxu1 %v3082_v0  ;;  %v1860_v49 = vpop.permute.xlu1 %1859 }
 0x7be   :  { %v1862_v48 = vpop.permute.xlu0 %1861  ;;  %2886 = vmatpush3.msra.mxu1 %v1754_v43 }
 0x7bf   :  { %v1863_v51 = vsel %vm298_vm11, %v1860_v49, %v1862_v48  ;;  %2888 = vmatmul.mubr.msk.f32.vlgmr.msra.gmra.mxu1 %vm1669_vm8, %v1767_v45  ;;  %2890 = vmatprep.subr.mxu1 %v3082_v0  ;;  %v2350_v45 = vld [vmem:[#allocation8 + $0x580] sm:$0xff]  ;;  %v2187_v48 = vld [vmem:[#allocation8 + $0x68] sm:$0xff] }
 0x7c0   :  { %2891 = vmatpush3.msra.mxu1 %v1644_v16  ;;  %2898 = vmatprep.mubr.msk.f32.mxu1 %vm3099_vm7, %v3082_v0  ;;  %v1865_v41 = vmul.f32 %v3514_v6, %v1863_v51  ;;  %v2202_v16 = vld [vmem:[#allocation8 + $0xe0] sm:$0xff]  ;;  %v2347_v49 = vld [vmem:[#allocation8 + $0x568] sm:$0xff] }
 0x7c1   :  { %2892 = vmatprep.subr.mxu1 %v3082_v0  ;;  %v1848_v54 = vpop.permute.xlu1 %1847  ;;  %v2186_v51 = vld [vmem:[#allocation8 + $0x60] sm:$0xff] }
 0x7c2   :  { %v1850_v53 = vpop.permute.xlu0 %1849  ;;  %2893 = vmatpush3.msra.mxu1 %v1632_v29 }
 0x7c3   :  { %v1851_v57 = vsel %vm358_vm10, %v1848_v54, %v1850_v53  ;;  %2894 = vmatprep.subr.mxu1 %v3082_v0  ;;  %v2183_v53 = vld [vmem:[#allocation8 + $0x48] sm:$0xff] }
 0x7c4   :  { %v1853_v40 = vmul.f32 %v3508_v58, %v1851_v57  ;;  %2895 = vmatpush3.msra.mxu1 %v1865_v41  ;;  %v2346_v41 = vld [vmem:[#allocation8 + $0x560] sm:$0xff]  ;;  %v2343_v54 = vld [vmem:[#allocation8 + $0x548] sm:$0xff] }
 0x7c5   :  { %2896 = vmatprep.subr.mxu1 %v3082_v0  ;;  %v1947_v46 = vpop.permute.xlu1 %1946  ;;  %v2182_v57 = vld [vmem:[#allocation8 + $0x40] sm:$0xff] }
 0x7c6   :  { %v1949_v34 = vpop.permute.xlu0 %1948  ;;  %2897 = vmatpush3.msra.mxu1 %v1853_v40 }
 0x7c7   :  { %2899 = vmatmul.mubr.msk.f32.vlgmr.msra.gmra.mxu1 %vm1669_vm8, %v1866_v38  ;;  %2901 = vmatprep.subr.mxu1 %v3082_v0  ;;  %v1950_v6 = vsel %vm418_vm9, %v1947_v46, %v1949_v34  ;;  %v2179_v38 = vld [vmem:[#allocation8 + $0x28] sm:$0xff]  ;;  %v2178_v46 = vld [vmem:[#allocation8 + $0x20] sm:$0xff] }
 0x7c8   :  { %2902 = vmatpush3.msra.mxu1 %v1632_v29  ;;  %2909 = vmatprep.mubr.msk.f32.mxu1 %vm3099_vm7, %v3082_v0  ;;  %v1952_v58 = vmul.f32 %v3564_v21, %v1950_v6  ;;  %v2198_v29 = vld [vmem:[#allocation8 + $0xc0] sm:$0xff]  ;;  %v2339_v34 = vld [vmem:[#allocation8 + $0x528] sm:$0xff] }
 0x7c9   :  { %2903 = vmatprep.subr.mxu1 %v3082_v0  ;;  %v2338_v6 = vld [vmem:[#allocation8 + $0x520] sm:$0xff] }
 0x7ca   :  { %2904 = vmatpush3.msra.mxu1 %v1754_v43  ;;  %v2190_v43 = vld [vmem:[#allocation8 + $0x80] sm:$0xff] }
 0x7cb   :  { %2905 = vmatprep.subr.mxu1 %v3082_v0 }
 0x7cc   :  { %2906 = vmatpush3.msra.mxu1 %v1853_v40  ;;  %v2342_v40 = vld [vmem:[#allocation8 + $0x540] sm:$0xff] }
 0x7cd   :  { %2907 = vmatprep.subr.mxu1 %v3082_v0 }
 0x7ce   :  { %2908 = vmatpush3.msra.mxu1 %v1952_v58  ;;  %v2175_v58 = vld [vmem:[#allocation8 + $0x8] sm:$0xff] }
 0x7cf   :  { %2910 = vmatmul.mubr.msk.f32.vlgmr.msra.gmra.mxu1 %vm1669_vm8, %v1953_v60  ;;  %v2335_v60 = vld [vmem:[#allocation8 + $0x508] sm:$0xff] }
 0x7d0   :  { %2096 = vmatprep.mubr.f32.mxu1 %v3082_v0  ;;  %v2230_v0 = vld [vmem:[#allocation8 + $0x1c0] sm:$0xff] }
 0x7d2   :  { %v1667_v39 = vpop.permute.xlu1 %1666 }
 0x877   :  { %v1738_v30 = vpop.f32.mrf.mxu1 }
 0x878   :  { %v1739_v61 = vadd.f32 %v1738_v30, %v1667_v39  ;;  %v2334_v30 = vld [vmem:[#allocation8 + $0x500] sm:$0xff] }
 0x879   :  { %v2878_v32 = vpop.f32.mrf.mxu1 }
 0x87a   :  { %v1742_v21 = vmax.f32 %v1739_v61, 0.0  ;;  %v2299_v32 = vld [vmem:[#allocation8 + $0x3e8] sm:$0xff]  ;;  %v2298_v61 = vld [vmem:[#allocation8 + $0x3e0] sm:$0xff] }
 0x87f   :  { %v1837_v62 = vpop.f32.mrf.mxu1 }
 0x880   :  { %v1838_v63 = vadd.f32 %v1837_v62, %v1667_v39  ;;  %v2330_v62 = vld [vmem:[#allocation8 + $0x4e0] sm:$0xff] }
 0x881   :  { %v2889_v52 = vpop.f32.mrf.mxu1 }
 0x882   :  { %v1841_v1 = vmax.f32 %v1838_v63, 0.0  ;;  %v2295_v63 = vld [vmem:[#allocation8 + $0x3c8] sm:$0xff] }
 0x883   :  { %v2327_v52 = vld [vmem:[#allocation8 + $0x4c8] sm:$0xff] }
 0x884   :  { %2062 = vmatprep.subr.mxu1 %v1841_v1  ;;  %v2294_v1 = vld [vmem:[#allocation8 + $0x3c0] sm:$0xff] }
 0x885   :  { %2063 = vmatpush1.msra.mxu1 %v1742_v21  ;;  %v2326_v21 = vld [vmem:[#allocation8 + $0x4c0] sm:$0xff] }
 0x886   :  { %2769 = vmatmul.mubr.msk.f32.vlgmr.msra.gmra.mxu1 %vm818_vm15, %v2028_v50  ;;  %2434 = vmatprep.subr.mxu1 %v2235_v33  ;;  %v2291_v33 = vld [vmem:[#allocation8 + $0x3a8] sm:$0xff] }
 0x887   :  { %v1936_v26 = vpop.f32.mrf.mxu1  ;;  %2435 = vmatpush1.msra.mxu1 %v2234_v2  ;;  %v2323_v2 = vld [vmem:[#allocation8 + $0x4a8] sm:$0xff] }
 0x888   :  { %2436 = vmatprep.subr.mxu1 %v2231_v3  ;;  %v1937_v22 = vadd.f32 %v1936_v26, %v1667_v39  ;;  %v2290_v3 = vld [vmem:[#allocation8 + $0x3a0] sm:$0xff]  ;;  %v2287_v26 = vld [vmem:[#allocation8 + $0x388] sm:$0xff] }
 0x889   :  { %v2900_v56 = vpop.f32.mrf.mxu1  ;;  %2437 = vmatpush1.msra.mxu1 %v2230_v0  ;;  %v2322_v0 = vld [vmem:[#allocation8 + $0x4a0] sm:$0xff] }
 0x88a   :  { %2438 = vmatprep.subr.mxu1 %v2227_v55  ;;  %v1940_v9 = vmax.f32 %v1937_v22, 0.0  ;;  %v2319_v55 = vld [vmem:[#allocation8 + $0x488] sm:$0xff]  ;;  %v2318_v56 = vld [vmem:[#allocation8 + $0x480] sm:$0xff] }
 0x88b   :  { %2439 = vmatpush1.msra.mxu1 %v2226_v44  ;;  %v2286_v44 = vld [vmem:[#allocation8 + $0x380] sm:$0xff] }
 0x88c   :  { %2440 = vmatprep.subr.mxu1 %v2223_v59  ;;  %v2283_v59 = vld [vmem:[#allocation8 + $0x368] sm:$0xff]  ;;  %v2278_v22 = vld [vmem:[#allocation8 + $0x340] sm:$0xff] }
 0x88d   :  { %2441 = vmatpush1.msra.mxu1 %v2222_v47  ;;  %v2315_v47 = vld [vmem:[#allocation8 + $0x468] sm:$0xff] }
 0x88e   :  { %2442 = vmatprep.subr.mxu1 %v2219_v11  ;;  %v2282_v11 = vld [vmem:[#allocation8 + $0x360] sm:$0xff] }
 0x88f   :  { %v2023_v36 = vpop.f32.mrf.mxu1  ;;  %2443 = vmatpush1.msra.mxu1 %v2218_v25  ;;  %v2314_v25 = vld [vmem:[#allocation8 + $0x460] sm:$0xff] }
 0x890   :  { %v2024_v8 = vadd.f32 %v2023_v36, %v1667_v39  ;;  %2444 = vmatprep.subr.mxu1 %v2215_v4  ;;  %v2331_v39 = vld [vmem:[#allocation8 + $0x4e8] sm:$0xff]  ;;  %v2310_v36 = vld [vmem:[#allocation8 + $0x440] sm:$0xff] }
 0x891   :  { %v2911_v14 = vpop.f32.mrf.mxu1  ;;  %2445 = vmatpush1.msra.mxu1 %v2214_v5  ;;  %v2279_v4 = vld [vmem:[#allocation8 + $0x348] sm:$0xff] }
 0x892   :  { %v2027_v13 = vmax.f32 %v2024_v8, 0.0  ;;  %2446 = vmatprep.subr.mxu1 %v2211_v7  ;;  %v2311_v5 = vld [vmem:[#allocation8 + $0x448] sm:$0xff]  ;;  %v2306_v14 = vld [vmem:[#allocation8 + $0x420] sm:$0xff] }
 0x893   :  { %2447 = vmatpush1.msra.mxu1 %v2210_v35  ;;  %v2275_v7 = vld [vmem:[#allocation8 + $0x328] sm:$0xff]  ;;  %v2274_v35 = vld [vmem:[#allocation8 + $0x320] sm:$0xff] }
 0x894   :  { %2133 = vmatprep.subr.mxu0 %v2027_v13  ;;  %2448 = vmatprep.subr.mxu1 %v2207_v15  ;;  %v2307_v8 = vld [vmem:[#allocation8 + $0x428] sm:$0xff] }
 0x895   :  { %2134 = vmatpush1.msra.mxu0 %v1940_v9  ;;  %2449 = vmatpush1.msra.mxu1 %v2206_v42  ;;  %v2271_v15 = vld [vmem:[#allocation8 + $0x308] sm:$0xff]  ;;  %v2270_v42 = vld [vmem:[#allocation8 + $0x300] sm:$0xff] }
 0x896   :  { %2770 = vmatmul.mubr.msk.f32.vlgmr.msra.gmra.mxu0 %vm818_vm15, %v2028_v50  ;;  %2450 = vmatprep.subr.mxu1 %v2203_v10  ;;  %v2174_v50 = vld [vmem:[#allocation8] sm:$0xff]  ;;  %v2303_v13 = vld [vmem:[#allocation8 + $0x408] sm:$0xff] }
 0x897   :  { %2505 = vmatprep.subr.mxu0 %v2363_v12  ;;  %2451 = vmatpush1.msra.mxu1 %v2202_v16  ;;  %v2302_v9 = vld [vmem:[#allocation8 + $0x400] sm:$0xff]  ;;  %v2267_v10 = vld [vmem:[#allocation8 + $0x2e8] sm:$0xff] }
 0x898   :  { %2506 = vmatpush1.msra.mxu0 %v2362_v17  ;;  %2452 = vmatprep.subr.mxu1 %v2199_v19  ;;  %v2427_v12 = vld [vmem:[#allocation8 + $0x7e8] sm:$0xff]  ;;  %v2266_v16 = vld [vmem:[#allocation8 + $0x2e0] sm:$0xff] }
 0x899   :  { %2507 = vmatprep.subr.mxu0 %v2359_v24  ;;  %2453 = vmatpush1.msra.mxu1 %v2198_v29  ;;  %v2426_v17 = vld [vmem:[#allocation8 + $0x7e0] sm:$0xff]  ;;  %v2263_v19 = vld [vmem:[#allocation8 + $0x2c8] sm:$0xff] }
 0x89a   :  { %2508 = vmatpush1.msra.mxu0 %v2358_v27  ;;  %2454 = vmatprep.subr.mxu1 %v2195_v28  ;;  %v2423_v24 = vld [vmem:[#allocation8 + $0x7c8] sm:$0xff]  ;;  %v2262_v29 = vld [vmem:[#allocation8 + $0x2c0] sm:$0xff] }
 0x89b   :  { %2509 = vmatprep.subr.mxu0 %v2355_v37  ;;  %2455 = vmatpush1.msra.mxu1 %v2194_v31  ;;  %v2422_v27 = vld [vmem:[#allocation8 + $0x7c0] sm:$0xff]  ;;  %v2259_v28 = vld [vmem:[#allocation8 + $0x2a8] sm:$0xff] }
 0x89c   :  { %2510 = vmatpush1.msra.mxu0 %v2354_v20  ;;  %2456 = vmatprep.subr.mxu1 %v2191_v18  ;;  %v2419_v37 = vld [vmem:[#allocation8 + $0x7a8] sm:$0xff]  ;;  %v2258_v31 = vld [vmem:[#allocation8 + $0x2a0] sm:$0xff] }
 0x89d   :  { %2511 = vmatprep.subr.mxu0 %v2351_v23  ;;  %2457 = vmatpush1.msra.mxu1 %v2190_v43  ;;  %v2418_v20 = vld [vmem:[#allocation8 + $0x7a0] sm:$0xff]  ;;  %v2255_v18 = vld [vmem:[#allocation8 + $0x288] sm:$0xff] }
 0x89e   :  { %2512 = vmatpush1.msra.mxu0 %v2350_v45  ;;  %2458 = vmatprep.subr.mxu1 %v2187_v48  ;;  %v2415_v23 = vld [vmem:[#allocation8 + $0x788] sm:$0xff]  ;;  %v2254_v43 = vld [vmem:[#allocation8 + $0x280] sm:$0xff] }
 0x89f   :  { %2513 = vmatprep.subr.mxu0 %v2347_v49  ;;  %2459 = vmatpush1.msra.mxu1 %v2186_v51  ;;  %v2414_v45 = vld [vmem:[#allocation8 + $0x780] sm:$0xff]  ;;  %v2251_v48 = vld [vmem:[#allocation8 + $0x268] sm:$0xff] }
 0x8a0   :  { %2514 = vmatpush1.msra.mxu0 %v2346_v41  ;;  %2460 = vmatprep.subr.mxu1 %v2183_v53  ;;  %v2411_v49 = vld [vmem:[#allocation8 + $0x768] sm:$0xff]  ;;  %v2250_v51 = vld [vmem:[#allocation8 + $0x260] sm:$0xff] }
 0x8a1   :  { %2515 = vmatprep.subr.mxu0 %v2343_v54  ;;  %2461 = vmatpush1.msra.mxu1 %v2182_v57  ;;  %v2410_v41 = vld [vmem:[#allocation8 + $0x760] sm:$0xff]  ;;  %v2247_v53 = vld [vmem:[#allocation8 + $0x248] sm:$0xff] }
 0x8a2   :  { %2516 = vmatpush1.msra.mxu0 %v2342_v40  ;;  %2462 = vmatprep.subr.mxu1 %v2179_v38  ;;  %v2407_v54 = vld [vmem:[#allocation8 + $0x748] sm:$0xff]  ;;  %v2246_v57 = vld [vmem:[#allocation8 + $0x240] sm:$0xff] }
 0x8a3   :  { %2517 = vmatprep.subr.mxu0 %v2339_v34  ;;  %2463 = vmatpush1.msra.mxu1 %v2178_v46  ;;  %v2406_v40 = vld [vmem:[#allocation8 + $0x740] sm:$0xff]  ;;  %v2243_v38 = vld [vmem:[#allocation8 + $0x228] sm:$0xff] }
 0x8a4   :  { %2518 = vmatpush1.msra.mxu0 %v2338_v6  ;;  %2464 = vmatprep.subr.mxu1 %v2175_v58  ;;  %v2403_v34 = vld [vmem:[#allocation8 + $0x728] sm:$0xff]  ;;  %v2242_v46 = vld [vmem:[#allocation8 + $0x220] sm:$0xff] }
 0x8a5   :  { %2519 = vmatprep.subr.mxu0 %v2335_v60  ;;  %2465 = vmatpush1.msra.mxu1 %v2174_v50  ;;  %v2402_v6 = vld [vmem:[#allocation8 + $0x720] sm:$0xff]  ;;  %v2239_v58 = vld [vmem:[#allocation8 + $0x208] sm:$0xff] }
 0x8a6   :  { %2520 = vmatpush1.msra.mxu0 %v2334_v30  ;;  %2466 = vmatprep.subr.mxu1 %v2299_v32  ;;  %v2399_v60 = vld [vmem:[#allocation8 + $0x708] sm:$0xff]  ;;  %v2238_v50 = vld [vmem:[#allocation8 + $0x200] sm:$0xff] }
 0x8a7   :  { %2521 = vmatprep.subr.mxu0 %v2331_v39  ;;  %2467 = vmatpush2.msra.mxu1 %v2298_v61  ;;  %v2398_v30 = vld [vmem:[#allocation8 + $0x700] sm:$0xff]  ;;  %v2395_v32 = vld [vmem:[#allocation8 + $0x6e8] sm:$0xff]  ;;  %v2237_v39 = vld [vmem:[#allocation8 + $0x1f8] sm:$0xff] }
 0x8a8   :  { %2522 = vmatpush1.msra.mxu0 %v2330_v62  ;;  %2468 = vmatprep.subr.mxu1 %v2295_v63  ;;  %v2394_v61 = vld [vmem:[#allocation8 + $0x6e0] sm:$0xff]  ;;  %v2391_v62 = vld [vmem:[#allocation8 + $0x6c8] sm:$0xff] }
 0x8a9   :  { %2523 = vmatprep.subr.mxu0 %v2327_v52  ;;  %2469 = vmatpush2.msra.mxu1 %v2294_v1  ;;  %v2390_v63 = vld [vmem:[#allocation8 + $0x6c0] sm:$0xff]  ;;  %v2387_v52 = vld [vmem:[#allocation8 + $0x6a8] sm:$0xff] }
 0x8aa   :  { %2524 = vmatpush1.msra.mxu0 %v2326_v21  ;;  %2470 = vmatprep.subr.mxu1 %v2291_v33  ;;  %v2386_v1 = vld [vmem:[#allocation8 + $0x6a0] sm:$0xff]  ;;  %v2383_v21 = vld [vmem:[#allocation8 + $0x688] sm:$0xff] }
 0x8ab   :  { %2525 = vmatprep.subr.mxu0 %v2323_v2  ;;  %2471 = vmatpush2.msra.mxu1 %v2290_v3  ;;  %v2382_v33 = vld [vmem:[#allocation8 + $0x680] sm:$0xff]  ;;  %v2379_v2 = vld [vmem:[#allocation8 + $0x668] sm:$0xff] }
 0x8ac   :  { %2526 = vmatpush1.msra.mxu0 %v2322_v0  ;;  %2472 = vmatprep.subr.mxu1 %v2287_v26  ;;  %v2378_v3 = vld [vmem:[#allocation8 + $0x660] sm:$0xff]  ;;  %v2375_v0 = vld [vmem:[#allocation8 + $0x648] sm:$0xff] }
 0x8ad   :  { %2527 = vmatprep.subr.mxu0 %v2319_v55  ;;  %2473 = vmatpush2.msra.mxu1 %v2286_v44  ;;  %v2374_v26 = vld [vmem:[#allocation8 + $0x640] sm:$0xff]  ;;  %v2371_v55 = vld [vmem:[#allocation8 + $0x628] sm:$0xff] }
 0x8ae   :  { %2528 = vmatpush1.msra.mxu0 %v2318_v56  ;;  %2474 = vmatprep.subr.mxu1 %v2283_v59  ;;  %v2370_v44 = vld [vmem:[#allocation8 + $0x620] sm:$0xff]  ;;  %v2367_v56 = vld [vmem:[#allocation8 + $0x608] sm:$0xff] }
 0x8af   :  { %2529 = vmatprep.subr.mxu0 %v2315_v47  ;;  %2475 = vmatpush2.msra.mxu1 %v2282_v11  ;;  %v2366_v59 = vld [vmem:[#allocation8 + $0x600] sm:$0xff]  ;;  %v2365_v47 = vld [vmem:[#allocation8 + $0x5f8] sm:$0xff] }
 0x8b0   :  { %2530 = vmatpush1.msra.mxu0 %v2314_v25  ;;  %2476 = vmatprep.subr.mxu1 %v2279_v4  ;;  %v2236_v4 = vld [vmem:[#allocation8 + $0x1f0] sm:$0xff] }
 0x8b1   :  { %2531 = vmatprep.subr.mxu0 %v2311_v5  ;;  %2477 = vmatpush2.msra.mxu1 %v2278_v22  ;;  %v2233_v5 = vld [vmem:[#allocation8 + $0x1d8] sm:$0xff]  ;;  %v2232_v22 = vld [vmem:[#allocation8 + $0x1d0] sm:$0xff] }
 0x8b2   :  { %2532 = vmatpush1.msra.mxu0 %v2310_v36  ;;  %2478 = vmatprep.subr.mxu1 %v2275_v7  ;;  %v2229_v36 = vld [vmem:[#allocation8 + $0x1b8] sm:$0xff]  ;;  %v2228_v7 = vld [vmem:[#allocation8 + $0x1b0] sm:$0xff] }
 0x8b3   :  { %2533 = vmatprep.subr.mxu0 %v2307_v8  ;;  %2479 = vmatpush2.msra.mxu1 %v2274_v35  ;;  %v2225_v8 = vld [vmem:[#allocation8 + $0x198] sm:$0xff]  ;;  %v2224_v35 = vld [vmem:[#allocation8 + $0x190] sm:$0xff] }
 0x8b4   :  { %2534 = vmatpush1.msra.mxu0 %v2306_v14  ;;  %2480 = vmatprep.subr.mxu1 %v2271_v15  ;;  %v2221_v14 = vld [vmem:[#allocation8 + $0x178] sm:$0xff]  ;;  %v2220_v15 = vld [vmem:[#allocation8 + $0x170] sm:$0xff] }
 0x8b5   :  { %2535 = vmatprep.subr.mxu0 %v2303_v13  ;;  %2481 = vmatpush2.msra.mxu1 %v2270_v42  ;;  %v2217_v13 = vld [vmem:[#allocation8 + $0x158] sm:$0xff]  ;;  %v2216_v42 = vld [vmem:[#allocation8 + $0x150] sm:$0xff] }
 0x8b6   :  { %2536 = vmatpush1.msra.mxu0 %v2302_v9  ;;  %2482 = vmatprep.subr.mxu1 %v2267_v10  ;;  %v2213_v9 = vld [vmem:[#allocation8 + $0x138] sm:$0xff]  ;;  %v2212_v10 = vld [vmem:[#allocation8 + $0x130] sm:$0xff] }
 0x8b7   :  { %2537 = vmatprep.subr.mxu0 %v2427_v12  ;;  %2483 = vmatpush2.msra.mxu1 %v2266_v16  ;;  %v2209_v12 = vld [vmem:[#allocation8 + $0x118] sm:$0xff] }
 0x8b8   :  { %2538 = vmatpush2.msra.mxu0 %v2426_v17  ;;  %2484 = vmatprep.subr.mxu1 %v2263_v19  ;;  %v2208_v17 = vld [vmem:[#allocation8 + $0x110] sm:$0xff]  ;;  %v2205_v19 = vld [vmem:[#allocation8 + $0xf8] sm:$0xff] }
 0x8b9   :  { %2539 = vmatprep.subr.mxu0 %v2423_v24  ;;  %2485 = vmatpush2.msra.mxu1 %v2262_v29  ;;  %v2204_v29 = vld [vmem:[#allocation8 + $0xf0] sm:$0xff] }
 0x8ba   :  { %2540 = vmatpush2.msra.mxu0 %v2422_v27  ;;  %2486 = vmatprep.subr.mxu1 %v2259_v28  ;;  %v2364_v27 = vld [vmem:[#allocation8 + $0x5f0] sm:$0xff]  ;;  %v2201_v28 = vld [vmem:[#allocation8 + $0xd8] sm:$0xff] }
 0x8bb   :  { %2541 = vmatprep.subr.mxu0 %v2419_v37  ;;  %2487 = vmatpush2.msra.mxu1 %v2258_v31  ;;  %v2361_v37 = vld [vmem:[#allocation8 + $0x5d8] sm:$0xff]  ;;  %v2200_v31 = vld [vmem:[#allocation8 + $0xd0] sm:$0xff] }
 0x8bc   :  { %2542 = vmatpush2.msra.mxu0 %v2418_v20  ;;  %2488 = vmatprep.subr.mxu1 %v2255_v18  ;;  %v2360_v20 = vld [vmem:[#allocation8 + $0x5d0] sm:$0xff]  ;;  %v2197_v18 = vld [vmem:[#allocation8 + $0xb8] sm:$0xff] }
 0x8bd   :  { %2543 = vmatprep.subr.mxu0 %v2415_v23  ;;  %2489 = vmatpush2.msra.mxu1 %v2254_v43  ;;  %v2357_v23 = vld [vmem:[#allocation8 + $0x5b8] sm:$0xff]  ;;  %v2196_v43 = vld [vmem:[#allocation8 + $0xb0] sm:$0xff] }
 0x8be   :  { %2544 = vmatpush2.msra.mxu0 %v2414_v45  ;;  %2490 = vmatprep.subr.mxu1 %v2251_v48  ;;  %v2356_v45 = vld [vmem:[#allocation8 + $0x5b0] sm:$0xff]  ;;  %v2193_v48 = vld [vmem:[#allocation8 + $0x98] sm:$0xff] }
 0x8bf   :  { %2545 = vmatprep.subr.mxu0 %v2411_v49  ;;  %2491 = vmatpush2.msra.mxu1 %v2250_v51  ;;  %v2353_v49 = vld [vmem:[#allocation8 + $0x598] sm:$0xff]  ;;  %v2192_v51 = vld [vmem:[#allocation8 + $0x90] sm:$0xff] }
 0x8c0   :  { %2546 = vmatpush2.msra.mxu0 %v2410_v41  ;;  %2492 = vmatprep.subr.mxu1 %v2247_v53  ;;  %v2352_v41 = vld [vmem:[#allocation8 + $0x590] sm:$0xff]  ;;  %v2189_v53 = vld [vmem:[#allocation8 + $0x78] sm:$0xff] }
 0x8c1   :  { %2547 = vmatprep.subr.mxu0 %v2407_v54  ;;  %2493 = vmatpush2.msra.mxu1 %v2246_v57  ;;  %v2349_v54 = vld [vmem:[#allocation8 + $0x578] sm:$0xff]  ;;  %v2188_v57 = vld [vmem:[#allocation8 + $0x70] sm:$0xff] }
 0x8c2   :  { %2548 = vmatpush2.msra.mxu0 %v2406_v40  ;;  %2494 = vmatprep.subr.mxu1 %v2243_v38  ;;  %v2348_v40 = vld [vmem:[#allocation8 + $0x570] sm:$0xff]  ;;  %v2185_v38 = vld [vmem:[#allocation8 + $0x58] sm:$0xff] }
 0x8c3   :  { %2549 = vmatprep.subr.mxu0 %v2403_v34  ;;  %2495 = vmatpush2.msra.mxu1 %v2242_v46  ;;  %v2345_v34 = vld [vmem:[#allocation8 + $0x558] sm:$0xff]  ;;  %v2184_v46 = vld [vmem:[#allocation8 + $0x50] sm:$0xff] }
 0x8c4   :  { %2550 = vmatpush2.msra.mxu0 %v2402_v6  ;;  %2496 = vmatprep.subr.mxu1 %v2239_v58  ;;  %v2344_v6 = vld [vmem:[#allocation8 + $0x550] sm:$0xff]  ;;  %v2181_v58 = vld [vmem:[#allocation8 + $0x38] sm:$0xff] }
 0x8c5   :  { %2551 = vmatprep.subr.mxu0 %v2399_v60  ;;  %2497 = vmatpush2.msra.mxu1 %v2238_v50  ;;  %v2341_v60 = vld [vmem:[#allocation8 + $0x538] sm:$0xff]  ;;  %v2180_v50 = vld [vmem:[#allocation8 + $0x30] sm:$0xff] }
 0x8c6   :  { %2552 = vmatpush2.msra.mxu0 %v2398_v30  ;;  %2576 = vmatprep.subr.mxu1 %v2237_v39  ;;  %v2340_v30 = vld [vmem:[#allocation8 + $0x530] sm:$0xff]  ;;  %v2337_v39 = vld [vmem:[#allocation8 + $0x518] sm:$0xff] }
 0x8c7   :  { %2553 = vmatprep.subr.mxu0 %v2395_v32  ;;  %v2177_v32 = vld [vmem:[#allocation8 + $0x18] sm:$0xff] }
 0x8c8   :  { %2554 = vmatpush2.msra.mxu0 %v2394_v61  ;;  %v2176_v61 = vld [vmem:[#allocation8 + $0x10] sm:$0xff] }
 0x8c9   :  { %2555 = vmatprep.subr.mxu0 %v2391_v62  ;;  %v2336_v62 = vld [vmem:[#allocation8 + $0x510] sm:$0xff] }
 0x8ca   :  { %2556 = vmatpush2.msra.mxu0 %v2390_v63  ;;  %v2301_v63 = vld [vmem:[#allocation8 + $0x3f8] sm:$0xff] }
 0x8cb   :  { %2557 = vmatprep.subr.mxu0 %v2387_v52  ;;  %v2333_v52 = vld [vmem:[#allocation8 + $0x4f8] sm:$0xff] }
 0x8cc   :  { %2558 = vmatpush2.msra.mxu0 %v2386_v1  ;;  %v2300_v1 = vld [vmem:[#allocation8 + $0x3f0] sm:$0xff] }
 0x8cd   :  { %2559 = vmatprep.subr.mxu0 %v2383_v21  ;;  %v2332_v21 = vld [vmem:[#allocation8 + $0x4f0] sm:$0xff] }
 0x8ce   :  { %2560 = vmatpush2.msra.mxu0 %v2382_v33  ;;  %v2297_v33 = vld [vmem:[#allocation8 + $0x3d8] sm:$0xff] }
 0x8cf   :  { %2561 = vmatprep.subr.mxu0 %v2379_v2  ;;  %v2329_v2 = vld [vmem:[#allocation8 + $0x4d8] sm:$0xff] }
 0x8d0   :  { %2562 = vmatpush2.msra.mxu0 %v2378_v3  ;;  %v2296_v3 = vld [vmem:[#allocation8 + $0x3d0] sm:$0xff] }
 0x8d1   :  { %2563 = vmatprep.subr.mxu0 %v2375_v0  ;;  %v2328_v0 = vld [vmem:[#allocation8 + $0x4d0] sm:$0xff] }
 0x8d2   :  { %2564 = vmatpush2.msra.mxu0 %v2374_v26  ;;  %v2293_v26 = vld [vmem:[#allocation8 + $0x3b8] sm:$0xff] }
 0x8d3   :  { %2565 = vmatprep.subr.mxu0 %v2371_v55  ;;  %v2325_v55 = vld [vmem:[#allocation8 + $0x4b8] sm:$0xff] }
 0x8d4   :  { %2566 = vmatpush2.msra.mxu0 %v2370_v44  ;;  %v2292_v44 = vld [vmem:[#allocation8 + $0x3b0] sm:$0xff] }
 0x8d5   :  { %2567 = vmatprep.subr.mxu0 %v2367_v56  ;;  %v2324_v56 = vld [vmem:[#allocation8 + $0x4b0] sm:$0xff] }
 0x8d6   :  { %2568 = vmatpush2.msra.mxu0 %v2366_v59  ;;  %v2289_v59 = vld [vmem:[#allocation8 + $0x398] sm:$0xff] }
 0x8d7   :  { %2647 = vmatprep.subr.mxu0 %v2365_v47  ;;  %v2321_v47 = vld [vmem:[#allocation8 + $0x498] sm:$0xff] }
 0x946   :  { %v3641_v11 = vpop.f32.mrf.mxu1 }
 0x948   :  { %v2100_v25 = vpop.f32.mrf.mxu1 }
 0x949   :  { %2498 = vmatprep.mubr.f32.mxu1 %v2100_v25 }
 0x94a   :  { %2499 = vmatmul.mubr.f32.vlgmr.msra.gmra.mxu1 %v3641_v11 }
 0x94b   :  { %2577 = vmatpush1.msra.mxu1 %v2236_v4  ;;  %2640 = vmatprep.mubr.f32.mxu1 %v2100_v25  ;;  %v2288_v25 = vld [vmem:[#allocation8 + $0x390] sm:$0xff] }
 0x94c   :  { %2578 = vmatprep.subr.mxu1 %v2233_v5  ;;  %v2320_v4 = vld [vmem:[#allocation8 + $0x490] sm:$0xff]  ;;  %v2285_v5 = vld [vmem:[#allocation8 + $0x378] sm:$0xff] }
 0x94d   :  { %2579 = vmatpush1.msra.mxu1 %v2232_v22  ;;  %v2317_v22 = vld [vmem:[#allocation8 + $0x478] sm:$0xff] }
 0x94e   :  { %2580 = vmatprep.subr.mxu1 %v2229_v36  ;;  %v2284_v36 = vld [vmem:[#allocation8 + $0x370] sm:$0xff] }
 0x94f   :  { %2581 = vmatpush1.msra.mxu1 %v2228_v7  ;;  %v2316_v7 = vld [vmem:[#allocation8 + $0x470] sm:$0xff] }
 0x950   :  { %2582 = vmatprep.subr.mxu1 %v2225_v8  ;;  %v2281_v8 = vld [vmem:[#allocation8 + $0x358] sm:$0xff] }
 0x951   :  { %2583 = vmatpush1.msra.mxu1 %v2224_v35  ;;  %v2313_v35 = vld [vmem:[#allocation8 + $0x458] sm:$0xff] }
 0x952   :  { %2584 = vmatprep.subr.mxu1 %v2221_v14  ;;  %v2280_v14 = vld [vmem:[#allocation8 + $0x350] sm:$0xff] }
 0x953   :  { %2585 = vmatpush1.msra.mxu1 %v2220_v15  ;;  %v2312_v15 = vld [vmem:[#allocation8 + $0x450] sm:$0xff] }
 0x954   :  { %2586 = vmatprep.subr.mxu1 %v2217_v13  ;;  %v2277_v13 = vld [vmem:[#allocation8 + $0x338] sm:$0xff] }
 0x955   :  { %2587 = vmatpush1.msra.mxu1 %v2216_v42  ;;  %v2309_v42 = vld [vmem:[#allocation8 + $0x438] sm:$0xff] }
 0x956   :  { %2588 = vmatprep.subr.mxu1 %v2213_v9  ;;  %v3644_v16 = vpop.f32.mrf.mxu0  ;;  %v2276_v9 = vld [vmem:[#allocation8 + $0x330] sm:$0xff] }
 0x957   :  { %2589 = vmatpush1.msra.mxu1 %v2212_v10  ;;  %v2308_v10 = vld [vmem:[#allocation8 + $0x430] sm:$0xff] }
 0x958   :  { %2590 = vmatprep.subr.mxu1 %v2209_v12  ;;  %v2171_v24 = vpop.f32.mrf.mxu0  ;;  %v2273_v12 = vld [vmem:[#allocation8 + $0x318] sm:$0xff] }
 0x959   :  { %2591 = vmatpush1.msra.mxu1 %v2208_v17  ;;  %2569 = vmatprep.mubr.f32.mxu0 %v2171_v24  ;;  %v2305_v17 = vld [vmem:[#allocation8 + $0x418] sm:$0xff] }
 0x95a   :  { %2592 = vmatprep.subr.mxu1 %v2205_v19  ;;  %2570 = vmatmul.mubr.f32.vlgmr.msra.gmra.mxu0 %v3644_v16  ;;  %v2272_v19 = vld [vmem:[#allocation8 + $0x310] sm:$0xff] }
 0x95b   :  { %2593 = vmatpush1.msra.mxu1 %v2204_v29  ;;  %2648 = vmatpush1.msra.mxu0 %v2364_v27  ;;  %v2269_v29 = vld [vmem:[#allocation8 + $0x2f8] sm:$0xff] }
 0x95c   :  { %2594 = vmatprep.subr.mxu1 %v2201_v28  ;;  %2649 = vmatprep.subr.mxu0 %v2361_v37  ;;  %v2429_v27 = vld [vmem:[#allocation8 + $0x7f8] sm:$0xff]  ;;  %v2268_v28 = vld [vmem:[#allocation8 + $0x2f0] sm:$0xff] }
 0x95d   :  { %2711 = vmatprep.mubr.f32.mxu0 %v2171_v24  ;;  %2595 = vmatpush1.msra.mxu1 %v2200_v31  ;;  %v2304_v24 = vld [vmem:[#allocation8 + $0x410] sm:$0xff]  ;;  %v2265_v31 = vld [vmem:[#allocation8 + $0x2d8] sm:$0xff] }
 0x95e   :  { %2650 = vmatpush1.msra.mxu0 %v2360_v20  ;;  %2596 = vmatprep.subr.mxu1 %v2197_v18  ;;  %v2428_v37 = vld [vmem:[#allocation8 + $0x7f0] sm:$0xff]  ;;  %v2425_v20 = vld [vmem:[#allocation8 + $0x7d8] sm:$0xff] }
 0x95f   :  { %2651 = vmatprep.subr.mxu0 %v2357_v23  ;;  %2597 = vmatpush1.msra.mxu1 %v2196_v43  ;;  %v2264_v18 = vld [vmem:[#allocation8 + $0x2d0] sm:$0xff]  ;;  %v2261_v43 = vld [vmem:[#allocation8 + $0x2b8] sm:$0xff] }
 0x960   :  { %2652 = vmatpush1.msra.mxu0 %v2356_v45  ;;  %2598 = vmatprep.subr.mxu1 %v2193_v48  ;;  %v2424_v23 = vld [vmem:[#allocation8 + $0x7d0] sm:$0xff]  ;;  %v2421_v45 = vld [vmem:[#allocation8 + $0x7b8] sm:$0xff] }
 0x961   :  { %2653 = vmatprep.subr.mxu0 %v2353_v49  ;;  %2599 = vmatpush1.msra.mxu1 %v2192_v51  ;;  %v2260_v48 = vld [vmem:[#allocation8 + $0x2b0] sm:$0xff]  ;;  %v2257_v51 = vld [vmem:[#allocation8 + $0x298] sm:$0xff] }
 0x962   :  { %2654 = vmatpush1.msra.mxu0 %v2352_v41  ;;  %2600 = vmatprep.subr.mxu1 %v2189_v53  ;;  %v2420_v49 = vld [vmem:[#allocation8 + $0x7b0] sm:$0xff]  ;;  %v2417_v41 = vld [vmem:[#allocation8 + $0x798] sm:$0xff] }
 0x963   :  { %2655 = vmatprep.subr.mxu0 %v2349_v54  ;;  %2601 = vmatpush1.msra.mxu1 %v2188_v57  ;;  %v2256_v53 = vld [vmem:[#allocation8 + $0x290] sm:$0xff]  ;;  %v2253_v57 = vld [vmem:[#allocation8 + $0x278] sm:$0xff] }
 0x964   :  { %2656 = vmatpush1.msra.mxu0 %v2348_v40  ;;  %2602 = vmatprep.subr.mxu1 %v2185_v38  ;;  %v2416_v54 = vld [vmem:[#allocation8 + $0x790] sm:$0xff]  ;;  %v2413_v40 = vld [vmem:[#allocation8 + $0x778] sm:$0xff] }
 0x965   :  { %2657 = vmatprep.subr.mxu0 %v2345_v34  ;;  %2603 = vmatpush1.msra.mxu1 %v2184_v46  ;;  %v2252_v38 = vld [vmem:[#allocation8 + $0x270] sm:$0xff]  ;;  %v2249_v46 = vld [vmem:[#allocation8 + $0x258] sm:$0xff] }
 0x966   :  { %2658 = vmatpush1.msra.mxu0 %v2344_v6  ;;  %2604 = vmatprep.subr.mxu1 %v2181_v58  ;;  %v2412_v34 = vld [vmem:[#allocation8 + $0x770] sm:$0xff]  ;;  %v2409_v6 = vld [vmem:[#allocation8 + $0x758] sm:$0xff] }
 0x967   :  { %2659 = vmatprep.subr.mxu0 %v2341_v60  ;;  %2605 = vmatpush1.msra.mxu1 %v2180_v50  ;;  %v2248_v58 = vld [vmem:[#allocation8 + $0x250] sm:$0xff]  ;;  %v2245_v50 = vld [vmem:[#allocation8 + $0x238] sm:$0xff] }
 0x968   :  { %2660 = vmatpush1.msra.mxu0 %v2340_v30  ;;  %2606 = vmatprep.subr.mxu1 %v2177_v32  ;;  %v2408_v60 = vld [vmem:[#allocation8 + $0x750] sm:$0xff]  ;;  %v2405_v30 = vld [vmem:[#allocation8 + $0x738] sm:$0xff] }
 0x969   :  { %2661 = vmatprep.subr.mxu0 %v2337_v39  ;;  %2607 = vmatpush1.msra.mxu1 %v2176_v61  ;;  %v2244_v32 = vld [vmem:[#allocation8 + $0x230] sm:$0xff]  ;;  %v2241_v61 = vld [vmem:[#allocation8 + $0x218] sm:$0xff] }
 0x96a   :  { %2662 = vmatpush1.msra.mxu0 %v2336_v62  ;;  %2608 = vmatprep.subr.mxu1 %v2301_v63  ;;  %v2404_v39 = vld [vmem:[#allocation8 + $0x730] sm:$0xff]  ;;  %v2401_v62 = vld [vmem:[#allocation8 + $0x718] sm:$0xff] }
 0x96b   :  { %2663 = vmatprep.subr.mxu0 %v2333_v52  ;;  %2609 = vmatpush2.msra.mxu1 %v2300_v1  ;;  %v2240_v63 = vld [vmem:[#allocation8 + $0x210] sm:$0xff]  ;;  %v2397_v1 = vld [vmem:[#allocation8 + $0x6f8] sm:$0xff] }
 0x96c   :  { %2664 = vmatpush1.msra.mxu0 %v2332_v21  ;;  %2610 = vmatprep.subr.mxu1 %v2297_v33  ;;  %v2400_v52 = vld [vmem:[#allocation8 + $0x710] sm:$0xff]  ;;  %v2393_v33 = vld [vmem:[#allocation8 + $0x6d8] sm:$0xff] }
 0x96d   :  { %2665 = vmatprep.subr.mxu0 %v2329_v2  ;;  %2611 = vmatpush2.msra.mxu1 %v2296_v3  ;;  %v2396_v21 = vld [vmem:[#allocation8 + $0x6f0] sm:$0xff]  ;;  %v2389_v3 = vld [vmem:[#allocation8 + $0x6b8] sm:$0xff] }
 0x96e   :  { %2666 = vmatpush1.msra.mxu0 %v2328_v0  ;;  %2612 = vmatprep.subr.mxu1 %v2293_v26  ;;  %v2392_v2 = vld [vmem:[#allocation8 + $0x6d0] sm:$0xff]  ;;  %v2385_v26 = vld [vmem:[#allocation8 + $0x698] sm:$0xff] }
 0x96f   :  { %2667 = vmatprep.subr.mxu0 %v2325_v55  ;;  %2613 = vmatpush2.msra.mxu1 %v2292_v44  ;;  %v2388_v0 = vld [vmem:[#allocation8 + $0x6b0] sm:$0xff]  ;;  %v2381_v44 = vld [vmem:[#allocation8 + $0x678] sm:$0xff] }
 0x970   :  { %2668 = vmatpush1.msra.mxu0 %v2324_v56  ;;  %2614 = vmatprep.subr.mxu1 %v2289_v59  ;;  %v2384_v55 = vld [vmem:[#allocation8 + $0x690] sm:$0xff]  ;;  %v2377_v59 = vld [vmem:[#allocation8 + $0x658] sm:$0xff] }
 0x971   :  { %2669 = vmatprep.subr.mxu0 %v2321_v47  ;;  %2615 = vmatpush2.msra.mxu1 %v2288_v25  ;;  %v2380_v56 = vld [vmem:[#allocation8 + $0x670] sm:$0xff] }
 0x972   :  { %2670 = vmatpush1.msra.mxu0 %v2320_v4  ;;  %2616 = vmatprep.subr.mxu1 %v2285_v5  ;;  %v2376_v47 = vld [vmem:[#allocation8 + $0x650] sm:$0xff]  ;;  %v2369_v4 = vld [vmem:[#allocation8 + $0x618] sm:$0xff] }
 0x973   :  { %2671 = vmatprep.subr.mxu0 %v2317_v22  ;;  %2617 = vmatpush2.msra.mxu1 %v2284_v36  ;;  %v2372_v25 = vld [vmem:[#allocation8 + $0x630] sm:$0xff]  ;;  %v2432_v36 = vpop.permute.xlu0 %2431 }
 0x974   :  { %2672 = vmatpush1.msra.mxu0 %v2316_v7  ;;  %2618 = vmatprep.subr.mxu1 %v2281_v8  ;;  %v2368_v5 = vld [vmem:[#allocation8 + $0x610] sm:$0xff] }
 0x975   :  { %2673 = vmatprep.subr.mxu0 %v2313_v35  ;;  %2619 = vmatpush2.msra.mxu1 %v2280_v14 }
 0x976   :  { %2674 = vmatpush1.msra.mxu0 %v2312_v15  ;;  %2620 = vmatprep.subr.mxu1 %v2277_v13 }
 0x977   :  { %2675 = vmatprep.subr.mxu0 %v2309_v42  ;;  %2621 = vmatpush2.msra.mxu1 %v2276_v9 }
 0x978   :  { %2676 = vmatpush1.msra.mxu0 %v2308_v10  ;;  %2622 = vmatprep.subr.mxu1 %v2273_v12 }
 0x979   :  { %2677 = vmatprep.subr.mxu0 %v2305_v17  ;;  %2623 = vmatpush2.msra.mxu1 %v2272_v19 }
 0x97a   :  { %2678 = vmatpush1.msra.mxu0 %v2304_v24  ;;  %2624 = vmatprep.subr.mxu1 %v2269_v29 }
 0x97b   :  { %2679 = vmatprep.subr.mxu0 %v2429_v27  ;;  %2625 = vmatpush2.msra.mxu1 %v2268_v28 }
 0x97c   :  { %2680 = vmatpush2.msra.mxu0 %v2428_v37  ;;  %2626 = vmatprep.subr.mxu1 %v2265_v31 }
 0x97d   :  { %2681 = vmatprep.subr.mxu0 %v2425_v20  ;;  %2627 = vmatpush2.msra.mxu1 %v2264_v18 }
 0x97e   :  { %2682 = vmatpush2.msra.mxu0 %v2424_v23  ;;  %2628 = vmatprep.subr.mxu1 %v2261_v43 }
 0x97f   :  { %2683 = vmatprep.subr.mxu0 %v2421_v45  ;;  %2629 = vmatpush2.msra.mxu1 %v2260_v48 }
 0x980   :  { %2684 = vmatpush2.msra.mxu0 %v2420_v49  ;;  %2630 = vmatprep.subr.mxu1 %v2257_v51 }
 0x981   :  { %2685 = vmatprep.subr.mxu0 %v2417_v41  ;;  %2631 = vmatpush2.msra.mxu1 %v2256_v53 }
 0x982   :  { %2686 = vmatpush2.msra.mxu0 %v2416_v54  ;;  %2632 = vmatprep.subr.mxu1 %v2253_v57 }
 0x983   :  { %2687 = vmatprep.subr.mxu0 %v2413_v40  ;;  %2633 = vmatpush2.msra.mxu1 %v2252_v38 }
 0x984   :  { %2688 = vmatpush2.msra.mxu0 %v2412_v34  ;;  %2634 = vmatprep.subr.mxu1 %v2249_v46 }
 0x985   :  { %2689 = vmatprep.subr.mxu0 %v2409_v6  ;;  %2635 = vmatpush2.msra.mxu1 %v2248_v58 }
 0x986   :  { %2690 = vmatpush2.msra.mxu0 %v2408_v60  ;;  %2636 = vmatprep.subr.mxu1 %v2245_v50 }
 0x987   :  { %2691 = vmatprep.subr.mxu0 %v2405_v30  ;;  %2637 = vmatpush2.msra.mxu1 %v2244_v32 }
 0x988   :  { %2692 = vmatpush2.msra.mxu0 %v2404_v39  ;;  %2638 = vmatprep.subr.mxu1 %v2241_v61 }
 0x989   :  { %2693 = vmatprep.subr.mxu0 %v2401_v62  ;;  %2639 = vmatpush2.msra.mxu1 %v2240_v63 }
 0x98a   :  { %2694 = vmatpush2.msra.mxu0 %v2400_v52  ;;  %2641 = vmatmul.mubr.f32.vlgmr.msra.gmra.mxu1 %v3641_v11  ;;  %v2373_v11 = vld [vmem:[#allocation8 + $0x638] sm:$0xff] }
 0x98b   :  { %2695 = vmatprep.subr.mxu0 %v2397_v1 }
 0x98c   :  { %2696 = vmatpush2.msra.mxu0 %v2396_v21 }
 0x98d   :  { %2697 = vmatprep.subr.mxu0 %v2393_v33 }
 0x98e   :  { %2698 = vmatpush2.msra.mxu0 %v2392_v2 }
 0x98f   :  { %2699 = vmatprep.subr.mxu0 %v2389_v3 }
 0x990   :  { %2700 = vmatpush2.msra.mxu0 %v2388_v0 }
 0x991   :  { %2701 = vmatprep.subr.mxu0 %v2385_v26 }
 0x992   :  { %2702 = vmatpush2.msra.mxu0 %v2384_v55 }
 0x993   :  { %2703 = vmatprep.subr.mxu0 %v2381_v44 }
 0x994   :  { %2704 = vmatpush2.msra.mxu0 %v2380_v56 }
 0x995   :  { %2705 = vmatprep.subr.mxu0 %v2377_v59 }
 0x996   :  { %2706 = vmatpush2.msra.mxu0 %v2376_v47 }
 0x997   :  { %2707 = vmatprep.subr.mxu0 %v2373_v11 }
 0x998   :  { %2708 = vmatpush2.msra.mxu0 %v2372_v25 }
 0x999   :  { %2709 = vmatprep.subr.mxu0 %v2369_v4 }
 0x99a   :  { %2710 = vmatpush2.msra.mxu0 %v2368_v5 }
 0x99b   :  { %2712 = vmatmul.mubr.f32.vlgmr.msra.gmra.mxu0 %v3644_v16 }
 0xa0a   :  { %v2500_v22 = vpop.f32.mrf.mxu1 }
 0xa0b   :  { %v2501_v8 = vadd.f32 %v2500_v22, %v2432_v36 }
 0xa0c   :  { %v2502_v7 = vpop.f32.mrf.mxu1 }
 0xa0d   :  { %v2503_v14 = vadd.f32 %v2502_v7, %v2432_v36 }
 0xa1a   :  { %v2571_v35 = vpop.f32.mrf.mxu0 }
 0xa1b   :  { %v2572_v15 = vadd.f32 %v2571_v35, %v2501_v8 }
 0xa1c   :  { %v2573_v13 = vpop.f32.mrf.mxu0 }
 0xa1d   :  { %v2574_v42 = vadd.f32 %v2573_v13, %v2503_v14  ;;  %3001 = vtanh.f32 %v2572_v15 }
 0xa1f   :  { %3003 = vtanh.f32 %v2574_v42 }
 0xa2a   :  { %v3002_v9 = vpop.eup %3001 }
 0xa2c   :  { %v3004_v10 = vpop.eup %3003 }
 0xa2d   :  { %v2724_v12 = vcombine.low %v3002_v9, %v3004_v10 }
 0xa2f   :  { %2726 = vst [vmem:[%s3659_s4] sm:$0xff] %v2724_v12 }
 0xa4a   :  { %v2642_v17 = vpop.f32.mrf.mxu1 }
 0xa4b   :  { %v2643_v19 = vadd.f32 %v2642_v17, %v2432_v36 }
 0xa4c   :  { %v2644_v16 = vpop.f32.mrf.mxu1 }
 0xa4d   :  { %v2645_v29 = vadd.f32 %v2644_v16, %v2432_v36 }
 0xa5b   :  { %v2713_v24 = vpop.f32.mrf.mxu0 }
 0xa5c   :  { %v2714_v27 = vadd.f32 %v2713_v24, %v2643_v19 }
 0xa5d   :  { %v2715_v28 = vpop.f32.mrf.mxu0 }
 0xa5e   :  { %v2716_v37 = vadd.f32 %v2715_v28, %v2645_v29  ;;  %3005 = vtanh.f32 %v2714_v27 }
 0xa60   :  { %3007 = vtanh.f32 %v2716_v37 }
 0xa6b   :  { %v3006_v31 = vpop.eup %3005 }
 0xa6d   :  { %v3008_v20 = vpop.eup %3007 }
 0xa6e   :  { %v2729_v18 = vcombine.low %v3006_v31, %v3008_v20 }
 0xa70   :  { %2771 = vst [vmem:[%s3659_s4 + $0x8] sm:$0xff] %v2729_v18 }
 0xa71   :  { %2737 = vsyncpa [#allocation7], 1 }
 0xa72   :  { %2738 = vsyncpa [#allocation9], 1 }

</bundles_post_ra>
